<compile_context>
chip_gen: v5e
topology: v5e:2x2
jax: 0.10.0
libtpu: 0.0.40
codegen_flags: <defaults>
</compile_context>

<pallas_src>
import math
import functools

import jax
import jax.numpy as jnp
from jax.experimental import pallas as pl
from jax.experimental.pallas import tpu as pltpu


# ----------------------------------------------------------------------------
# Kernel
# ----------------------------------------------------------------------------
def _layer_norm(x, g, b, eps=1e-5):
    mu = jnp.mean(x, axis=-1, keepdims=True)
    var = jnp.mean((x - mu) ** 2, axis=-1, keepdims=True)
    return (x - mu) * jax.lax.rsqrt(var + eps) * g + b


def seq_transformer_kernel(x_ref, we_ref, be_ref, ct_ref, pe_ref,
                           ln1g_ref, ln1b_ref, wqkv_ref, wout_ref, bout_ref,
                           ln2g_ref, ln2b_ref, wf1_ref, bf1_ref, wf2_ref, bf2_ref,
                           o_ref, *, heads, mxu_dtype):
    # x_ref is the batch tile of the *zero-padded* sequence: (TB, N, C) where
    # row 0 of each batch element is zeros (placeholder for the class token).
    TB, N, C = x_ref.shape
    depth, D, _ = wqkv_ref.shape
    dh = D // heads
    scale = D ** (-0.5)            # full-dim scale, as in the PyTorch module

    def mxdot(a, w):
        # MXU matmul; optionally bf16 operands (v6e/v7x), f32 accumulation.
        return jnp.dot(a.astype(mxu_dtype), w.astype(mxu_dtype),
                       preferred_element_type=jnp.float32)

    # ---- patch_to_embedding + positional encoding -------------------------
    emb = mxdot(x_ref[...].reshape(TB * N, C), we_ref[...]) + be_ref[...]
    emb = emb.reshape(TB, N, D) + pe_ref[...][None]        # pe row 0 is zeros

    # ---- class token: overwrite row 0 of every batch element (no concat) ---
    pos = jax.lax.broadcasted_iota(jnp.int32, (TB, N, D), 1)
    ct_b = jnp.broadcast_to(ct_ref[...][None], (TB, N, D))
    x = jnp.where(pos == 0, ct_b, emb).reshape(TB * N, D)

    # ---- transformer layers (unrolled; weights resident in VMEM) ----------
    for l in range(depth):
        # PreNorm + Attention (NO residual, per the original module)
        xn = _layer_norm(x, ln1g_ref[l], ln1b_ref[l])                 # (TB*N, D)
        qkv = mxdot(xn, wqkv_ref[l])                                  # (TB*N, 3D)
        q = (qkv[:, 0 * D:1 * D] * scale).reshape(TB, N, D)           # scale hoisted
        k = qkv[:, 1 * D:2 * D].reshape(TB, N, D)
        v = qkv[:, 2 * D:3 * D].reshape(TB, N, D)

        # Per-head scores/softmax/context with 3-D single-batch-dim einsums
        # (guaranteed Mosaic lowering).  Head outputs are concatenated once
        # so the output projection is ONE (TB*N, D) @ (D, D) matmul.
        # TODO(synk): fold heads into the einsum batch axis (whole-D scores)
        # when the (b n h d)->(b h n d) relayout is a safe in-kernel op.
        ctx_heads = []
        for h in range(heads):
            sl = slice(h * dh, (h + 1) * dh)
            qh, kh, vh = q[:, :, sl], k[:, :, sl], v[:, :, sl]        # (TB, N, dh)
            dots = jnp.einsum('bnd,bmd->bnm', qh, kh,
                              preferred_element_type=jnp.float32)     # (TB, N, N)
            dots = dots - jnp.max(dots, axis=-1, keepdims=True)
            p = jnp.exp(dots)
            pn = p * pl.reciprocal(jnp.sum(p, axis=-1, keepdims=True), approx=True)
            ctx_heads.append(jnp.einsum('bnm,bmd->bnd', pn, vh,
                                        preferred_element_type=jnp.float32))
        ctx = jnp.concatenate(ctx_heads, axis=-1).reshape(TB * N, D)  # head concat (once)
        x = mxdot(ctx, wout_ref[l]) + bout_ref[l]                     # no residual here

        # Residual(PreNorm(FeedForward))
        xn2 = _layer_norm(x, ln2g_ref[l], ln2b_ref[l])
        hid = jnp.maximum(mxdot(xn2, wf1_ref[l]) + bf1_ref[l], 0.0)
        x = x + mxdot(hid, wf2_ref[l]) + bf2_ref[l]

    # ---- class-token rows only: single reshape + slice --------------------
    o_ref[...] = x.reshape(TB, N, D)[:, 0:1, :].astype(o_ref.dtype)


# ----------------------------------------------------------------------------
# Wrapper
# ----------------------------------------------------------------------------
def _pick_tile_b(B, N, max_rows=512):
    """Largest divisor of B that keeps >=2 grid steps (v7x megacore gets both
    TensorCores busy) and a bounded per-step row count."""
    best = 1
    for d in range(1, B + 1):
        if B % d != 0:
            continue
        if d * N > max_rows:
            continue
        if (B // d) < min(2, B):
            continue
        best = d
    return best


def _vmem_limit_bytes(weights, tile_b, N, dim, mlp_dim, heads, n_channel):
    """Rough VMEM budget: resident weights + per-step activations, with
    headroom for Mosaic temporaries / input double-buffering.  Clamped to the
    v7x physical ceiling."""
    wbytes = sum(math.prod(w.shape) * w.dtype.itemsize for w in weights)
    rows = tile_b * N
    act = 4 * rows * (8 * dim + mlp_dim) \
        + 4 * tile_b * heads * N * N \
        + 4 * 2 * tile_b * N * n_channel
    est = 2 * wbytes + 4 * act + (1 << 20)
    return int(min(64 << 20, max(16 << 20, est)))


def seq_transformer_forward(forward_seq, params, *, dim, heads, tile_b=None,
                            mxu_dtype=jnp.float32):
    B, n, C = forward_seq.shape
    N = n + 1                                   # +1 class token
    if tile_b is None:
        tile_b = _pick_tile_b(B, N)
    assert B % tile_b == 0, (B, tile_b)

    # Layout plumbing (plain XLA, outside the kernel): prepend one zero row
    # per batch element (class-token slot) and one zero row to the positional
    # table, so the kernel works on a uniform (TB, N, ...) row space with no
    # in-kernel concatenate.
    x_pad = jnp.pad(forward_seq.astype(jnp.float32), ((0, 0), (1, 0), (0, 0)))
    pe_pad = jnp.pad(params['pe'].astype(jnp.float32), ((1, 0), (0, 0)))

    weights = [params['w_embed'], params['b_embed'], params['c_token'], pe_pad,
               params['ln1g'], params['ln1b'], params['wqkv'], params['wout'],
               params['bout'], params['ln2g'], params['ln2b'], params['wf1'],
               params['bf1'], params['wf2'], params['bf2']]

    def _full_spec(a):
        nd = a.ndim
        return pl.BlockSpec(a.shape, lambda i, _nd=nd: (0,) * _nd)

    in_specs = [pl.BlockSpec((tile_b, N, C), lambda i: (i, 0, 0))]
    in_specs += [_full_spec(w) for w in weights]

    mlp_dim = params['wf1'].shape[-1]
    vmem_limit = _vmem_limit_bytes(weights, tile_b, N, dim, mlp_dim, heads, C)

    kern = functools.partial(seq_transformer_kernel, heads=heads,
                             mxu_dtype=mxu_dtype)
    out = pl.pallas_call(
        kern,
        grid=(B // tile_b,),
        out_shape=jax.ShapeDtypeStruct((B, 1, dim), jnp.float32),
        in_specs=in_specs,
        out_specs=pl.BlockSpec((tile_b, 1, dim), lambda i: (i, 0, 0)),
        compiler_params=pltpu.CompilerParams(
            dimension_semantics=("parallel",),
            vmem_limit_bytes=vmem_limit),
    )(x_pad, *weights)
    return out.reshape(B, dim)


# ----------------------------------------------------------------------------
# Pure-JAX reference for validation
# ----------------------------------------------------------------------------
def ref_forward(x, params, *, dim, heads):
    def ln(t, g, b):
        mu = t.mean(-1, keepdims=True)
        var = ((t - mu) ** 2).mean(-1, keepdims=True)
        return (t - mu) / jnp.sqrt(var + 1e-5) * g + b

    x = x @ params['w_embed'] + params['b_embed'] + params['pe']
    B = x.shape[0]
    ct = jnp.broadcast_to(params['c_token'][None], (B, 1, dim))
    x = jnp.concatenate([ct, x], axis=1)
    dh = dim // heads
    depth = params['wqkv'].shape[0]
    for l in range(depth):
        xn = ln(x, params['ln1g'][l], params['ln1b'][l])
        qkv = xn @ params['wqkv'][l]
        q, k, v = jnp.split(qkv, 3, -1)
        rs = lambda t: t.reshape(B, -1, heads, dh).transpose(0, 2, 1, 3)
        q, k, v = rs(q), rs(k), rs(v)
        dots = jnp.einsum('bhid,bhjd->bhij', q, k) * dim ** (-0.5)
        attn = jax.nn.softmax(dots, -1)
        out = jnp.einsum('bhij,bhjd->bhid', attn, v)
        out = out.transpose(0, 2, 1, 3).reshape(B, -1, dim)
        x = out @ params['wout'][l] + params['bout'][l]    # no residual (as in module)
        xn2 = ln(x, params['ln2g'][l], params['ln2b'][l])
        h = jax.nn.relu(xn2 @ params['wf1'][l] + params['bf1'][l])
        x = x + (h @ params['wf2'][l] + params['bf2'][l])
    return x[:, 0]


# ----------------------------------------------------------------------------
if __name__ == "__main__":
    # small shapes consistent with Seq_Transformer(n_channel, len_sw, n_classes, ...)
    # B=4 so the batch grid has 2 steps (exercises the "parallel" grid axis).
    B, len_sw, n_channel = 4, 8, 4
    dim, depth, heads, mlp_dim = 32, 2, 4, 64
    n_classes = 6   # classifier exists in __init__ but is unused by forward

    key = jax.random.PRNGKey(0)
    keys = iter(jax.random.split(key, 64))
    nrm = lambda shape, s=0.02: s * jax.random.normal(next(keys), shape, dtype=jnp.float32)

    # PositionalEncoding buffer (max_len = len_sw)
    position = jnp.arange(len_sw, dtype=jnp.float32)[:, None]
    div_term = jnp.exp(jnp.arange(0, dim, 2, dtype=jnp.float32) * (-math.log(10000.0) / dim))
    pe = jnp.zeros((len_sw, dim), dtype=jnp.float32)
    pe = pe.at[:, 0::2].set(jnp.sin(position * div_term))
    pe = pe.at[:, 1::2].set(jnp.cos(position * div_term))

    params = {
        'w_embed': nrm((n_channel, dim)),
        'b_embed': nrm((1, dim)),
        'c_token': nrm((1, dim), 1.0),
        'pe': pe,
        # per-layer weights stacked on a leading depth axis
        'ln1g': jnp.ones((depth, 1, dim), jnp.float32),
        'ln1b': jnp.zeros((depth, 1, dim), jnp.float32),
        'wqkv': nrm((depth, dim, 3 * dim)),
        'wout': nrm((depth, dim, dim)),
        'bout': nrm((depth, 1, dim)),
        'ln2g': jnp.ones((depth, 1, dim), jnp.float32),
        'ln2b': jnp.zeros((depth, 1, dim), jnp.float32),
        'wf1': nrm((depth, dim, mlp_dim)),
        'bf1': nrm((depth, 1, mlp_dim)),
        'wf2': nrm((depth, mlp_dim, dim)),
        'bf2': nrm((depth, 1, dim)),
    }

    forward_seq = jax.random.normal(next(keys), (B, len_sw, n_channel), dtype=jnp.float32)

    c_t = seq_transformer_forward(forward_seq, params, dim=dim, heads=heads)
    c_t = jax.block_until_ready(c_t)

    ref = ref_forward(forward_seq, params, dim=dim, heads=heads)
    assert c_t.shape == (B, dim), c_t.shape
    assert bool(jnp.all(jnp.isfinite(c_t)))
    # tolerance slightly looser than f32-exact because the softmax denominator
    # uses the EUP approximate reciprocal (pl.reciprocal(approx=True))
    assert jnp.allclose(c_t, ref, rtol=1e-2, atol=1e-3), float(jnp.max(jnp.abs(c_t - ref)))
    print("KERNEL_OK")
</pallas_src>

<mosaic_0001>
module attributes {stable_mosaic.version = 11 : i64} {
  func.func @seq_transformer_kernel(%arg0: i32, %arg1: memref<2x9x4xf32, #tpu.memory_space<vmem>>, %arg2: memref<4x32xf32, #tpu.memory_space<vmem>>, %arg3: memref<1x32xf32, #tpu.memory_space<vmem>>, %arg4: memref<1x32xf32, #tpu.memory_space<vmem>>, %arg5: memref<9x32xf32, #tpu.memory_space<vmem>>, %arg6: memref<2x1x32xf32, #tpu.memory_space<vmem>>, %arg7: memref<2x1x32xf32, #tpu.memory_space<vmem>>, %arg8: memref<2x32x96xf32, #tpu.memory_space<vmem>>, %arg9: memref<2x32x32xf32, #tpu.memory_space<vmem>>, %arg10: memref<2x1x32xf32, #tpu.memory_space<vmem>>, %arg11: memref<2x1x32xf32, #tpu.memory_space<vmem>>, %arg12: memref<2x1x32xf32, #tpu.memory_space<vmem>>, %arg13: memref<2x32x64xf32, #tpu.memory_space<vmem>>, %arg14: memref<2x1x64xf32, #tpu.memory_space<vmem>>, %arg15: memref<2x64x32xf32, #tpu.memory_space<vmem>>, %arg16: memref<2x1x32xf32, #tpu.memory_space<vmem>>, %arg17: memref<2x1x32xf32, #tpu.memory_space<vmem>>) attributes {dimension_semantics = [#tpu.dimension_semantics<parallel>], iteration_bounds = array<i64: 2>, scalar_prefetch = 0 : i64, scratch_operands = 0 : i64, tpu.core_type = #tpu.core_type<tc>, window_params = [{transform_indices = @transform_0, window_bounds = array<i64: 2, 9, 4>}, {pipeline_mode = #tpu.pipeline_mode<synchronous>, transform_indices = @transform_1, window_bounds = array<i64: 4, 32>}, {pipeline_mode = #tpu.pipeline_mode<synchronous>, transform_indices = @transform_2, window_bounds = array<i64: 1, 32>}, {pipeline_mode = #tpu.pipeline_mode<synchronous>, transform_indices = @transform_3, window_bounds = array<i64: 1, 32>}, {pipeline_mode = #tpu.pipeline_mode<synchronous>, transform_indices = @transform_4, window_bounds = array<i64: 9, 32>}, {pipeline_mode = #tpu.pipeline_mode<synchronous>, transform_indices = @transform_5, window_bounds = array<i64: 2, 1, 32>}, {pipeline_mode = #tpu.pipeline_mode<synchronous>, transform_indices = @transform_6, window_bounds = array<i64: 2, 1, 32>}, {pipeline_mode = #tpu.pipeline_mode<synchronous>, transform_indices = @transform_7, window_bounds = array<i64: 2, 32, 96>}, {pipeline_mode = #tpu.pipeline_mode<synchronous>, transform_indices = @transform_8, window_bounds = array<i64: 2, 32, 32>}, {pipeline_mode = #tpu.pipeline_mode<synchronous>, transform_indices = @transform_9, window_bounds = array<i64: 2, 1, 32>}, {pipeline_mode = #tpu.pipeline_mode<synchronous>, transform_indices = @transform_10, window_bounds = array<i64: 2, 1, 32>}, {pipeline_mode = #tpu.pipeline_mode<synchronous>, transform_indices = @transform_11, window_bounds = array<i64: 2, 1, 32>}, {pipeline_mode = #tpu.pipeline_mode<synchronous>, transform_indices = @transform_12, window_bounds = array<i64: 2, 32, 64>}, {pipeline_mode = #tpu.pipeline_mode<synchronous>, transform_indices = @transform_13, window_bounds = array<i64: 2, 1, 64>}, {pipeline_mode = #tpu.pipeline_mode<synchronous>, transform_indices = @transform_14, window_bounds = array<i64: 2, 64, 32>}, {pipeline_mode = #tpu.pipeline_mode<synchronous>, transform_indices = @transform_15, window_bounds = array<i64: 2, 1, 32>}, {transform_indices = @transform_16, window_bounds = array<i64: 2, 1, 32>}]} {
    %c0 = arith.constant 0 : index
    %c0_0 = arith.constant 0 : index
    %c0_1 = arith.constant 0 : index
    %0 = vector.load %arg1[%c0, %c0_0, %c0_1] : memref<2x9x4xf32, #tpu.memory_space<vmem>>, vector<2x9x4xf32>
    %1 = vector.shape_cast %0 : vector<2x9x4xf32> to vector<18x4xf32>
    %c0_2 = arith.constant 0 : index
    %c0_3 = arith.constant 0 : index
    %2 = vector.load %arg2[%c0_2, %c0_3] : memref<4x32xf32, #tpu.memory_space<vmem>>, vector<4x32xf32>
    %cst = arith.constant dense<0.000000e+00> : vector<18x32xf32>
    %3 = tpu.matmul %1, %2, %cst {dimension_numbers = #tpu.dot_dimension_numbers<[1], [0], [0], [1], [0, 0, 1, 1], [], []>} : vector<18x4xf32>, vector<4x32xf32>, vector<18x32xf32> -> vector<18x32xf32>
    %c0_4 = arith.constant 0 : index
    %c0_5 = arith.constant 0 : index
    %4 = vector.load %arg3[%c0_4, %c0_5] : memref<1x32xf32, #tpu.memory_space<vmem>>, vector<1x32xf32>
    %5 = vector.broadcast %4 : vector<1x32xf32> to vector<18x32xf32>
    %6 = arith.addf %3, %5 : vector<18x32xf32>
    %7 = vector.shape_cast %6 : vector<18x32xf32> to vector<2x9x32xf32>
    %c0_6 = arith.constant 0 : index
    %c0_7 = arith.constant 0 : index
    %8 = vector.load %arg5[%c0_6, %c0_7] : memref<9x32xf32, #tpu.memory_space<vmem>>, vector<9x32xf32>
    %9 = vector.shape_cast %8 : vector<9x32xf32> to vector<1x9x32xf32>
    %10 = vector.broadcast %9 : vector<1x9x32xf32> to vector<2x9x32xf32>
    %11 = arith.addf %7, %10 : vector<2x9x32xf32>
    %12 = tpu.iota {dimensions = array<i32: 1>} : vector<2x9x32xi32>
    %c0_8 = arith.constant 0 : index
    %c0_9 = arith.constant 0 : index
    %13 = vector.load %arg4[%c0_8, %c0_9] : memref<1x32xf32, #tpu.memory_space<vmem>>, vector<1x32xf32>
    %14 = vector.shape_cast %13 : vector<1x32xf32> to vector<1x1x32xf32>
    %15 = vector.shape_cast %14 : vector<1x1x32xf32> to vector<1x1x32xf32>
    %16 = vector.broadcast %15 : vector<1x1x32xf32> to vector<2x9x32xf32>
    %c0_i32 = arith.constant 0 : i32
    %17 = vector.broadcast %c0_i32 : i32 to vector<2x9x32xi32>
    %18 = arith.cmpi eq, %12, %17 : vector<2x9x32xi32>
    %19 = arith.select %18, %16, %11 : vector<2x9x32xi1>, vector<2x9x32xf32>
    %20 = vector.shape_cast %19 : vector<2x9x32xf32> to vector<18x32xf32>
    %c0_10 = arith.constant 0 : index
    %c0_11 = arith.constant 0 : index
    %c0_12 = arith.constant 0 : index
    %21 = vector.load %arg6[%c0_10, %c0_11, %c0_12] : memref<2x1x32xf32, #tpu.memory_space<vmem>>, vector<1x1x32xf32>
    %22 = vector.shape_cast %21 : vector<1x1x32xf32> to vector<1x32xf32>
    %c0_13 = arith.constant 0 : index
    %c0_14 = arith.constant 0 : index
    %c0_15 = arith.constant 0 : index
    %23 = vector.load %arg7[%c0_13, %c0_14, %c0_15] : memref<2x1x32xf32, #tpu.memory_space<vmem>>, vector<1x1x32xf32>
    %24 = vector.shape_cast %23 : vector<1x1x32xf32> to vector<1x32xf32>
    %cst_16 = arith.constant dense<0.000000e+00> : vector<18xf32>
    %25 = vector.multi_reduction <add>, %20, %cst_16 [1] : vector<18x32xf32> to vector<18xf32>
    %26 = vector.shape_cast %25 : vector<18xf32> to vector<18x1xf32>
    %cst_17 = arith.constant 3.200000e+01 : f32
    %27 = vector.broadcast %cst_17 : f32 to vector<18x1xf32>
    %28 = arith.divf %26, %27 : vector<18x1xf32>
    %29 = vector.broadcast %28 : vector<18x1xf32> to vector<18x32xf32>
    %30 = arith.subf %20, %29 : vector<18x32xf32>
    %31 = arith.mulf %30, %30 : vector<18x32xf32>
    %cst_18 = arith.constant dense<0.000000e+00> : vector<18xf32>
    %32 = vector.multi_reduction <add>, %31, %cst_18 [1] : vector<18x32xf32> to vector<18xf32>
    %33 = vector.shape_cast %32 : vector<18xf32> to vector<18x1xf32>
    %cst_19 = arith.constant 3.200000e+01 : f32
    %34 = vector.broadcast %cst_19 : f32 to vector<18x1xf32>
    %35 = arith.divf %33, %34 : vector<18x1xf32>
    %36 = vector.broadcast %28 : vector<18x1xf32> to vector<18x32xf32>
    %37 = arith.subf %20, %36 : vector<18x32xf32>
    %cst_20 = arith.constant 9.99999974E-6 : f32
    %38 = vector.broadcast %cst_20 : f32 to vector<18x1xf32>
    %39 = arith.addf %35, %38 : vector<18x1xf32>
    %40 = math.rsqrt %39 : vector<18x1xf32>
    %41 = vector.broadcast %40 : vector<18x1xf32> to vector<18x32xf32>
    %42 = arith.mulf %37, %41 : vector<18x32xf32>
    %43 = vector.broadcast %22 : vector<1x32xf32> to vector<18x32xf32>
    %44 = arith.mulf %42, %43 : vector<18x32xf32>
    %45 = vector.broadcast %24 : vector<1x32xf32> to vector<18x32xf32>
    %46 = arith.addf %44, %45 : vector<18x32xf32>
    %c0_21 = arith.constant 0 : index
    %c0_22 = arith.constant 0 : index
    %c0_23 = arith.constant 0 : index
    %47 = vector.load %arg8[%c0_21, %c0_22, %c0_23] : memref<2x32x96xf32, #tpu.memory_space<vmem>>, vector<1x32x96xf32>
    %48 = vector.shape_cast %47 : vector<1x32x96xf32> to vector<32x96xf32>
    %cst_24 = arith.constant dense<0.000000e+00> : vector<18x96xf32>
    %49 = tpu.matmul %46, %48, %cst_24 {dimension_numbers = #tpu.dot_dimension_numbers<[1], [0], [0], [1], [0, 0, 1, 1], [], []>} : vector<18x32xf32>, vector<32x96xf32>, vector<18x96xf32> -> vector<18x96xf32>
    %50 = vector.extract_strided_slice %49 {offsets = [0, 0], sizes = [18, 32], strides = [1, 1]} : vector<18x96xf32> to vector<18x32xf32>
    %cst_25 = arith.constant 0.176776692 : f32
    %51 = vector.broadcast %cst_25 : f32 to vector<18x32xf32>
    %52 = arith.mulf %50, %51 : vector<18x32xf32>
    %53 = vector.shape_cast %52 : vector<18x32xf32> to vector<2x9x32xf32>
    %54 = vector.extract_strided_slice %49 {offsets = [0, 32], sizes = [18, 32], strides = [1, 1]} : vector<18x96xf32> to vector<18x32xf32>
    %55 = vector.shape_cast %54 : vector<18x32xf32> to vector<2x9x32xf32>
    %56 = vector.extract_strided_slice %49 {offsets = [0, 64], sizes = [18, 32], strides = [1, 1]} : vector<18x96xf32> to vector<18x32xf32>
    %57 = vector.shape_cast %56 : vector<18x32xf32> to vector<2x9x32xf32>
    %58 = vector.extract_strided_slice %53 {offsets = [0, 0, 0], sizes = [2, 9, 8], strides = [1, 1, 1]} : vector<2x9x32xf32> to vector<2x9x8xf32>
    %59 = vector.extract_strided_slice %55 {offsets = [0, 0, 0], sizes = [2, 9, 8], strides = [1, 1, 1]} : vector<2x9x32xf32> to vector<2x9x8xf32>
    %60 = vector.extract_strided_slice %57 {offsets = [0, 0, 0], sizes = [2, 9, 8], strides = [1, 1, 1]} : vector<2x9x32xf32> to vector<2x9x8xf32>
    "tpu.trace_start"() <{level = 10 : i32, message = "bnd,bmd->bnm"}> : () -> ()
    %cst_26 = arith.constant dense<0.000000e+00> : vector<2x9x9xf32>
    %61 = tpu.matmul %58, %59, %cst_26 {dimension_numbers = #tpu.dot_dimension_numbers<[2], [2], [1], [1], [0, 0, 0, 1, 1, 1], [0], [0]>} : vector<2x9x8xf32>, vector<2x9x8xf32>, vector<2x9x9xf32> -> vector<2x9x9xf32>
    "tpu.trace_stop"() : () -> ()
    %cst_27 = arith.constant dense<0xFF800000> : vector<2x9xf32>
    %62 = vector.multi_reduction <maximumf>, %61, %cst_27 [2] : vector<2x9x9xf32> to vector<2x9xf32>
    %63 = vector.shape_cast %62 : vector<2x9xf32> to vector<2x9x1xf32>
    %64 = vector.broadcast %63 : vector<2x9x1xf32> to vector<2x9x9xf32>
    %65 = arith.subf %61, %64 : vector<2x9x9xf32>
    %66 = math.exp %65 : vector<2x9x9xf32>
    %cst_28 = arith.constant dense<0.000000e+00> : vector<2x9xf32>
    %67 = vector.multi_reduction <add>, %66, %cst_28 [2] : vector<2x9x9xf32> to vector<2x9xf32>
    %68 = vector.shape_cast %67 : vector<2x9xf32> to vector<2x9x1xf32>
    %69 = tpu.reciprocal %68 {approx = true} : vector<2x9x1xf32> -> vector<2x9x1xf32>
    %70 = vector.broadcast %69 : vector<2x9x1xf32> to vector<2x9x9xf32>
    %71 = arith.mulf %66, %70 : vector<2x9x9xf32>
    "tpu.trace_start"() <{level = 10 : i32, message = "bnm,bmd->bnd"}> : () -> ()
    %cst_29 = arith.constant dense<0.000000e+00> : vector<2x9x8xf32>
    %72 = tpu.matmul %71, %60, %cst_29 {dimension_numbers = #tpu.dot_dimension_numbers<[2], [1], [1], [2], [0, 0, 0, 1, 1, 2], [0], [0]>} : vector<2x9x9xf32>, vector<2x9x8xf32>, vector<2x9x8xf32> -> vector<2x9x8xf32>
    "tpu.trace_stop"() : () -> ()
    %73 = vector.extract_strided_slice %53 {offsets = [0, 0, 8], sizes = [2, 9, 8], strides = [1, 1, 1]} : vector<2x9x32xf32> to vector<2x9x8xf32>
    %74 = vector.extract_strided_slice %55 {offsets = [0, 0, 8], sizes = [2, 9, 8], strides = [1, 1, 1]} : vector<2x9x32xf32> to vector<2x9x8xf32>
    %75 = vector.extract_strided_slice %57 {offsets = [0, 0, 8], sizes = [2, 9, 8], strides = [1, 1, 1]} : vector<2x9x32xf32> to vector<2x9x8xf32>
    "tpu.trace_start"() <{level = 10 : i32, message = "bnd,bmd->bnm"}> : () -> ()
    %cst_30 = arith.constant dense<0.000000e+00> : vector<2x9x9xf32>
    %76 = tpu.matmul %73, %74, %cst_30 {dimension_numbers = #tpu.dot_dimension_numbers<[2], [2], [1], [1], [0, 0, 0, 1, 1, 1], [0], [0]>} : vector<2x9x8xf32>, vector<2x9x8xf32>, vector<2x9x9xf32> -> vector<2x9x9xf32>
    "tpu.trace_stop"() : () -> ()
    %cst_31 = arith.constant dense<0xFF800000> : vector<2x9xf32>
    %77 = vector.multi_reduction <maximumf>, %76, %cst_31 [2] : vector<2x9x9xf32> to vector<2x9xf32>
    %78 = vector.shape_cast %77 : vector<2x9xf32> to vector<2x9x1xf32>
    %79 = vector.broadcast %78 : vector<2x9x1xf32> to vector<2x9x9xf32>
    %80 = arith.subf %76, %79 : vector<2x9x9xf32>
    %81 = math.exp %80 : vector<2x9x9xf32>
    %cst_32 = arith.constant dense<0.000000e+00> : vector<2x9xf32>
    %82 = vector.multi_reduction <add>, %81, %cst_32 [2] : vector<2x9x9xf32> to vector<2x9xf32>
    %83 = vector.shape_cast %82 : vector<2x9xf32> to vector<2x9x1xf32>
    %84 = tpu.reciprocal %83 {approx = true} : vector<2x9x1xf32> -> vector<2x9x1xf32>
    %85 = vector.broadcast %84 : vector<2x9x1xf32> to vector<2x9x9xf32>
    %86 = arith.mulf %81, %85 : vector<2x9x9xf32>
    "tpu.trace_start"() <{level = 10 : i32, message = "bnm,bmd->bnd"}> : () -> ()
    %cst_33 = arith.constant dense<0.000000e+00> : vector<2x9x8xf32>
    %87 = tpu.matmul %86, %75, %cst_33 {dimension_numbers = #tpu.dot_dimension_numbers<[2], [1], [1], [2], [0, 0, 0, 1, 1, 2], [0], [0]>} : vector<2x9x9xf32>, vector<2x9x8xf32>, vector<2x9x8xf32> -> vector<2x9x8xf32>
    "tpu.trace_stop"() : () -> ()
    %88 = vector.extract_strided_slice %53 {offsets = [0, 0, 16], sizes = [2, 9, 8], strides = [1, 1, 1]} : vector<2x9x32xf32> to vector<2x9x8xf32>
    %89 = vector.extract_strided_slice %55 {offsets = [0, 0, 16], sizes = [2, 9, 8], strides = [1, 1, 1]} : vector<2x9x32xf32> to vector<2x9x8xf32>
    %90 = vector.extract_strided_slice %57 {offsets = [0, 0, 16], sizes = [2, 9, 8], strides = [1, 1, 1]} : vector<2x9x32xf32> to vector<2x9x8xf32>
    "tpu.trace_start"() <{level = 10 : i32, message = "bnd,bmd->bnm"}> : () -> ()
    %cst_34 = arith.constant dense<0.000000e+00> : vector<2x9x9xf32>
    %91 = tpu.matmul %88, %89, %cst_34 {dimension_numbers = #tpu.dot_dimension_numbers<[2], [2], [1], [1], [0, 0, 0, 1, 1, 1], [0], [0]>} : vector<2x9x8xf32>, vector<2x9x8xf32>, vector<2x9x9xf32> -> vector<2x9x9xf32>
    "tpu.trace_stop"() : () -> ()
    %cst_35 = arith.constant dense<0xFF800000> : vector<2x9xf32>
    %92 = vector.multi_reduction <maximumf>, %91, %cst_35 [2] : vector<2x9x9xf32> to vector<2x9xf32>
    %93 = vector.shape_cast %92 : vector<2x9xf32> to vector<2x9x1xf32>
    %94 = vector.broadcast %93 : vector<2x9x1xf32> to vector<2x9x9xf32>
    %95 = arith.subf %91, %94 : vector<2x9x9xf32>
    %96 = math.exp %95 : vector<2x9x9xf32>
    %cst_36 = arith.constant dense<0.000000e+00> : vector<2x9xf32>
    %97 = vector.multi_reduction <add>, %96, %cst_36 [2] : vector<2x9x9xf32> to vector<2x9xf32>
    %98 = vector.shape_cast %97 : vector<2x9xf32> to vector<2x9x1xf32>
    %99 = tpu.reciprocal %98 {approx = true} : vector<2x9x1xf32> -> vector<2x9x1xf32>
    %100 = vector.broadcast %99 : vector<2x9x1xf32> to vector<2x9x9xf32>
    %101 = arith.mulf %96, %100 : vector<2x9x9xf32>
    "tpu.trace_start"() <{level = 10 : i32, message = "bnm,bmd->bnd"}> : () -> ()
    %cst_37 = arith.constant dense<0.000000e+00> : vector<2x9x8xf32>
    %102 = tpu.matmul %101, %90, %cst_37 {dimension_numbers = #tpu.dot_dimension_numbers<[2], [1], [1], [2], [0, 0, 0, 1, 1, 2], [0], [0]>} : vector<2x9x9xf32>, vector<2x9x8xf32>, vector<2x9x8xf32> -> vector<2x9x8xf32>
    "tpu.trace_stop"() : () -> ()
    %103 = vector.extract_strided_slice %53 {offsets = [0, 0, 24], sizes = [2, 9, 8], strides = [1, 1, 1]} : vector<2x9x32xf32> to vector<2x9x8xf32>
    %104 = vector.extract_strided_slice %55 {offsets = [0, 0, 24], sizes = [2, 9, 8], strides = [1, 1, 1]} : vector<2x9x32xf32> to vector<2x9x8xf32>
    %105 = vector.extract_strided_slice %57 {offsets = [0, 0, 24], sizes = [2, 9, 8], strides = [1, 1, 1]} : vector<2x9x32xf32> to vector<2x9x8xf32>
    "tpu.trace_start"() <{level = 10 : i32, message = "bnd,bmd->bnm"}> : () -> ()
    %cst_38 = arith.constant dense<0.000000e+00> : vector<2x9x9xf32>
    %106 = tpu.matmul %103, %104, %cst_38 {dimension_numbers = #tpu.dot_dimension_numbers<[2], [2], [1], [1], [0, 0, 0, 1, 1, 1], [0], [0]>} : vector<2x9x8xf32>, vector<2x9x8xf32>, vector<2x9x9xf32> -> vector<2x9x9xf32>
    "tpu.trace_stop"() : () -> ()
    %cst_39 = arith.constant dense<0xFF800000> : vector<2x9xf32>
    %107 = vector.multi_reduction <maximumf>, %106, %cst_39 [2] : vector<2x9x9xf32> to vector<2x9xf32>
    %108 = vector.shape_cast %107 : vector<2x9xf32> to vector<2x9x1xf32>
    %109 = vector.broadcast %108 : vector<2x9x1xf32> to vector<2x9x9xf32>
    %110 = arith.subf %106, %109 : vector<2x9x9xf32>
    %111 = math.exp %110 : vector<2x9x9xf32>
    %cst_40 = arith.constant dense<0.000000e+00> : vector<2x9xf32>
    %112 = vector.multi_reduction <add>, %111, %cst_40 [2] : vector<2x9x9xf32> to vector<2x9xf32>
    %113 = vector.shape_cast %112 : vector<2x9xf32> to vector<2x9x1xf32>
    %114 = tpu.reciprocal %113 {approx = true} : vector<2x9x1xf32> -> vector<2x9x1xf32>
    %115 = vector.broadcast %114 : vector<2x9x1xf32> to vector<2x9x9xf32>
    %116 = arith.mulf %111, %115 : vector<2x9x9xf32>
    "tpu.trace_start"() <{level = 10 : i32, message = "bnm,bmd->bnd"}> : () -> ()
    %cst_41 = arith.constant dense<0.000000e+00> : vector<2x9x8xf32>
    %117 = tpu.matmul %116, %105, %cst_41 {dimension_numbers = #tpu.dot_dimension_numbers<[2], [1], [1], [2], [0, 0, 0, 1, 1, 2], [0], [0]>} : vector<2x9x9xf32>, vector<2x9x8xf32>, vector<2x9x8xf32> -> vector<2x9x8xf32>
    "tpu.trace_stop"() : () -> ()
    %118 = tpu.concatenate %72, %87, %102, %117 in 2 : vector<2x9x8xf32>, vector<2x9x8xf32>, vector<2x9x8xf32>, vector<2x9x8xf32> -> vector<2x9x32xf32>
    %119 = vector.shape_cast %118 : vector<2x9x32xf32> to vector<18x32xf32>
    %c0_42 = arith.constant 0 : index
    %c0_43 = arith.constant 0 : index
    %c0_44 = arith.constant 0 : index
    %120 = vector.load %arg9[%c0_42, %c0_43, %c0_44] : memref<2x32x32xf32, #tpu.memory_space<vmem>>, vector<1x32x32xf32>
    %121 = vector.shape_cast %120 : vector<1x32x32xf32> to vector<32x32xf32>
    %cst_45 = arith.constant dense<0.000000e+00> : vector<18x32xf32>
    %122 = tpu.matmul %119, %121, %cst_45 {dimension_numbers = #tpu.dot_dimension_numbers<[1], [0], [0], [1], [0, 0, 1, 1], [], []>} : vector<18x32xf32>, vector<32x32xf32>, vector<18x32xf32> -> vector<18x32xf32>
    %c0_46 = arith.constant 0 : index
    %c0_47 = arith.constant 0 : index
    %c0_48 = arith.constant 0 : index
    %123 = vector.load %arg10[%c0_46, %c0_47, %c0_48] : memref<2x1x32xf32, #tpu.memory_space<vmem>>, vector<1x1x32xf32>
    %124 = vector.shape_cast %123 : vector<1x1x32xf32> to vector<1x32xf32>
    %125 = vector.broadcast %124 : vector<1x32xf32> to vector<18x32xf32>
    %126 = arith.addf %122, %125 : vector<18x32xf32>
    %c0_49 = arith.constant 0 : index
    %c0_50 = arith.constant 0 : index
    %c0_51 = arith.constant 0 : index
    %127 = vector.load %arg11[%c0_49, %c0_50, %c0_51] : memref<2x1x32xf32, #tpu.memory_space<vmem>>, vector<1x1x32xf32>
    %128 = vector.shape_cast %127 : vector<1x1x32xf32> to vector<1x32xf32>
    %c0_52 = arith.constant 0 : index
    %c0_53 = arith.constant 0 : index
    %c0_54 = arith.constant 0 : index
    %129 = vector.load %arg12[%c0_52, %c0_53, %c0_54] : memref<2x1x32xf32, #tpu.memory_space<vmem>>, vector<1x1x32xf32>
    %130 = vector.shape_cast %129 : vector<1x1x32xf32> to vector<1x32xf32>
    %cst_55 = arith.constant dense<0.000000e+00> : vector<18xf32>
    %131 = vector.multi_reduction <add>, %126, %cst_55 [1] : vector<18x32xf32> to vector<18xf32>
    %132 = vector.shape_cast %131 : vector<18xf32> to vector<18x1xf32>
    %cst_56 = arith.constant 3.200000e+01 : f32
    %133 = vector.broadcast %cst_56 : f32 to vector<18x1xf32>
    %134 = arith.divf %132, %133 : vector<18x1xf32>
    %135 = vector.broadcast %134 : vector<18x1xf32> to vector<18x32xf32>
    %136 = arith.subf %126, %135 : vector<18x32xf32>
    %137 = arith.mulf %136, %136 : vector<18x32xf32>
    %cst_57 = arith.constant dense<0.000000e+00> : vector<18xf32>
    %138 = vector.multi_reduction <add>, %137, %cst_57 [1] : vector<18x32xf32> to vector<18xf32>
    %139 = vector.shape_cast %138 : vector<18xf32> to vector<18x1xf32>
    %cst_58 = arith.constant 3.200000e+01 : f32
    %140 = vector.broadcast %cst_58 : f32 to vector<18x1xf32>
    %141 = arith.divf %139, %140 : vector<18x1xf32>
    %142 = vector.broadcast %134 : vector<18x1xf32> to vector<18x32xf32>
    %143 = arith.subf %126, %142 : vector<18x32xf32>
    %cst_59 = arith.constant 9.99999974E-6 : f32
    %144 = vector.broadcast %cst_59 : f32 to vector<18x1xf32>
    %145 = arith.addf %141, %144 : vector<18x1xf32>
    %146 = math.rsqrt %145 : vector<18x1xf32>
    %147 = vector.broadcast %146 : vector<18x1xf32> to vector<18x32xf32>
    %148 = arith.mulf %143, %147 : vector<18x32xf32>
    %149 = vector.broadcast %128 : vector<1x32xf32> to vector<18x32xf32>
    %150 = arith.mulf %148, %149 : vector<18x32xf32>
    %151 = vector.broadcast %130 : vector<1x32xf32> to vector<18x32xf32>
    %152 = arith.addf %150, %151 : vector<18x32xf32>
    %c0_60 = arith.constant 0 : index
    %c0_61 = arith.constant 0 : index
    %c0_62 = arith.constant 0 : index
    %153 = vector.load %arg13[%c0_60, %c0_61, %c0_62] : memref<2x32x64xf32, #tpu.memory_space<vmem>>, vector<1x32x64xf32>
    %154 = vector.shape_cast %153 : vector<1x32x64xf32> to vector<32x64xf32>
    %cst_63 = arith.constant dense<0.000000e+00> : vector<18x64xf32>
    %155 = tpu.matmul %152, %154, %cst_63 {dimension_numbers = #tpu.dot_dimension_numbers<[1], [0], [0], [1], [0, 0, 1, 1], [], []>} : vector<18x32xf32>, vector<32x64xf32>, vector<18x64xf32> -> vector<18x64xf32>
    %c0_64 = arith.constant 0 : index
    %c0_65 = arith.constant 0 : index
    %c0_66 = arith.constant 0 : index
    %156 = vector.load %arg14[%c0_64, %c0_65, %c0_66] : memref<2x1x64xf32, #tpu.memory_space<vmem>>, vector<1x1x64xf32>
    %157 = vector.shape_cast %156 : vector<1x1x64xf32> to vector<1x64xf32>
    %158 = vector.broadcast %157 : vector<1x64xf32> to vector<18x64xf32>
    %159 = arith.addf %155, %158 : vector<18x64xf32>
    %cst_67 = arith.constant 0.000000e+00 : f32
    %160 = vector.broadcast %cst_67 : f32 to vector<18x64xf32>
    %161 = arith.maximumf %159, %160 : vector<18x64xf32>
    %c0_68 = arith.constant 0 : index
    %c0_69 = arith.constant 0 : index
    %c0_70 = arith.constant 0 : index
    %162 = vector.load %arg15[%c0_68, %c0_69, %c0_70] : memref<2x64x32xf32, #tpu.memory_space<vmem>>, vector<1x64x32xf32>
    %163 = vector.shape_cast %162 : vector<1x64x32xf32> to vector<64x32xf32>
    %cst_71 = arith.constant dense<0.000000e+00> : vector<18x32xf32>
    %164 = tpu.matmul %161, %163, %cst_71 {dimension_numbers = #tpu.dot_dimension_numbers<[1], [0], [0], [1], [0, 0, 1, 1], [], []>} : vector<18x64xf32>, vector<64x32xf32>, vector<18x32xf32> -> vector<18x32xf32>
    %165 = arith.addf %126, %164 : vector<18x32xf32>
    %c0_72 = arith.constant 0 : index
    %c0_73 = arith.constant 0 : index
    %c0_74 = arith.constant 0 : index
    %166 = vector.load %arg16[%c0_72, %c0_73, %c0_74] : memref<2x1x32xf32, #tpu.memory_space<vmem>>, vector<1x1x32xf32>
    %167 = vector.shape_cast %166 : vector<1x1x32xf32> to vector<1x32xf32>
    %168 = vector.broadcast %167 : vector<1x32xf32> to vector<18x32xf32>
    %169 = arith.addf %165, %168 : vector<18x32xf32>
    %c1 = arith.constant 1 : index
    %c0_75 = arith.constant 0 : index
    %c0_76 = arith.constant 0 : index
    %170 = vector.load %arg6[%c1, %c0_75, %c0_76] : memref<2x1x32xf32, #tpu.memory_space<vmem>>, vector<1x1x32xf32>
    %171 = vector.shape_cast %170 : vector<1x1x32xf32> to vector<1x32xf32>
    %c1_77 = arith.constant 1 : index
    %c0_78 = arith.constant 0 : index
    %c0_79 = arith.constant 0 : index
    %172 = vector.load %arg7[%c1_77, %c0_78, %c0_79] : memref<2x1x32xf32, #tpu.memory_space<vmem>>, vector<1x1x32xf32>
    %173 = vector.shape_cast %172 : vector<1x1x32xf32> to vector<1x32xf32>
    %cst_80 = arith.constant dense<0.000000e+00> : vector<18xf32>
    %174 = vector.multi_reduction <add>, %169, %cst_80 [1] : vector<18x32xf32> to vector<18xf32>
    %175 = vector.shape_cast %174 : vector<18xf32> to vector<18x1xf32>
    %cst_81 = arith.constant 3.200000e+01 : f32
    %176 = vector.broadcast %cst_81 : f32 to vector<18x1xf32>
    %177 = arith.divf %175, %176 : vector<18x1xf32>
    %178 = vector.broadcast %177 : vector<18x1xf32> to vector<18x32xf32>
    %179 = arith.subf %169, %178 : vector<18x32xf32>
    %180 = arith.mulf %179, %179 : vector<18x32xf32>
    %cst_82 = arith.constant dense<0.000000e+00> : vector<18xf32>
    %181 = vector.multi_reduction <add>, %180, %cst_82 [1] : vector<18x32xf32> to vector<18xf32>
    %182 = vector.shape_cast %181 : vector<18xf32> to vector<18x1xf32>
    %cst_83 = arith.constant 3.200000e+01 : f32
    %183 = vector.broadcast %cst_83 : f32 to vector<18x1xf32>
    %184 = arith.divf %182, %183 : vector<18x1xf32>
    %185 = vector.broadcast %177 : vector<18x1xf32> to vector<18x32xf32>
    %186 = arith.subf %169, %185 : vector<18x32xf32>
    %cst_84 = arith.constant 9.99999974E-6 : f32
    %187 = vector.broadcast %cst_84 : f32 to vector<18x1xf32>
    %188 = arith.addf %184, %187 : vector<18x1xf32>
    %189 = math.rsqrt %188 : vector<18x1xf32>
    %190 = vector.broadcast %189 : vector<18x1xf32> to vector<18x32xf32>
    %191 = arith.mulf %186, %190 : vector<18x32xf32>
    %192 = vector.broadcast %171 : vector<1x32xf32> to vector<18x32xf32>
    %193 = arith.mulf %191, %192 : vector<18x32xf32>
    %194 = vector.broadcast %173 : vector<1x32xf32> to vector<18x32xf32>
    %195 = arith.addf %193, %194 : vector<18x32xf32>
    %c1_85 = arith.constant 1 : index
    %c0_86 = arith.constant 0 : index
    %c0_87 = arith.constant 0 : index
    %196 = vector.load %arg8[%c1_85, %c0_86, %c0_87] : memref<2x32x96xf32, #tpu.memory_space<vmem>>, vector<1x32x96xf32>
    %197 = vector.shape_cast %196 : vector<1x32x96xf32> to vector<32x96xf32>
    %cst_88 = arith.constant dense<0.000000e+00> : vector<18x96xf32>
    %198 = tpu.matmul %195, %197, %cst_88 {dimension_numbers = #tpu.dot_dimension_numbers<[1], [0], [0], [1], [0, 0, 1, 1], [], []>} : vector<18x32xf32>, vector<32x96xf32>, vector<18x96xf32> -> vector<18x96xf32>
    %199 = vector.extract_strided_slice %198 {offsets = [0, 0], sizes = [18, 32], strides = [1, 1]} : vector<18x96xf32> to vector<18x32xf32>
    %cst_89 = arith.constant 0.176776692 : f32
    %200 = vector.broadcast %cst_89 : f32 to vector<18x32xf32>
    %201 = arith.mulf %199, %200 : vector<18x32xf32>
    %202 = vector.shape_cast %201 : vector<18x32xf32> to vector<2x9x32xf32>
    %203 = vector.extract_strided_slice %198 {offsets = [0, 32], sizes = [18, 32], strides = [1, 1]} : vector<18x96xf32> to vector<18x32xf32>
    %204 = vector.shape_cast %203 : vector<18x32xf32> to vector<2x9x32xf32>
    %205 = vector.extract_strided_slice %198 {offsets = [0, 64], sizes = [18, 32], strides = [1, 1]} : vector<18x96xf32> to vector<18x32xf32>
    %206 = vector.shape_cast %205 : vector<18x32xf32> to vector<2x9x32xf32>
    %207 = vector.extract_strided_slice %202 {offsets = [0, 0, 0], sizes = [2, 9, 8], strides = [1, 1, 1]} : vector<2x9x32xf32> to vector<2x9x8xf32>
    %208 = vector.extract_strided_slice %204 {offsets = [0, 0, 0], sizes = [2, 9, 8], strides = [1, 1, 1]} : vector<2x9x32xf32> to vector<2x9x8xf32>
    %209 = vector.extract_strided_slice %206 {offsets = [0, 0, 0], sizes = [2, 9, 8], strides = [1, 1, 1]} : vector<2x9x32xf32> to vector<2x9x8xf32>
    "tpu.trace_start"() <{level = 10 : i32, message = "bnd,bmd->bnm"}> : () -> ()
    %cst_90 = arith.constant dense<0.000000e+00> : vector<2x9x9xf32>
    %210 = tpu.matmul %207, %208, %cst_90 {dimension_numbers = #tpu.dot_dimension_numbers<[2], [2], [1], [1], [0, 0, 0, 1, 1, 1], [0], [0]>} : vector<2x9x8xf32>, vector<2x9x8xf32>, vector<2x9x9xf32> -> vector<2x9x9xf32>
    "tpu.trace_stop"() : () -> ()
    %cst_91 = arith.constant dense<0xFF800000> : vector<2x9xf32>
    %211 = vector.multi_reduction <maximumf>, %210, %cst_91 [2] : vector<2x9x9xf32> to vector<2x9xf32>
    %212 = vector.shape_cast %211 : vector<2x9xf32> to vector<2x9x1xf32>
    %213 = vector.broadcast %212 : vector<2x9x1xf32> to vector<2x9x9xf32>
    %214 = arith.subf %210, %213 : vector<2x9x9xf32>
    %215 = math.exp %214 : vector<2x9x9xf32>
    %cst_92 = arith.constant dense<0.000000e+00> : vector<2x9xf32>
    %216 = vector.multi_reduction <add>, %215, %cst_92 [2] : vector<2x9x9xf32> to vector<2x9xf32>
    %217 = vector.shape_cast %216 : vector<2x9xf32> to vector<2x9x1xf32>
    %218 = tpu.reciprocal %217 {approx = true} : vector<2x9x1xf32> -> vector<2x9x1xf32>
    %219 = vector.broadcast %218 : vector<2x9x1xf32> to vector<2x9x9xf32>
    %220 = arith.mulf %215, %219 : vector<2x9x9xf32>
    "tpu.trace_start"() <{level = 10 : i32, message = "bnm,bmd->bnd"}> : () -> ()
    %cst_93 = arith.constant dense<0.000000e+00> : vector<2x9x8xf32>
    %221 = tpu.matmul %220, %209, %cst_93 {dimension_numbers = #tpu.dot_dimension_numbers<[2], [1], [1], [2], [0, 0, 0, 1, 1, 2], [0], [0]>} : vector<2x9x9xf32>, vector<2x9x8xf32>, vector<2x9x8xf32> -> vector<2x9x8xf32>
    "tpu.trace_stop"() : () -> ()
    %222 = vector.extract_strided_slice %202 {offsets = [0, 0, 8], sizes = [2, 9, 8], strides = [1, 1, 1]} : vector<2x9x32xf32> to vector<2x9x8xf32>
    %223 = vector.extract_strided_slice %204 {offsets = [0, 0, 8], sizes = [2, 9, 8], strides = [1, 1, 1]} : vector<2x9x32xf32> to vector<2x9x8xf32>
    %224 = vector.extract_strided_slice %206 {offsets = [0, 0, 8], sizes = [2, 9, 8], strides = [1, 1, 1]} : vector<2x9x32xf32> to vector<2x9x8xf32>
    "tpu.trace_start"() <{level = 10 : i32, message = "bnd,bmd->bnm"}> : () -> ()
    %cst_94 = arith.constant dense<0.000000e+00> : vector<2x9x9xf32>
    %225 = tpu.matmul %222, %223, %cst_94 {dimension_numbers = #tpu.dot_dimension_numbers<[2], [2], [1], [1], [0, 0, 0, 1, 1, 1], [0], [0]>} : vector<2x9x8xf32>, vector<2x9x8xf32>, vector<2x9x9xf32> -> vector<2x9x9xf32>
    "tpu.trace_stop"() : () -> ()
    %cst_95 = arith.constant dense<0xFF800000> : vector<2x9xf32>
    %226 = vector.multi_reduction <maximumf>, %225, %cst_95 [2] : vector<2x9x9xf32> to vector<2x9xf32>
    %227 = vector.shape_cast %226 : vector<2x9xf32> to vector<2x9x1xf32>
    %228 = vector.broadcast %227 : vector<2x9x1xf32> to vector<2x9x9xf32>
    %229 = arith.subf %225, %228 : vector<2x9x9xf32>
    %230 = math.exp %229 : vector<2x9x9xf32>
    %cst_96 = arith.constant dense<0.000000e+00> : vector<2x9xf32>
    %231 = vector.multi_reduction <add>, %230, %cst_96 [2] : vector<2x9x9xf32> to vector<2x9xf32>
    %232 = vector.shape_cast %231 : vector<2x9xf32> to vector<2x9x1xf32>
    %233 = tpu.reciprocal %232 {approx = true} : vector<2x9x1xf32> -> vector<2x9x1xf32>
    %234 = vector.broadcast %233 : vector<2x9x1xf32> to vector<2x9x9xf32>
    %235 = arith.mulf %230, %234 : vector<2x9x9xf32>
    "tpu.trace_start"() <{level = 10 : i32, message = "bnm,bmd->bnd"}> : () -> ()
    %cst_97 = arith.constant dense<0.000000e+00> : vector<2x9x8xf32>
    %236 = tpu.matmul %235, %224, %cst_97 {dimension_numbers = #tpu.dot_dimension_numbers<[2], [1], [1], [2], [0, 0, 0, 1, 1, 2], [0], [0]>} : vector<2x9x9xf32>, vector<2x9x8xf32>, vector<2x9x8xf32> -> vector<2x9x8xf32>
    "tpu.trace_stop"() : () -> ()
    %237 = vector.extract_strided_slice %202 {offsets = [0, 0, 16], sizes = [2, 9, 8], strides = [1, 1, 1]} : vector<2x9x32xf32> to vector<2x9x8xf32>
    %238 = vector.extract_strided_slice %204 {offsets = [0, 0, 16], sizes = [2, 9, 8], strides = [1, 1, 1]} : vector<2x9x32xf32> to vector<2x9x8xf32>
    %239 = vector.extract_strided_slice %206 {offsets = [0, 0, 16], sizes = [2, 9, 8], strides = [1, 1, 1]} : vector<2x9x32xf32> to vector<2x9x8xf32>
    "tpu.trace_start"() <{level = 10 : i32, message = "bnd,bmd->bnm"}> : () -> ()
    %cst_98 = arith.constant dense<0.000000e+00> : vector<2x9x9xf32>
    %240 = tpu.matmul %237, %238, %cst_98 {dimension_numbers = #tpu.dot_dimension_numbers<[2], [2], [1], [1], [0, 0, 0, 1, 1, 1], [0], [0]>} : vector<2x9x8xf32>, vector<2x9x8xf32>, vector<2x9x9xf32> -> vector<2x9x9xf32>
    "tpu.trace_stop"() : () -> ()
    %cst_99 = arith.constant dense<0xFF800000> : vector<2x9xf32>
    %241 = vector.multi_reduction <maximumf>, %240, %cst_99 [2] : vector<2x9x9xf32> to vector<2x9xf32>
    %242 = vector.shape_cast %241 : vector<2x9xf32> to vector<2x9x1xf32>
    %243 = vector.broadcast %242 : vector<2x9x1xf32> to vector<2x9x9xf32>
    %244 = arith.subf %240, %243 : vector<2x9x9xf32>
    %245 = math.exp %244 : vector<2x9x9xf32>
    %cst_100 = arith.constant dense<0.000000e+00> : vector<2x9xf32>
    %246 = vector.multi_reduction <add>, %245, %cst_100 [2] : vector<2x9x9xf32> to vector<2x9xf32>
    %247 = vector.shape_cast %246 : vector<2x9xf32> to vector<2x9x1xf32>
    %248 = tpu.reciprocal %247 {approx = true} : vector<2x9x1xf32> -> vector<2x9x1xf32>
    %249 = vector.broadcast %248 : vector<2x9x1xf32> to vector<2x9x9xf32>
    %250 = arith.mulf %245, %249 : vector<2x9x9xf32>
    "tpu.trace_start"() <{level = 10 : i32, message = "bnm,bmd->bnd"}> : () -> ()
    %cst_101 = arith.constant dense<0.000000e+00> : vector<2x9x8xf32>
    %251 = tpu.matmul %250, %239, %cst_101 {dimension_numbers = #tpu.dot_dimension_numbers<[2], [1], [1], [2], [0, 0, 0, 1, 1, 2], [0], [0]>} : vector<2x9x9xf32>, vector<2x9x8xf32>, vector<2x9x8xf32> -> vector<2x9x8xf32>
    "tpu.trace_stop"() : () -> ()
    %252 = vector.extract_strided_slice %202 {offsets = [0, 0, 24], sizes = [2, 9, 8], strides = [1, 1, 1]} : vector<2x9x32xf32> to vector<2x9x8xf32>
    %253 = vector.extract_strided_slice %204 {offsets = [0, 0, 24], sizes = [2, 9, 8], strides = [1, 1, 1]} : vector<2x9x32xf32> to vector<2x9x8xf32>
    %254 = vector.extract_strided_slice %206 {offsets = [0, 0, 24], sizes = [2, 9, 8], strides = [1, 1, 1]} : vector<2x9x32xf32> to vector<2x9x8xf32>
    "tpu.trace_start"() <{level = 10 : i32, message = "bnd,bmd->bnm"}> : () -> ()
    %cst_102 = arith.constant dense<0.000000e+00> : vector<2x9x9xf32>
    %255 = tpu.matmul %252, %253, %cst_102 {dimension_numbers = #tpu.dot_dimension_numbers<[2], [2], [1], [1], [0, 0, 0, 1, 1, 1], [0], [0]>} : vector<2x9x8xf32>, vector<2x9x8xf32>, vector<2x9x9xf32> -> vector<2x9x9xf32>
    "tpu.trace_stop"() : () -> ()
    %cst_103 = arith.constant dense<0xFF800000> : vector<2x9xf32>
    %256 = vector.multi_reduction <maximumf>, %255, %cst_103 [2] : vector<2x9x9xf32> to vector<2x9xf32>
    %257 = vector.shape_cast %256 : vector<2x9xf32> to vector<2x9x1xf32>
    %258 = vector.broadcast %257 : vector<2x9x1xf32> to vector<2x9x9xf32>
    %259 = arith.subf %255, %258 : vector<2x9x9xf32>
    %260 = math.exp %259 : vector<2x9x9xf32>
    %cst_104 = arith.constant dense<0.000000e+00> : vector<2x9xf32>
    %261 = vector.multi_reduction <add>, %260, %cst_104 [2] : vector<2x9x9xf32> to vector<2x9xf32>
    %262 = vector.shape_cast %261 : vector<2x9xf32> to vector<2x9x1xf32>
    %263 = tpu.reciprocal %262 {approx = true} : vector<2x9x1xf32> -> vector<2x9x1xf32>
    %264 = vector.broadcast %263 : vector<2x9x1xf32> to vector<2x9x9xf32>
    %265 = arith.mulf %260, %264 : vector<2x9x9xf32>
    "tpu.trace_start"() <{level = 10 : i32, message = "bnm,bmd->bnd"}> : () -> ()
    %cst_105 = arith.constant dense<0.000000e+00> : vector<2x9x8xf32>
    %266 = tpu.matmul %265, %254, %cst_105 {dimension_numbers = #tpu.dot_dimension_numbers<[2], [1], [1], [2], [0, 0, 0, 1, 1, 2], [0], [0]>} : vector<2x9x9xf32>, vector<2x9x8xf32>, vector<2x9x8xf32> -> vector<2x9x8xf32>
    "tpu.trace_stop"() : () -> ()
    %267 = tpu.concatenate %221, %236, %251, %266 in 2 : vector<2x9x8xf32>, vector<2x9x8xf32>, vector<2x9x8xf32>, vector<2x9x8xf32> -> vector<2x9x32xf32>
    %268 = vector.shape_cast %267 : vector<2x9x32xf32> to vector<18x32xf32>
    %c1_106 = arith.constant 1 : index
    %c0_107 = arith.constant 0 : index
    %c0_108 = arith.constant 0 : index
    %269 = vector.load %arg9[%c1_106, %c0_107, %c0_108] : memref<2x32x32xf32, #tpu.memory_space<vmem>>, vector<1x32x32xf32>
    %270 = vector.shape_cast %269 : vector<1x32x32xf32> to vector<32x32xf32>
    %cst_109 = arith.constant dense<0.000000e+00> : vector<18x32xf32>
    %271 = tpu.matmul %268, %270, %cst_109 {dimension_numbers = #tpu.dot_dimension_numbers<[1], [0], [0], [1], [0, 0, 1, 1], [], []>} : vector<18x32xf32>, vector<32x32xf32>, vector<18x32xf32> -> vector<18x32xf32>
    %c1_110 = arith.constant 1 : index
    %c0_111 = arith.constant 0 : index
    %c0_112 = arith.constant 0 : index
    %272 = vector.load %arg10[%c1_110, %c0_111, %c0_112] : memref<2x1x32xf32, #tpu.memory_space<vmem>>, vector<1x1x32xf32>
    %273 = vector.shape_cast %272 : vector<1x1x32xf32> to vector<1x32xf32>
    %274 = vector.broadcast %273 : vector<1x32xf32> to vector<18x32xf32>
    %275 = arith.addf %271, %274 : vector<18x32xf32>
    %c1_113 = arith.constant 1 : index
    %c0_114 = arith.constant 0 : index
    %c0_115 = arith.constant 0 : index
    %276 = vector.load %arg11[%c1_113, %c0_114, %c0_115] : memref<2x1x32xf32, #tpu.memory_space<vmem>>, vector<1x1x32xf32>
    %277 = vector.shape_cast %276 : vector<1x1x32xf32> to vector<1x32xf32>
    %c1_116 = arith.constant 1 : index
    %c0_117 = arith.constant 0 : index
    %c0_118 = arith.constant 0 : index
    %278 = vector.load %arg12[%c1_116, %c0_117, %c0_118] : memref<2x1x32xf32, #tpu.memory_space<vmem>>, vector<1x1x32xf32>
    %279 = vector.shape_cast %278 : vector<1x1x32xf32> to vector<1x32xf32>
    %cst_119 = arith.constant dense<0.000000e+00> : vector<18xf32>
    %280 = vector.multi_reduction <add>, %275, %cst_119 [1] : vector<18x32xf32> to vector<18xf32>
    %281 = vector.shape_cast %280 : vector<18xf32> to vector<18x1xf32>
    %cst_120 = arith.constant 3.200000e+01 : f32
    %282 = vector.broadcast %cst_120 : f32 to vector<18x1xf32>
    %283 = arith.divf %281, %282 : vector<18x1xf32>
    %284 = vector.broadcast %283 : vector<18x1xf32> to vector<18x32xf32>
    %285 = arith.subf %275, %284 : vector<18x32xf32>
    %286 = arith.mulf %285, %285 : vector<18x32xf32>
    %cst_121 = arith.constant dense<0.000000e+00> : vector<18xf32>
    %287 = vector.multi_reduction <add>, %286, %cst_121 [1] : vector<18x32xf32> to vector<18xf32>
    %288 = vector.shape_cast %287 : vector<18xf32> to vector<18x1xf32>
    %cst_122 = arith.constant 3.200000e+01 : f32
    %289 = vector.broadcast %cst_122 : f32 to vector<18x1xf32>
    %290 = arith.divf %288, %289 : vector<18x1xf32>
    %291 = vector.broadcast %283 : vector<18x1xf32> to vector<18x32xf32>
    %292 = arith.subf %275, %291 : vector<18x32xf32>
    %cst_123 = arith.constant 9.99999974E-6 : f32
    %293 = vector.broadcast %cst_123 : f32 to vector<18x1xf32>
    %294 = arith.addf %290, %293 : vector<18x1xf32>
    %295 = math.rsqrt %294 : vector<18x1xf32>
    %296 = vector.broadcast %295 : vector<18x1xf32> to vector<18x32xf32>
    %297 = arith.mulf %292, %296 : vector<18x32xf32>
    %298 = vector.broadcast %277 : vector<1x32xf32> to vector<18x32xf32>
    %299 = arith.mulf %297, %298 : vector<18x32xf32>
    %300 = vector.broadcast %279 : vector<1x32xf32> to vector<18x32xf32>
    %301 = arith.addf %299, %300 : vector<18x32xf32>
    %c1_124 = arith.constant 1 : index
    %c0_125 = arith.constant 0 : index
    %c0_126 = arith.constant 0 : index
    %302 = vector.load %arg13[%c1_124, %c0_125, %c0_126] : memref<2x32x64xf32, #tpu.memory_space<vmem>>, vector<1x32x64xf32>
    %303 = vector.shape_cast %302 : vector<1x32x64xf32> to vector<32x64xf32>
    %cst_127 = arith.constant dense<0.000000e+00> : vector<18x64xf32>
    %304 = tpu.matmul %301, %303, %cst_127 {dimension_numbers = #tpu.dot_dimension_numbers<[1], [0], [0], [1], [0, 0, 1, 1], [], []>} : vector<18x32xf32>, vector<32x64xf32>, vector<18x64xf32> -> vector<18x64xf32>
    %c1_128 = arith.constant 1 : index
    %c0_129 = arith.constant 0 : index
    %c0_130 = arith.constant 0 : index
    %305 = vector.load %arg14[%c1_128, %c0_129, %c0_130] : memref<2x1x64xf32, #tpu.memory_space<vmem>>, vector<1x1x64xf32>
    %306 = vector.shape_cast %305 : vector<1x1x64xf32> to vector<1x64xf32>
    %307 = vector.broadcast %306 : vector<1x64xf32> to vector<18x64xf32>
    %308 = arith.addf %304, %307 : vector<18x64xf32>
    %cst_131 = arith.constant 0.000000e+00 : f32
    %309 = vector.broadcast %cst_131 : f32 to vector<18x64xf32>
    %310 = arith.maximumf %308, %309 : vector<18x64xf32>
    %c1_132 = arith.constant 1 : index
    %c0_133 = arith.constant 0 : index
    %c0_134 = arith.constant 0 : index
    %311 = vector.load %arg15[%c1_132, %c0_133, %c0_134] : memref<2x64x32xf32, #tpu.memory_space<vmem>>, vector<1x64x32xf32>
    %312 = vector.shape_cast %311 : vector<1x64x32xf32> to vector<64x32xf32>
    %cst_135 = arith.constant dense<0.000000e+00> : vector<18x32xf32>
    %313 = tpu.matmul %310, %312, %cst_135 {dimension_numbers = #tpu.dot_dimension_numbers<[1], [0], [0], [1], [0, 0, 1, 1], [], []>} : vector<18x64xf32>, vector<64x32xf32>, vector<18x32xf32> -> vector<18x32xf32>
    %314 = arith.addf %275, %313 : vector<18x32xf32>
    %c1_136 = arith.constant 1 : index
    %c0_137 = arith.constant 0 : index
    %c0_138 = arith.constant 0 : index
    %315 = vector.load %arg16[%c1_136, %c0_137, %c0_138] : memref<2x1x32xf32, #tpu.memory_space<vmem>>, vector<1x1x32xf32>
    %316 = vector.shape_cast %315 : vector<1x1x32xf32> to vector<1x32xf32>
    %317 = vector.broadcast %316 : vector<1x32xf32> to vector<18x32xf32>
    %318 = arith.addf %314, %317 : vector<18x32xf32>
    %319 = vector.shape_cast %318 : vector<18x32xf32> to vector<2x9x32xf32>
    %320 = vector.extract_strided_slice %319 {offsets = [0, 0, 0], sizes = [2, 1, 32], strides = [1, 1, 1]} : vector<2x9x32xf32> to vector<2x1x32xf32>
    %c0_139 = arith.constant 0 : index
    %c0_140 = arith.constant 0 : index
    %c0_141 = arith.constant 0 : index
    %321 = vector.load %arg17[%c0_139, %c0_140, %c0_141] : memref<2x1x32xf32, #tpu.memory_space<vmem>>, vector<2x1x32xf32>
    tpu.vector_store %arg17[%c0_139, %c0_140, %c0_141], %320 {strides = array<i32>} : memref<2x1x32xf32, #tpu.memory_space<vmem>>, vector<2x1x32xf32>,
    return
  }
  func.func @transform_0(%arg0: i32) -> (i32, i32, i32) {
    %c0_i32 = arith.constant 0 : i32
    %c0_i32_0 = arith.constant 0 : i32
    %c0_i32_1 = arith.constant 0 : i32
    return %arg0, %c0_i32, %c0_i32_0 : i32, i32, i32
  }
  func.func @transform_1(%arg0: i32) -> (i32, i32) {
    %c0_i32 = arith.constant 0 : i32
    %c0_i32_0 = arith.constant 0 : i32
    %c0_i32_1 = arith.constant 0 : i32
    return %c0_i32, %c0_i32_0 : i32, i32
  }
  func.func @transform_2(%arg0: i32) -> (i32, i32) {
    %c0_i32 = arith.constant 0 : i32
    %c0_i32_0 = arith.constant 0 : i32
    %c0_i32_1 = arith.constant 0 : i32
    return %c0_i32, %c0_i32_0 : i32, i32
  }
  func.func @transform_3(%arg0: i32) -> (i32, i32) {
    %c0_i32 = arith.constant 0 : i32
    %c0_i32_0 = arith.constant 0 : i32
    %c0_i32_1 = arith.constant 0 : i32
    return %c0_i32, %c0_i32_0 : i32, i32
  }
  func.func @transform_4(%arg0: i32) -> (i32, i32) {
    %c0_i32 = arith.constant 0 : i32
    %c0_i32_0 = arith.constant 0 : i32
    %c0_i32_1 = arith.constant 0 : i32
    return %c0_i32, %c0_i32_0 : i32, i32
  }
  func.func @transform_5(%arg0: i32) -> (i32, i32, i32) {
    %c0_i32 = arith.constant 0 : i32
    %c0_i32_0 = arith.constant 0 : i32
    %c0_i32_1 = arith.constant 0 : i32
    %c0_i32_2 = arith.constant 0 : i32
    return %c0_i32, %c0_i32_0, %c0_i32_1 : i32, i32, i32
  }
  func.func @transform_6(%arg0: i32) -> (i32, i32, i32) {
    %c0_i32 = arith.constant 0 : i32
    %c0_i32_0 = arith.constant 0 : i32
    %c0_i32_1 = arith.constant 0 : i32
    %c0_i32_2 = arith.constant 0 : i32
    return %c0_i32, %c0_i32_0, %c0_i32_1 : i32, i32, i32
  }
  func.func @transform_7(%arg0: i32) -> (i32, i32, i32) {
    %c0_i32 = arith.constant 0 : i32
    %c0_i32_0 = arith.constant 0 : i32
    %c0_i32_1 = arith.constant 0 : i32
    %c0_i32_2 = arith.constant 0 : i32
    return %c0_i32, %c0_i32_0, %c0_i32_1 : i32, i32, i32
  }
  func.func @transform_8(%arg0: i32) -> (i32, i32, i32) {
    %c0_i32 = arith.constant 0 : i32
    %c0_i32_0 = arith.constant 0 : i32
    %c0_i32_1 = arith.constant 0 : i32
    %c0_i32_2 = arith.constant 0 : i32
    return %c0_i32, %c0_i32_0, %c0_i32_1 : i32, i32, i32
  }
  func.func @transform_9(%arg0: i32) -> (i32, i32, i32) {
    %c0_i32 = arith.constant 0 : i32
    %c0_i32_0 = arith.constant 0 : i32
    %c0_i32_1 = arith.constant 0 : i32
    %c0_i32_2 = arith.constant 0 : i32
    return %c0_i32, %c0_i32_0, %c0_i32_1 : i32, i32, i32
  }
  func.func @transform_10(%arg0: i32) -> (i32, i32, i32) {
    %c0_i32 = arith.constant 0 : i32
    %c0_i32_0 = arith.constant 0 : i32
    %c0_i32_1 = arith.constant 0 : i32
    %c0_i32_2 = arith.constant 0 : i32
    return %c0_i32, %c0_i32_0, %c0_i32_1 : i32, i32, i32
  }
  func.func @transform_11(%arg0: i32) -> (i32, i32, i32) {
    %c0_i32 = arith.constant 0 : i32
    %c0_i32_0 = arith.constant 0 : i32
    %c0_i32_1 = arith.constant 0 : i32
    %c0_i32_2 = arith.constant 0 : i32
    return %c0_i32, %c0_i32_0, %c0_i32_1 : i32, i32, i32
  }
  func.func @transform_12(%arg0: i32) -> (i32, i32, i32) {
    %c0_i32 = arith.constant 0 : i32
    %c0_i32_0 = arith.constant 0 : i32
    %c0_i32_1 = arith.constant 0 : i32
    %c0_i32_2 = arith.constant 0 : i32
    return %c0_i32, %c0_i32_0, %c0_i32_1 : i32, i32, i32
  }
  func.func @transform_13(%arg0: i32) -> (i32, i32, i32) {
    %c0_i32 = arith.constant 0 : i32
    %c0_i32_0 = arith.constant 0 : i32
    %c0_i32_1 = arith.constant 0 : i32
    %c0_i32_2 = arith.constant 0 : i32
    return %c0_i32, %c0_i32_0, %c0_i32_1 : i32, i32, i32
  }
  func.func @transform_14(%arg0: i32) -> (i32, i32, i32) {
    %c0_i32 = arith.constant 0 : i32
    %c0_i32_0 = arith.constant 0 : i32
    %c0_i32_1 = arith.constant 0 : i32
    %c0_i32_2 = arith.constant 0 : i32
    return %c0_i32, %c0_i32_0, %c0_i32_1 : i32, i32, i32
  }
  func.func @transform_15(%arg0: i32) -> (i32, i32, i32) {
    %c0_i32 = arith.constant 0 : i32
    %c0_i32_0 = arith.constant 0 : i32
    %c0_i32_1 = arith.constant 0 : i32
    %c0_i32_2 = arith.constant 0 : i32
    return %c0_i32, %c0_i32_0, %c0_i32_1 : i32, i32, i32
  }
  func.func @transform_16(%arg0: i32) -> (i32, i32, i32) {
    %c0_i32 = arith.constant 0 : i32
    %c0_i32_0 = arith.constant 0 : i32
    %c0_i32_1 = arith.constant 0 : i32
    return %arg0, %c0_i32, %c0_i32_0 : i32, i32, i32
  }
}

</mosaic_0001>

<bundles_post_ra>
// kernel: tpu_custom_call.1
= control target key start
LH: loop header
LB: loop body
LE: loop exit
PB: predicated region body
PF: predicated region fallthrough
CT: control target
= control target key end

     0   :  { %s7435_s0 = inlined_call_operand.vmem [shape: f32[4,9,4], index: 0, kind: input, shape index: {}]   ;;  %s7436_s1 = inlined_call_operand.vmem [shape: f32[4,32], index: 1, kind: input, shape index: {}]   ;;  %s7437_s2 = inlined_call_operand.hbm [shape: f32[1,32], index: 2, kind: input, shape index: {}]   ;;  %s7438_s3 = inlined_call_operand.hbm [shape: f32[1,32], index: 3, kind: input, shape index: {}]   ;;  %s7439_s4 = inlined_call_operand.vmem [shape: f32[9,32], index: 4, kind: input, shape index: {}]   ;;  %s7440_s5 = inlined_call_operand.vmem [shape: f32[2,1,32], index: 5, kind: input, shape index: {}]   ;;  %s7441_s6 = inlined_call_operand.vmem [shape: f32[2,1,32], index: 6, kind: input, shape index: {}]   ;;  %s7442_s7 = inlined_call_operand.vmem [shape: f32[2,32,96], index: 7, kind: input, shape index: {}]   ;;  %s7443_s8 = inlined_call_operand.vmem [shape: f32[2,32,32], index: 8, kind: input, shape index: {}]   ;;  %s7444_s9 = inlined_call_operand.vmem [shape: f32[2,1,32], index: 9, kind: input, shape index: {}]   ;;  %s7445_s10 = inlined_call_operand.vmem [shape: f32[2,1,32], index: 10, kind: input, shape index: {}]   ;;  %s7446_s11 = inlined_call_operand.hbm [shape: f32[2,1,32], index: 11, kind: input, shape index: {}]   ;;  %s7447_s12 = inlined_call_operand.vmem [shape: f32[2,32,64], index: 12, kind: input, shape index: {}]   ;;  %s7448_s13 = inlined_call_operand.hbm [shape: f32[2,1,64], index: 13, kind: input, shape index: {}]   ;;  %s7449_s14 = inlined_call_operand.vmem [shape: f32[2,64,32], index: 14, kind: input, shape index: {}]   ;;  %s7450_s15 = inlined_call_operand.vmem [shape: f32[2,1,32], index: 15, kind: input, shape index: {}]   ;;  %s7451_s16 = inlined_call_operand.hbm [shape: f32[4,1,32], index: 16, kind: output, shape index: {}]  }
   0x1   :  { %7472 = sst [smem:[#allocation23_spill]] %s7435_s0 }
   0x2   :  { %7473 = sst [smem:[#allocation24_spill]] %s7437_s2 }
   0x3   :  { %7474 = sst [smem:[#allocation25_spill]] %s7438_s3 }
   0x4   :  { %7475 = sst [smem:[#allocation26_spill]] %s7451_s16 }
   0x5   :  { %21 = vsyncpa [#allocation3], 0 }
   0x6   :  { %22 = vsyncpa [#allocation6], 0 }
   0x7   :  { %23 = vsyncpa [#allocation9], 0 }
   0x8   :  { %24 = vsyncpa [#allocation4], 0 }
   0x9   :  { %26 = vsyncpa [#allocation4 + $0x1], 0  ;;  %s5452_s21 = smov 0   ;;  %s5454_s22 = smov 0  }
   0xa   :  { %s5456_s23 = smov 0   ;;  %s5458_s24 = smov 0  }
   0xb LB: > { %7476 = sst [smem:[#allocation15_spill]] %s5331_s21  ;;  %s5473_s25 = sadd.s32 4294967295, %s5343_s24   ;;  %s5343_s24 = sphi %s5458_s24, %s7502_s24   ;;  %s5339_s23 = sphi %s5456_s23, %s7505_s23   ;;  %s5335_s22 = sphi %s5454_s22, %s7504_s22   ;;  %s5331_s21 = sphi %s5452_s21, %s7503_s21  }
   0xc   : > { %7477 = sst [smem:[#allocation16_spill]] %s5335_s22  ;;  %s4663_s26 = sadd.s32 4294967294, %s5343_s24  }
   0xd   : > { %7478 = sst [smem:[#allocation17_spill]] %s5339_s23  ;;  %s5477_s27 = sadd.s32 1, %s5343_s24  }
   0xe   : > { %7479 = sst [smem:[#allocation18_spill]] %s5343_s24  ;;  %s380_s28 = sadd.s32 1, %s5339_s23 }
   0xf   : > { %7480 = sst [smem:[#allocation19_spill]] %s5477_s27  ;;  %s377_s29 = ssub.s32 %s5343_s24, %s5477_s27 }
  0x10   : > { %p390_p0 = scmp.ne.s32.totalorder %s5339_s23, %s5335_s22  ;;  %p378_p1 = scmp.eq.s32.totalorder %s377_s29, 0 }
  0x11   : > { %p391_p2 = scmp.eq.s32.totalorder %s5473_s25, 1  ;;  %p396_p3 = scmp.ne.s32.totalorder %s5335_s22, %s5331_s21 }
  0x12   : > { %p397_p4 = scmp.eq.s32.totalorder %s4663_s26, 1  ;;  %p4664_p7 = scmp.ge.s32.totalorder %s5343_s24, 1 }
  0x13   : > { %s5488_s30 = scalar_select %p378_p1, %s5339_s23, %s380_s28  }
  0x14   : > { %p5490_p5 = por %p391_p2, %p390_p0  ;;  %p5494_p6 = por %p397_p4, %p396_p3 }
  0x15   : > { %7481 = sst [smem:[#allocation20_spill]] %s5488_s30  ;;  %p404_p8 = scmp.lt.s32.totalorder %s5343_s24, 3 }
  0x16   : > { %s7482_s0 = scalar_select %p5490_p5, 1, 0 }
  0x17   : > { %s7484_s17 = scalar_select %p5494_p6, 1, 0 }
  0x18   : > { %7483 = sst [smem:[#allocation21_spill]] %s7482_s0  ;;  %p4886_p9 = scmp.eq.s32.totalorder %s5473_s25, 0 }
  0x19   : > { %7485 = sst [smem:[#allocation22_spill]] %s7484_s17  ;;  %p5501_p10 = pnand %p4664_p7, %p404_p8 }
  0x1a   : > { %s7487_s3 = sld [smem:[#allocation25_spill]]  ;;  %s5345_s28 = smov [#allocation5]  }
  0x1b   : > { %p4869_p11 = pneg %p5501_p10  ;;  %s433_s29 = sshll.u32 %s5345_s28, 4  ;;  %s434_s29 = int_to_ptr.vmem [resolvable:$true] %s433_s29 }
  0x1c   : > { %s7488_s2 = sld [smem:[#allocation24_spill]]  ;;  %s5346_s21 = smov [#allocation2]  }
  0x1d   : > { %p5515_p12 = pnand %p4886_p9, %p4869_p11  ;;  %s421_s28 = sshll.u32 %s5346_s21, 4  ;;  %s422_s28 = int_to_ptr.vmem [resolvable:$true] %s421_s28 }
  0x1e   : > { %s5347_s23 = smov [#allocation7]   ;;  %s480_s0 = sshll.u32 %s7448_s13, 4  ;;  %s481_s0 = int_to_ptr.hbm [resolvable:$true] %s480_s0 }
  0x1f   : > { %s465_s30 = sshll.u32 %s5347_s23, 4  ;;  %s5348_s16 = smov 16   ;;  %s466_s30 = int_to_ptr.vmem [resolvable:$true] %s465_s30 }
  0x20   : > { %s431_s26 = sshll.u32 %s7487_s3, 4  ;;  %s463_s3 = sshll.u32 %s7446_s11, 4  ;;  %s432_s26 = int_to_ptr.hbm [resolvable:$true] %s431_s26  ;;  %s464_s3 = int_to_ptr.hbm [resolvable:$true] %s463_s3 }
  0x21   : > { %4875 = dma.hbm_to_vmem [thread:$0]  (!%p5515_p12), %s432_s26, 16, %s434_s29, [#allocation6]  }
  0x22   : > { %s419_s27 = sshll.u32 %s7488_s2, 4  ;;  %s5349_s22 = smov 1   ;;  %s420_s27 = int_to_ptr.hbm [resolvable:$true] %s419_s27 }
  0x23   : > { %4872 = dma.hbm_to_vmem [thread:$0]  (!%p5515_p12), %s420_s27, 16, %s422_s28, [#allocation3]  }
  0x24   : > { %4878 = dma.hbm_to_vmem [thread:$0]  (!%p5515_p12), %s464_s3, 32, %s466_s30, [#allocation6], %s5348_s16, %s5348_s16, %s5349_s22  }
  0x25   : > { %s5350_s21 = smov [#allocation8]   ;;  %514 = sbr.rel (%p5501_p10) target bundleno = 5126 (0x1406), region = 84 }
  0x26   : > { %s482_s19 = sshll.u32 %s5350_s21, 4  ;;  %s483_s19 = int_to_ptr.vmem [resolvable:$true] %s482_s19 }
  0x27   : > { %4881 = dma.hbm_to_vmem [thread:$0]  (!%p5515_p12), %s481_s0, 32, %s483_s19, [#allocation9], %s5348_s16, %s5348_s16, %s5349_s22  }
  0x2a   : > { %5314 = dma.done.wait (%p4886_p9), [#allocation3], 16  }
  0x2b   : > { %5316 = vsyncadd (%p4886_p9), [#allocation3], 4294967280 }
  0x2c   : > { %5318 = dma.done.wait (%p4886_p9), [#allocation6], 48  }
  0x2d   : > { %5320 = vsyncadd (%p4886_p9), [#allocation6], 4294967248 }
  0x2e   : > { %5322 = dma.done.wait (%p4886_p9), [#allocation9], 32  }
  0x2f   : > { %5324 = vsyncadd (%p4886_p9), [#allocation9], 4294967264  ;;  %s5548_s2 = sshll.u32 %s5473_s25, 1  ;;  %vm651_vm0 = vcmask 1043456   ;;  %s7490_s27 = sld [smem:[#allocation23_spill]]  ;;  %vm644_vm1 = vcmask 31744  }
  0x30   : > { %p582_p13 = scmp.lt.s32.totalorder %s5548_s2, 3  ;;  %v611_v0 = vld [vmem:[%s7436_s1] sm:$0xf]  ;;  %v4979_v22 = vld [vmem:[#allocation2] ss:$0 sm:$0xff]  ;;  %vm878_vm3 = vcmask 261120  }
  0x31   : > { %4679 = vmatpush.msk.msra.mxu0 %vm651_vm0, %v611_v0  ;;  %v714_v23 = vld [vmem:[%s7439_s4] sm:$0xff]  ;;  %v715_v50 = vld [vmem:[%s7439_s4 + $0x8] sm:$0x1]  ;;  %vm885_vm4 = vcmask 254976   ;;  %s5352_s18 = smov 96   ;;  %s7468_s25 = smov 64  }
  0x32   : > { %s583_s3 = scalar_select %p582_p13, %s5548_s2, 3  ;;  %v717_v26 = vrot.slane %v714_v23, 1  ;;  %v718_v27 = vrot.slane %v714_v23, 2  ;;  %v719_v28 = vrot.slane %v714_v23, 3  ;;  %v720_v29 = vrot.slane %v714_v23, 4 }
  0x33   : > { %v721_v30 = vrot.slane %v714_v23, 5  ;;  %v722_v31 = vrot.slane %v714_v23, 6  ;;  %v723_v38 = vrot.slane %v714_v23, 7  ;;  %s5354_s26 = smov 120   ;;  %s5355_s29 = smov 88   ;;  %vm1356_vm15 = vcmask 64512  }
  0x34   : > { %s4848_s16 = sshll.u32 %s583_s3, 4  ;;  %s5356_s20 = smov 112   ;;  %vm1534_vm0 = vcmask 1040384  }
  0x35   : > { %s5555_s0 = scalar_lea.vmem %s7490_s27, %s4848_s16  ;;  %s5357_s28 = smov 80  }
  0x36   : > { %v589_v1 = vld [vmem:[%s5555_s0] sm:$0xff]  ;;  %v591_v9 = vld [vmem:[%s5555_s0 + $0x10] sm:$0xff]  ;;  %v590_v10 = vld [vmem:[%s5555_s0 + $0x8] sm:$0x1]  ;;  %s5358_s23 = smov 104   ;;  %s5359_s30 = smov 72  }
  0x37   : > { %v597_v2 = vrot.slane %v589_v1, 1  ;;  %v598_v3 = vrot.slane %v589_v1, 2  ;;  %v599_v4 = vrot.slane %v589_v1, 3  ;;  %616 = vst [vmem:[#allocation1] ss:$9 sm:$0xff] %v589_v1  ;;  %v600_v5 = vrot.slane %v589_v1, 4 }
  0x38   : > { %v601_v6 = vrot.slane %v589_v1, 5  ;;  %v602_v7 = vrot.slane %v589_v1, 6  ;;  %v603_v8 = vrot.slane %v589_v1, 7  ;;  %v604_v11 = vrot.slane %v591_v9, 1  ;;  %v592_v19 = vld [vmem:[%s5555_s0 + $0x18] sm:$0x1] }
  0x39   : > { %618 = vst [vmem:[#allocation1 + $0x1] ss:$9 sm:$0xff] %v597_v2  ;;  %v605_v13 = vrot.slane %v591_v9, 2  ;;  %v606_v14 = vrot.slane %v591_v9, 3  ;;  %v607_v15 = vrot.slane %v591_v9, 4  ;;  %v608_v16 = vrot.slane %v591_v9, 5 }
  0x3a   : > { %620 = vst [vmem:[#allocation1 + $0x2] ss:$9 sm:$0xff] %v598_v3  ;;  %v609_v17 = vrot.slane %v591_v9, 6  ;;  %v610_v18 = vrot.slane %v591_v9, 7  ;;  %s7470_s21 = smov 56   ;;  %s7466_s19 = smov 48  }
  0x3b   : > { %622 = vst [vmem:[#allocation1 + $0x3] ss:$9 sm:$0xff] %v599_v4  ;;  %s7462_s3 = smov 40   ;;  %s7464_s16 = smov 8  }
  0x3c   : > { %624 = vst [vmem:[#allocation1 + $0x4] ss:$9 sm:$0xff] %v600_v5  ;;  %s5364_s22 = smov 16   ;;  %s5365_s24 = smov 24  }
  0x3d   : > { %626 = vst [vmem:[#allocation1 + $0x5] ss:$9 sm:$0xff] %v601_v6 }
  0x3e   : > { %628 = vst [vmem:[#allocation1 + $0x6] ss:$9 sm:$0xff] %v602_v7  ;;  %v749_v7 = vlaneseq }
  0x3f   : > { %630 = vst [vmem:[#allocation1 + $0x7] ss:$9 sm:$0xff] %v603_v8 }
  0x46   : > { %v631_v12 = vld [vmem:[#allocation1] sm:$0xff] }
  0x47   : > { %4680 = vmatmul.msk.f32.vlgmr.msra.gmra.mxu0 %vm644_vm1, %v631_v12  ;;  %632 = vst [vmem:[#allocation1] ss:$9 sm:$0xff] %v590_v10  ;;  %v4980_v12 = vld [vmem:[#allocation5] ss:$0 sm:$0xff] }
  0x48   : > { %633 = vst [vmem:[#allocation1 + $0x1] ss:$9 sm:$0xff] %v591_v9  ;;  %v750_v9 = vshrl.u32 %v749_v7, 7 }
  0x49   : > { %634 = vst [vmem:[#allocation1 + $0x2] ss:$9 sm:$0xff] %v604_v11 }
  0x4a   : > { %635 = vst [vmem:[#allocation1 + $0x3] ss:$9 sm:$0xff] %v605_v13  ;;  %vm756_vm2 = vcmp.eq.s32.totalorder %v750_v9, 0 }
  0x4b   : > { %636 = vst [vmem:[#allocation1 + $0x4] ss:$9 sm:$0xff] %v606_v14 }
  0x4c   : > { %637 = vst [vmem:[#allocation1 + $0x5] ss:$9 sm:$0xff] %v607_v15 }
  0x4d   : > { %638 = vst [vmem:[#allocation1 + $0x6] ss:$9 sm:$0xff] %v608_v16 }
  0x4e   : > { %639 = vst [vmem:[#allocation1 + $0x7] ss:$9 sm:$0xff] %v609_v17 }
  0x55   : > { %v640_v20 = vld [vmem:[#allocation1] sm:$0xff] }
  0x56   : > { %4681 = vmatmul.msk.f32.gmra.mxu0 %vm644_vm1, %v640_v20  ;;  %641 = vst [vmem:[#allocation1] ss:$9 sm:$0xff] %v610_v18 }
  0x57   : > { %642 = vst [vmem:[#allocation1 + $0x1] ss:$9 sm:$0xff] %v592_v19 }
  0x5e   : > { %v643_v21 = vld [vmem:[#allocation1] sm:$0xff] }
  0x5f   : > { %4682 = vmatmul.msk.f32.gmra.mxu0 %vm644_vm1, %v643_v21  ;;  %vm1459_vm1 = vcmask 72704  }
  0xc4   : > { %v672_v24 = vpop.f32.mrf.mxu0 }
  0xc5   : > { %v673_v25 = vadd.f32 %v4979_v22, %v672_v24 }
  0xc7   : > { %v684_v32 = vrot.slane %v673_v25, 1  ;;  %v685_v33 = vrot.slane %v673_v25, 2  ;;  %v686_v34 = vrot.slane %v673_v25, 3  ;;  %v687_v35 = vrot.slane %v673_v25, 4 }
  0xc8   : > { %v688_v36 = vrot.slane %v673_v25, 5  ;;  %v689_v37 = vrot.slane %v673_v25, 6  ;;  %v731_v39 = vadd.f32 %v714_v23, %v673_v25  ;;  %v690_v40 = vrot.slane %v673_v25, 7 }
  0xc9   : > { %v732_v41 = vadd.f32 %v717_v26, %v684_v32  ;;  %v733_v42 = vadd.f32 %v718_v27, %v685_v33  ;;  %v734_v43 = vadd.f32 %v719_v28, %v686_v34  ;;  %v735_v44 = vadd.f32 %v720_v29, %v687_v35 }
  0xca   : > { %776 = vst [vmem:[#allocation1] ss:$9 sm:$0xff] %v731_v39  ;;  %v736_v45 = vadd.f32 %v721_v30, %v688_v36  ;;  %v737_v46 = vadd.f32 %v722_v31, %v689_v37  ;;  %v738_v47 = vadd.f32 %v723_v38, %v690_v40  ;;  %v5351_v36 = vmov 32.0  }
  0xcb   : > { %778 = vst [vmem:[#allocation1 + $0x1] ss:$9 sm:$0xff] %v732_v41  ;;  %4995 = vrcp.f32 %v5351_v36 }
  0xcc   : > { %780 = vst [vmem:[#allocation1 + $0x2] ss:$9 sm:$0xff] %v733_v42 }
  0xcd   : > { %782 = vst [vmem:[#allocation1 + $0x3] ss:$9 sm:$0xff] %v734_v43 }
  0xce   : > { %784 = vst [vmem:[#allocation1 + $0x4] ss:$9 sm:$0xff] %v735_v44 }
  0xcf   : > { %786 = vst [vmem:[#allocation1 + $0x5] ss:$9 sm:$0xff] %v736_v45 }
  0xd0   : > { %788 = vst [vmem:[#allocation1 + $0x6] ss:$9 sm:$0xff] %v737_v46 }
  0xd1   : > { %790 = vst [vmem:[#allocation1 + $0x7] ss:$9 sm:$0xff] %v738_v47  ;;  %v4996_v37 = vpop.eup %4995 }
  0xd2   : > { %vm894_vm5 = vweird.f32 %v4996_v37 }
  0xd3   : > { %v675_v48 = vpop.f32.mrf.mxu0 }
  0xd4   : > { %v676_v49 = vadd.f32 %v4979_v22, %v675_v48 }
  0xd6   : > { %v739_v51 = vadd.f32 %v715_v50, %v676_v49  ;;  %v691_v53 = vrot.slane %v676_v49, 1  ;;  %v692_v54 = vrot.slane %v676_v49, 2  ;;  %v693_v55 = vrot.slane %v676_v49, 3 }
  0xd7   : > { %v694_v57 = vrot.slane %v676_v49, 4  ;;  %v695_v58 = vrot.slane %v676_v49, 5  ;;  %v696_v60 = vrot.slane %v676_v49, 6  ;;  %v697_v0 = vrot.slane %v676_v49, 7 }
  0xd8   : > { %v791_v52 = vld [vmem:[#allocation1] sm:$0xff]  ;;  %v740_v59 = vadd.f32 %v714_v23, %v691_v53  ;;  %v741_v62 = vadd.f32 %v717_v26, %v692_v54  ;;  %v742_v1 = vadd.f32 %v718_v27, %v693_v55 }
  0xd9   : > { %792 = vst [vmem:[#allocation1] ss:$9 sm:$0xff] %v739_v51  ;;  %v743_v2 = vadd.f32 %v719_v28, %v694_v57  ;;  %v744_v3 = vadd.f32 %v720_v29, %v695_v58  ;;  %v745_v4 = vadd.f32 %v721_v30, %v696_v60  ;;  %v746_v6 = vadd.f32 %v722_v31, %v697_v0 }
  0xda   : > { %v5576_v13 = vsel %vm756_vm2, %v4980_v12, %v791_v52 }
  0xdb   : > { %v817_v15 = vrot.slane %v5576_v13, 1  ;;  %v818_v16 = vrot.slane %v5576_v13, 2  ;;  %v819_v17 = vrot.slane %v5576_v13, 3  ;;  %v820_v18 = vrot.slane %v5576_v13, 4 }
  0xdc   : > { %v678_v56 = vpop.f32.mrf.mxu0  ;;  %v821_v19 = vrot.slane %v5576_v13, 5  ;;  %v822_v20 = vrot.slane %v5576_v13, 6  ;;  %v823_v21 = vrot.slane %v5576_v13, 7 }
  0xdd   : > { %v679_v61 = vadd.f32 %v4979_v22, %v678_v56 }
  0xdf   : > { %v747_v5 = vadd.f32 %v723_v38, %v679_v61  ;;  %v698_v8 = vrot.slane %v679_v61, 1  ;;  %v890_v38 = vmul.f32 32.0, %v4996_v37 }
  0xe0   : > { %v5573_v63 = vld [vmem:[#allocation1] sm:$0xff] }
  0xe1   : > { %794 = vst [vmem:[#allocation1] ss:$9 sm:$0xff] %v740_v59  ;;  %v748_v10 = vadd.f32 %v715_v50, %v698_v8  ;;  %v891_v39 = vsub.f32 1.0, %v890_v38 }
  0xe2   : > { %795 = vst [vmem:[#allocation1 + $0x1] ss:$9 sm:$0xff] %v741_v62 }
  0xe3   : > { %796 = vst [vmem:[#allocation1 + $0x2] ss:$9 sm:$0xff] %v742_v1  ;;  %v892_v40 = vmul.f32 %v4996_v37, %v891_v39 }
  0xe4   : > { %797 = vst [vmem:[#allocation1 + $0x3] ss:$9 sm:$0xff] %v743_v2 }
  0xe5   : > { %798 = vst [vmem:[#allocation1 + $0x4] ss:$9 sm:$0xff] %v744_v3  ;;  %v893_v41 = vadd.f32 %v4996_v37, %v892_v40 }
  0xe6   : > { %799 = vst [vmem:[#allocation1 + $0x5] ss:$9 sm:$0xff] %v745_v4 }
  0xe7   : > { %800 = vst [vmem:[#allocation1 + $0x6] ss:$9 sm:$0xff] %v746_v6  ;;  %v5624_v42 = vsel %vm894_vm5, %v4996_v37, %v893_v41  ;;  %vm2572_vm5 = vcmask 130048  }
  0xe8   : > { %801 = vst [vmem:[#allocation1 + $0x7] ss:$9 sm:$0xff] %v747_v5 }
  0xef   : > { %v802_v11 = vld [vmem:[#allocation1] sm:$0xff] }
  0xf0   : > { %803 = vst [vmem:[#allocation1] ss:$9 sm:$0xff] %v748_v10  ;;  %v5595_v22 = vsel %vm756_vm2, %v4980_v12, %v802_v11  ;;  %vm1463_vm2 = vcmask 65536  }
  0xf1   : > { %v824_v24 = vrot.slane %v5595_v22, 1  ;;  %v825_v26 = vrot.slane %v5595_v22, 2  ;;  %v826_v27 = vrot.slane %v5595_v22, 3  ;;  %v827_v28 = vrot.slane %v5595_v22, 4 }
  0xf2   : > { %v828_v29 = vrot.slane %v5595_v22, 5  ;;  %v829_v30 = vrot.slane %v5595_v22, 6  ;;  %v830_v31 = vrot.slane %v5595_v22, 7 }
  0xf7   : > { %v5578_v14 = vld [vmem:[#allocation1] sm:$0xff] }
  0xf8   : > { %847 = vst [vmem:[#allocation1] ss:$9 sm:$0xff] %v5576_v13 }
  0xf9   : > { %849 = vst [vmem:[#allocation1 + $0x1] ss:$9 sm:$0xff] %v817_v15 }
  0xfa   : > { %851 = vst [vmem:[#allocation1 + $0x2] ss:$9 sm:$0xff] %v818_v16 }
  0xfb   : > { %853 = vst [vmem:[#allocation1 + $0x3] ss:$9 sm:$0xff] %v819_v17 }
  0xfc   : > { %855 = vst [vmem:[#allocation1 + $0x4] ss:$9 sm:$0xff] %v820_v18 }
  0xfd   : > { %857 = vst [vmem:[#allocation1 + $0x5] ss:$9 sm:$0xff] %v821_v19 }
  0xfe   : > { %859 = vst [vmem:[#allocation1 + $0x6] ss:$9 sm:$0xff] %v822_v20 }
  0xff   : > { %861 = vst [vmem:[#allocation1 + $0x7] ss:$9 sm:$0xff] %v823_v21 }
 0x106   : > { %v862_v23 = vld [vmem:[#allocation1] sm:$0xff] }
 0x107   : > { %863 = vst [vmem:[#allocation1] ss:$9 sm:$0xff] %v5573_v63  ;;  %v879_v25 = vsel %vm878_vm3, %v862_v23, 0.0 }
 0x108   : > { %864 = vst [vmem:[#allocation1 + $0x1] ss:$9 sm:$0xff] %v5595_v22  ;;  %880 = vadd.xlane.f32.xlu0 %v879_v25 }
 0x109   : > { %865 = vst [vmem:[#allocation1 + $0x2] ss:$9 sm:$0xff] %v824_v24 }
 0x10a   : > { %866 = vst [vmem:[#allocation1 + $0x3] ss:$9 sm:$0xff] %v825_v26 }
 0x10b   : > { %867 = vst [vmem:[#allocation1 + $0x4] ss:$9 sm:$0xff] %v826_v27 }
 0x10c   : > { %868 = vst [vmem:[#allocation1 + $0x5] ss:$9 sm:$0xff] %v827_v28 }
 0x10d   : > { %869 = vst [vmem:[#allocation1 + $0x6] ss:$9 sm:$0xff] %v828_v29 }
 0x10e   : > { %870 = vst [vmem:[#allocation1 + $0x7] ss:$9 sm:$0xff] %v829_v30 }
 0x115   : > { %v871_v32 = vld [vmem:[#allocation1] sm:$0xff] }
 0x116   : > { %872 = vst [vmem:[#allocation1] ss:$9 sm:$0xff] %v830_v31  ;;  %v882_v33 = vsel %vm878_vm3, %v871_v32, 0.0 }
 0x117   : > { %873 = vst [vmem:[#allocation1 + $0x1] ss:$9 sm:$0xff] %v5578_v14  ;;  %883 = vadd.xlane.f32.xlu0 %v882_v33 }
 0x11e   : > { %v874_v34 = vld [vmem:[#allocation1] sm:$0xff] }
 0x11f   : > { %v886_v35 = vsel %vm885_vm4, %v874_v34, 0.0 }
 0x120   : > { %887 = vadd.xlane.f32.xlu1 %v886_v35 }
 0x17b   : > { %v881_v43 = vpop.xlane.xlu0 %880 }
 0x17c   : > { %v896_v44 = vmul.f32 %v5624_v42, %v881_v43 }
 0x17e   : > { %v902_v45 = vperm.slane %v896_v44, 0  ;;  %v903_v46 = vperm.slane %v896_v44, 1  ;;  %v904_v47 = vperm.slane %v896_v44, 2  ;;  %v905_v48 = vperm.slane %v896_v44, 3 }
 0x17f   : > { %v906_v49 = vperm.slane %v896_v44, 4  ;;  %v907_v50 = vperm.slane %v896_v44, 5  ;;  %v908_v51 = vperm.slane %v896_v44, 6  ;;  %v909_v52 = vperm.slane %v896_v44, 7 }
 0x180   : > { %v5628_v53 = vsub.f32 %v5576_v13, %v902_v45  ;;  %v5632_v54 = vsub.f32 %v817_v15, %v903_v46  ;;  %v5636_v55 = vsub.f32 %v818_v16, %v904_v47  ;;  %v5640_v56 = vsub.f32 %v819_v17, %v905_v48 }
 0x181   : > { %v5642_v57 = vsub.f32 %v820_v18, %v906_v49  ;;  %v5644_v58 = vsub.f32 %v821_v19, %v907_v50  ;;  %v5646_v59 = vsub.f32 %v822_v20, %v908_v51  ;;  %v5654_v0 = vsub.f32 %v823_v21, %v909_v52  ;;  %v5732_v51 = vld [vmem:[%s7440_s5] ss:$0 sm:$0xff] }
 0x182   : > { %v956_v60 = vmul.f32 %v5628_v53, %v5628_v53  ;;  %v957_v61 = vmul.f32 %v5632_v54, %v5632_v54  ;;  %v958_v62 = vmul.f32 %v5636_v55, %v5636_v55  ;;  %v959_v1 = vmul.f32 %v5640_v56, %v5640_v56 }
 0x183   : > { %v960_v2 = vmul.f32 %v5642_v57, %v5642_v57  ;;  %v961_v3 = vmul.f32 %v5644_v58, %v5644_v58  ;;  %v962_v4 = vmul.f32 %v5646_v59, %v5646_v59  ;;  %v963_v5 = vmul.f32 %v5654_v0, %v5654_v0 }
 0x184   : > { %992 = vst [vmem:[#allocation1] ss:$9 sm:$0xff] %v956_v60 }
 0x185   : > { %994 = vst [vmem:[#allocation1 + $0x1] ss:$9 sm:$0xff] %v957_v61 }
 0x186   : > { %996 = vst [vmem:[#allocation1 + $0x2] ss:$9 sm:$0xff] %v958_v62 }
 0x187   : > { %998 = vst [vmem:[#allocation1 + $0x3] ss:$9 sm:$0xff] %v959_v1  ;;  %v5738_v1 = vld [vmem:[%s7441_s6] ss:$0 sm:$0xff] }
 0x188   : > { %1000 = vst [vmem:[#allocation1 + $0x4] ss:$9 sm:$0xff] %v960_v2  ;;  %v1129_v2 = vrot.slane %v5732_v51, 2 }
 0x189   : > { %1002 = vst [vmem:[#allocation1 + $0x5] ss:$9 sm:$0xff] %v961_v3 }
 0x18a   : > { %1004 = vst [vmem:[#allocation1 + $0x6] ss:$9 sm:$0xff] %v962_v4  ;;  %v884_v6 = vpop.xlane.xlu0 %883 }
 0x18b   : > { %1006 = vst [vmem:[#allocation1 + $0x7] ss:$9 sm:$0xff] %v963_v5  ;;  %v897_v7 = vmul.f32 %v5624_v42, %v884_v6  ;;  %v1198_v5 = vld [vmem:[%s7442_s7 + $0x18] sm:$0xff]  ;;  %v1130_v6 = vrot.slane %v5732_v51, 3 }
 0x18c   : > { %1263 = vmatpush.msra.mxu1 %v1198_v5  ;;  %v5801_v5 = vrot.slane %v5738_v1, 1 }
 0x18d   : > { %v910_v8 = vperm.slane %v897_v7, 0  ;;  %v911_v9 = vperm.slane %v897_v7, 1  ;;  %v912_v10 = vperm.slane %v897_v7, 2  ;;  %v913_v11 = vperm.slane %v897_v7, 3 }
 0x18e   : > { %v914_v12 = vperm.slane %v897_v7, 4  ;;  %v915_v13 = vperm.slane %v897_v7, 5  ;;  %v916_v15 = vperm.slane %v897_v7, 6  ;;  %v917_v16 = vperm.slane %v897_v7, 7 }
 0x18f   : > { %v5668_v17 = vsub.f32 %v5573_v63, %v910_v8  ;;  %v5671_v18 = vsub.f32 %v5595_v22, %v911_v9  ;;  %v5675_v19 = vsub.f32 %v824_v24, %v912_v10  ;;  %v5679_v20 = vsub.f32 %v825_v26, %v913_v11 }
 0x190   : > { %v5683_v21 = vsub.f32 %v826_v27, %v914_v12  ;;  %v5687_v23 = vsub.f32 %v827_v28, %v915_v13  ;;  %v5691_v63 = vsub.f32 %v828_v29, %v916_v15  ;;  %v5701_v27 = vsub.f32 %v829_v30, %v917_v16  ;;  %v1197_v12 = vld [vmem:[%s7442_s7 + $0x10] sm:$0xff] }
 0x191   : > { %v964_v24 = vmul.f32 %v5668_v17, %v5668_v17  ;;  %v965_v25 = vmul.f32 %v5671_v18, %v5671_v18  ;;  %v966_v26 = vmul.f32 %v5675_v19, %v5675_v19  ;;  %v967_v28 = vmul.f32 %v5679_v20, %v5679_v20  ;;  %1264 = vmatpush.msra.mxu1 %v1197_v12 }
 0x192   : > { %v1007_v32 = vld [vmem:[#allocation1] sm:$0xff]  ;;  %v968_v29 = vmul.f32 %v5683_v21, %v5683_v21  ;;  %v969_v35 = vmul.f32 %v5687_v23, %v5687_v23  ;;  %v970_v30 = vmul.f32 %v5691_v63, %v5691_v63  ;;  %v971_v37 = vmul.f32 %v5701_v27, %v5701_v27 }
 0x193   : > { %1008 = vst [vmem:[#allocation1] ss:$9 sm:$0xff] %v964_v24  ;;  %v888_v33 = vpop.xlane.xlu1 %887  ;;  %v1023_v34 = vsel %vm878_vm3, %v1007_v32, 0.0  ;;  %v1131_v7 = vrot.slane %v5732_v51, 4  ;;  %v1132_v8 = vrot.slane %v5732_v51, 5  ;;  %v1133_v9 = vrot.slane %v5732_v51, 6 }
 0x194   : > { %1009 = vst [vmem:[#allocation1 + $0x1] ss:$9 sm:$0xff] %v965_v25  ;;  %v898_v36 = vmul.f32 %v5624_v42, %v888_v33  ;;  %1024 = vadd.xlane.f32.xlu1 %v1023_v34  ;;  %v1134_v10 = vrot.slane %v5732_v51, 7  ;;  %v1164_v13 = vrot.slane %v5738_v1, 2  ;;  %v1165_v15 = vrot.slane %v5738_v1, 3 }
 0x195   : > { %1010 = vst [vmem:[#allocation1 + $0x2] ss:$9 sm:$0xff] %v966_v26  ;;  %v1166_v16 = vrot.slane %v5738_v1, 4  ;;  %v1167_v24 = vrot.slane %v5738_v1, 5  ;;  %v1168_v25 = vrot.slane %v5738_v1, 6  ;;  %v1169_v26 = vrot.slane %v5738_v1, 7 }
 0x196   : > { %1011 = vst [vmem:[#allocation1 + $0x3] ss:$9 sm:$0xff] %v967_v28  ;;  %v918_v38 = vperm.slane %v898_v36, 0  ;;  %v919_v39 = vperm.slane %v898_v36, 1  ;;  %v5763_v28 = vrot.slane %v5732_v51, 1 }
 0x197   : > { %1012 = vst [vmem:[#allocation1 + $0x4] ss:$9 sm:$0xff] %v968_v29  ;;  %v1196_v29 = vld [vmem:[%s7442_s7 + $0x8] sm:$0xff] }
 0x198   : > { %1013 = vst [vmem:[#allocation1 + $0x5] ss:$9 sm:$0xff] %v969_v35  ;;  %v5717_v40 = vsub.f32 %v830_v31, %v918_v38  ;;  %v5720_v41 = vsub.f32 %v5578_v14, %v919_v39  ;;  %1265 = vmatpush.msra.mxu1 %v1196_v29 }
 0x199   : > { %1014 = vst [vmem:[#allocation1 + $0x6] ss:$9 sm:$0xff] %v970_v30 }
 0x19a   : > { %1015 = vst [vmem:[#allocation1 + $0x7] ss:$9 sm:$0xff] %v971_v37  ;;  %v972_v43 = vmul.f32 %v5717_v40, %v5717_v40  ;;  %v973_v44 = vmul.f32 %v5720_v41, %v5720_v41 }
 0x1a1   : > { %v1016_v45 = vld [vmem:[#allocation1] sm:$0xff] }
 0x1a2   : > { %1017 = vst [vmem:[#allocation1] ss:$9 sm:$0xff] %v972_v43  ;;  %v1026_v46 = vsel %vm878_vm3, %v1016_v45, 0.0  ;;  %v1195_v43 = vld [vmem:[%s7442_s7] sm:$0xff] }
 0x1a3   : > { %1018 = vst [vmem:[#allocation1 + $0x1] ss:$9 sm:$0xff] %v973_v44  ;;  %1027 = vadd.xlane.f32.xlu2 %v1026_v46  ;;  %1266 = vmatpush.msra.mxu1 %v1195_v43 }
 0x1aa   : > { %v1019_v47 = vld [vmem:[#allocation1] sm:$0xff] }
 0x1ab   : > { %v1029_v22 = vsel %vm885_vm4, %v1019_v47, 0.0 }
 0x1ac   : > { %1030 = vadd.xlane.f32.xlu2 %v1029_v22 }
 0x207   : > { %v1025_v31 = vpop.xlane.xlu1 %1024 }
 0x208   : > { %v1032_v14 = vmul.f32 %v1025_v31, %v5624_v42 }
 0x20a   : > { %v1035_v48 = vadd.f32 1e-05, %v1032_v14 }
 0x20c   : > { %4997 = vrsqrt.f32 %v1035_v48  ;;  %vm1044_vm7 = vweird.f32 %v1035_v48 }
 0x212   : > { %v4998_v49 = vpop.eup %4997 }
 0x213   : > { %v1039_v50 = vmul.f32 %v4998_v49, %v1035_v48  ;;  %vm1045_vm6 = vweird.f32 %v4998_v49 }
 0x214   : > { %vm1046_vm8 = vmor %vm1044_vm7, %vm1045_vm6  ;;  %vm2577_vm6 = vcmask 195584  }
 0x215   : > { %v1040_v52 = vmul.f32 %v4998_v49, %v1039_v50 }
 0x216   : > { %v1028_v60 = vpop.xlane.xlu2 %1027 }
 0x217   : > { %v1041_v61 = vmul.f32 0.5, %v1040_v52  ;;  %v1033_v62 = vmul.f32 %v1028_v60, %v5624_v42 }
 0x219   : > { %v1042_v3 = vsub.f32 1.5, %v1041_v61  ;;  %v5741_v4 = vadd.f32 1e-05, %v1033_v62 }
 0x21b   : > { %v1043_v11 = vmul.f32 %v4998_v49, %v1042_v3  ;;  %4999 = vrsqrt.f32 %v5741_v4  ;;  %vm1054_vm10 = vweird.f32 %v5741_v4 }
 0x21d   : > { %v1047_v32 = vsel %vm1046_vm8, %v4998_v49, %v1043_v11 }
 0x21e   : > { %v1071_v33 = vperm.slane %v1047_v32, 0  ;;  %v1072_v34 = vperm.slane %v1047_v32, 1  ;;  %v1073_v35 = vperm.slane %v1047_v32, 2  ;;  %v1074_v36 = vperm.slane %v1047_v32, 3 }
 0x21f   : > { %v1075_v30 = vperm.slane %v1047_v32, 4  ;;  %v1076_v37 = vperm.slane %v1047_v32, 5  ;;  %v1077_v38 = vperm.slane %v1047_v32, 6  ;;  %v1078_v39 = vperm.slane %v1047_v32, 7 }
 0x220   : > { %v1107_v44 = vmul.f32 %v1071_v33, %v5628_v53  ;;  %v1109_v45 = vmul.f32 %v1073_v35, %v5636_v55  ;;  %v1110_v46 = vmul.f32 %v1074_v36, %v5640_v56  ;;  %v1108_v47 = vmul.f32 %v1072_v34, %v5632_v54 }
 0x221   : > { %v5000_v22 = vpop.eup %4999  ;;  %v1111_v31 = vmul.f32 %v1075_v30, %v5642_v57  ;;  %v1112_v14 = vmul.f32 %v1076_v37, %v5644_v58  ;;  %v1113_v48 = vmul.f32 %v1077_v38, %v5646_v59  ;;  %v1114_v49 = vmul.f32 %v1078_v39, %v5654_v0  ;;  %v1031_v0 = vpop.xlane.xlu2 %1030 }
 0x222   : > { %v1142_v50 = vmul.f32 %v5732_v51, %v1107_v44  ;;  %v1144_v53 = vmul.f32 %v1129_v2, %v1109_v45  ;;  %v1145_v55 = vmul.f32 %v1130_v6, %v1110_v46  ;;  %v1049_v54 = vmul.f32 %v5000_v22, %v5741_v4 }
 0x223   : > { %v1146_v56 = vmul.f32 %v1131_v7, %v1111_v31  ;;  %v1147_v57 = vmul.f32 %v1132_v8, %v1112_v14  ;;  %v1148_v58 = vmul.f32 %v1133_v9, %v1113_v48  ;;  %v1149_v59 = vmul.f32 %v1134_v10, %v1114_v49 }
 0x224   : > { %v1177_v52 = vadd.f32 %v5738_v1, %v1142_v50  ;;  %v1179_v60 = vadd.f32 %v1164_v13, %v1144_v53  ;;  %v1180_v61 = vadd.f32 %v1165_v15, %v1145_v55  ;;  %v1050_v62 = vmul.f32 %v5000_v22, %v1049_v54 }
 0x225   : > { %v1181_v3 = vadd.f32 %v1166_v16, %v1146_v56  ;;  %v1182_v11 = vadd.f32 %v1167_v24, %v1147_v57  ;;  %v1143_v32 = vmul.f32 %v5763_v28, %v1108_v47  ;;  %v1034_v29 = vmul.f32 %v1031_v0, %v5624_v42 }
 0x226   : > { %1217 = vst [vmem:[#allocation1] ss:$9 sm:$0xff] %v1177_v52  ;;  %v1051_v12 = vmul.f32 0.5, %v1050_v62  ;;  %v1183_v33 = vadd.f32 %v1168_v25, %v1148_v58  ;;  %v1184_v34 = vadd.f32 %v1169_v26, %v1149_v59  ;;  %vm1055_vm9 = vweird.f32 %v5000_v22 }
 0x227   : > { %1221 = vst [vmem:[#allocation1 + $0x2] ss:$9 sm:$0xff] %v1179_v60  ;;  %v1037_v36 = vadd.f32 1e-05, %v1034_v29  ;;  %v1178_v30 = vadd.f32 %v5801_v5, %v1143_v32  ;;  %vm1056_vm11 = vmor %vm1054_vm10, %vm1055_vm9 }
 0x228   : > { %1223 = vst [vmem:[#allocation1 + $0x3] ss:$9 sm:$0xff] %v1180_v61  ;;  %v1052_v35 = vsub.f32 1.5, %v1051_v12 }
 0x229   : > { %1225 = vst [vmem:[#allocation1 + $0x4] ss:$9 sm:$0xff] %v1181_v3  ;;  %5001 = vrsqrt.f32 %v1037_v36  ;;  %vm1064_vm13 = vweird.f32 %v1037_v36 }
 0x22a   : > { %1227 = vst [vmem:[#allocation1 + $0x5] ss:$9 sm:$0xff] %v1182_v11  ;;  %v1053_v37 = vmul.f32 %v5000_v22, %v1052_v35 }
 0x22b   : > { %1229 = vst [vmem:[#allocation1 + $0x6] ss:$9 sm:$0xff] %v1183_v33 }
 0x22c   : > { %1231 = vst [vmem:[#allocation1 + $0x7] ss:$9 sm:$0xff] %v1184_v34  ;;  %v1057_v38 = vsel %vm1056_vm11, %v5000_v22, %v1053_v37 }
 0x22d   : > { %v1079_v39 = vperm.slane %v1057_v38, 0  ;;  %v1080_v43 = vperm.slane %v1057_v38, 1  ;;  %v1081_v44 = vperm.slane %v1057_v38, 2  ;;  %v1082_v45 = vperm.slane %v1057_v38, 3  ;;  %1219 = vst [vmem:[#allocation1 + $0x1] ss:$9 sm:$0xff] %v1178_v30 }
 0x22e   : > { %v1083_v46 = vperm.slane %v1057_v38, 4  ;;  %v1084_v47 = vperm.slane %v1057_v38, 5  ;;  %v1085_v31 = vperm.slane %v1057_v38, 6  ;;  %v1086_v14 = vperm.slane %v1057_v38, 7 }
 0x22f   : > { %v1115_v48 = vmul.f32 %v1079_v39, %v5668_v17  ;;  %v1117_v49 = vmul.f32 %v1081_v44, %v5675_v19  ;;  %v1118_v4 = vmul.f32 %v1082_v45, %v5679_v20  ;;  %v1116_v50 = vmul.f32 %v1080_v43, %v5671_v18  ;;  %v5002_v19 = vpop.eup %5001 }
 0x230   : > { %v1119_v22 = vmul.f32 %v1083_v46, %v5683_v21  ;;  %v1120_v53 = vmul.f32 %v1084_v47, %v5687_v23  ;;  %v1121_v55 = vmul.f32 %v1085_v31, %v5691_v63  ;;  %v1122_v54 = vmul.f32 %v1086_v14, %v5701_v27 }
 0x231   : > { %v1150_v56 = vmul.f32 %v5732_v51, %v1115_v48  ;;  %v1152_v57 = vmul.f32 %v1129_v2, %v1117_v49  ;;  %v1153_v17 = vmul.f32 %v1130_v6, %v1118_v4  ;;  %v1059_v58 = vmul.f32 %v5002_v19, %v1037_v36 }
 0x232   : > { %v1154_v18 = vmul.f32 %v1131_v7, %v1119_v22  ;;  %v1155_v20 = vmul.f32 %v1132_v8, %v1120_v53  ;;  %v1156_v21 = vmul.f32 %v1133_v9, %v1121_v55  ;;  %v1157_v23 = vmul.f32 %v1134_v10, %v1122_v54 }
 0x233   : > { %v1185_v63 = vadd.f32 %v5738_v1, %v1150_v56  ;;  %v1187_v27 = vadd.f32 %v1164_v13, %v1152_v57  ;;  %v1188_v2 = vadd.f32 %v1165_v15, %v1153_v17  ;;  %v1151_v8 = vmul.f32 %v5763_v28, %v1116_v50 }
 0x234   : > { %v1189_v6 = vadd.f32 %v1166_v16, %v1154_v18  ;;  %v1232_v7 = vld [vmem:[#allocation1] sm:$0xff]  ;;  %v1190_v9 = vadd.f32 %v1167_v24, %v1155_v20  ;;  %v1191_v10 = vadd.f32 %v1168_v25, %v1156_v21  ;;  %v1192_v13 = vadd.f32 %v1169_v26, %v1157_v23 }
 0x235   : > { %1233 = vst [vmem:[#allocation1] ss:$9 sm:$0xff] %v1185_v63  ;;  %4683 = vmatmul.msk.f32.vlgmr.msra.gmra.mxu1 %vm878_vm3, %v1232_v7  ;;  %v1060_v15 = vmul.f32 %v5002_v19, %v1059_v58  ;;  %v1186_v16 = vadd.f32 %v5801_v5, %v1151_v8  ;;  %vm1065_vm12 = vweird.f32 %v5002_v19 }
 0x236   : > { %1235 = vst [vmem:[#allocation1 + $0x2] ss:$9 sm:$0xff] %v1187_v27  ;;  %vm1066_vm14 = vmor %vm1064_vm13, %vm1065_vm12 }
 0x237   : > { %1236 = vst [vmem:[#allocation1 + $0x3] ss:$9 sm:$0xff] %v1188_v2  ;;  %v1061_v59 = vmul.f32 0.5, %v1060_v15 }
 0x238   : > { %1237 = vst [vmem:[#allocation1 + $0x4] ss:$9 sm:$0xff] %v1189_v6 }
 0x239   : > { %1238 = vst [vmem:[#allocation1 + $0x5] ss:$9 sm:$0xff] %v1190_v9  ;;  %v1062_v24 = vsub.f32 1.5, %v1061_v59 }
 0x23a   : > { %1239 = vst [vmem:[#allocation1 + $0x6] ss:$9 sm:$0xff] %v1191_v10 }
 0x23b   : > { %1240 = vst [vmem:[#allocation1 + $0x7] ss:$9 sm:$0xff] %v1192_v13  ;;  %v1063_v0 = vmul.f32 %v5002_v19, %v1062_v24 }
 0x23c   : > { %1234 = vst [vmem:[#allocation1 + $0x1] ss:$9 sm:$0xff] %v1186_v16 }
 0x23d   : > { %v1067_v25 = vsel %vm1066_vm14, %v5002_v19, %v1063_v0 }
 0x23e   : > { %v1087_v52 = vperm.slane %v1067_v25, 0  ;;  %v1088_v60 = vperm.slane %v1067_v25, 1 }
 0x240   : > { %v1123_v26 = vmul.f32 %v1087_v52, %v5717_v40  ;;  %v1124_v61 = vmul.f32 %v1088_v60, %v5720_v41 }
 0x242   : > { %v1158_v3 = vmul.f32 %v5732_v51, %v1123_v26  ;;  %v1159_v11 = vmul.f32 %v5763_v28, %v1124_v61 }
 0x243   : > { %v1241_v62 = vld [vmem:[#allocation1] sm:$0xff] }
 0x244   : > { %4684 = vmatmul.msk.f32.gmra.mxu1 %vm878_vm3, %v1241_v62  ;;  %v1193_v12 = vadd.f32 %v5738_v1, %v1158_v3  ;;  %v1194_v32 = vadd.f32 %v5801_v5, %v1159_v11 }
 0x246   : > { %1242 = vst [vmem:[#allocation1] ss:$9 sm:$0xff] %v1193_v12 }
 0x247   : > { %1243 = vst [vmem:[#allocation1 + $0x1] ss:$9 sm:$0xff] %v1194_v32 }
 0x24e   : > { %v1244_v29 = vld [vmem:[#allocation1] sm:$0xff] }
 0x24f   : > { %4685 = vmatmul.msk.f32.gmra.mxu1 %vm878_vm3, %v1244_v29 }
 0x2b2   : > { %v5858_v33 = vpop.f32.mrf.mxu1 }
 0x2b3   : > { %v5861_v40 = vmul.f32 0.17677669, %v5858_v33  ;;  %v5901_v38 = vrot.slane %v5858_v33, 1  ;;  %v5906_v43 = vrot.slane %v5858_v33, 2  ;;  %v5910_v44 = vrot.slane %v5858_v33, 3 }
 0x2b4   : > { %v5914_v45 = vrot.slane %v5858_v33, 4  ;;  %v5918_v46 = vrot.slane %v5858_v33, 5  ;;  %v5922_v47 = vrot.slane %v5858_v33, 6  ;;  %v5926_v31 = vrot.slane %v5858_v33, 7 }
 0x2b5   : > { %v5864_v41 = vrot.slane %v5861_v40, 1  ;;  %v5867_v51 = vrot.slane %v5861_v40, 2  ;;  %v5870_v1 = vrot.slane %v5861_v40, 3  ;;  %1316 = vst [vmem:[#allocation1] ss:$9 sm:$0xff] %v5861_v40  ;;  %v5874_v28 = vrot.slane %v5861_v40, 4 }
 0x2b6   : > { %v5877_v5 = vrot.slane %v5861_v40, 5  ;;  %v5881_v34 = vrot.slane %v5861_v40, 6  ;;  %v5885_v35 = vrot.slane %v5861_v40, 7 }
 0x2b7   : > { %1318 = vst [vmem:[#allocation1 + $0x1] ss:$9 sm:$0xff] %v5864_v41 }
 0x2b8   : > { %1320 = vst [vmem:[#allocation1 + $0x2] ss:$9 sm:$0xff] %v5867_v51 }
 0x2b9   : > { %1322 = vst [vmem:[#allocation1 + $0x3] ss:$9 sm:$0xff] %v5870_v1 }
 0x2ba   : > { %1324 = vst [vmem:[#allocation1 + $0x4] ss:$9 sm:$0xff] %v5874_v28 }
 0x2bb   : > { %1326 = vst [vmem:[#allocation1 + $0x5] ss:$9 sm:$0xff] %v5877_v5 }
 0x2bc   : > { %1328 = vst [vmem:[#allocation1 + $0x6] ss:$9 sm:$0xff] %v5881_v34 }
 0x2bd   : > { %1330 = vst [vmem:[#allocation1 + $0x7] ss:$9 sm:$0xff] %v5885_v35 }
 0x2c1   : > { %v5892_v36 = vpop.f32.mrf.mxu1 }
 0x2c2   : > { %v5895_v30 = vmul.f32 0.17677669, %v5892_v36  ;;  %v5975_v18 = vrot.slane %v5892_v36, 1  ;;  %v5978_v20 = vrot.slane %v5892_v36, 2  ;;  %v5983_v23 = vrot.slane %v5892_v36, 3 }
 0x2c3   : > { %v5987_v63 = vrot.slane %v5892_v36, 4  ;;  %v5991_v27 = vrot.slane %v5892_v36, 5  ;;  %v5995_v2 = vrot.slane %v5892_v36, 6  ;;  %v5999_v6 = vrot.slane %v5892_v36, 7 }
 0x2c4   : > { %v5897_v37 = vld [vmem:[#allocation1] sm:$0xff]  ;;  %v5933_v48 = vrot.slane %v5895_v30, 1  ;;  %v5936_v49 = vrot.slane %v5895_v30, 2  ;;  %v5939_v50 = vrot.slane %v5895_v30, 3  ;;  %v5943_v22 = vrot.slane %v5895_v30, 4 }
 0x2c5   : > { %1332 = vst [vmem:[#allocation1] ss:$9 sm:$0xff] %v5895_v30  ;;  %v5947_v53 = vrot.slane %v5895_v30, 5  ;;  %v5953_v54 = vrot.slane %v5895_v30, 6  ;;  %v5957_v56 = vrot.slane %v5895_v30, 7 }
 0x2cc   : > { %v5903_v39 = vld [vmem:[#allocation1] sm:$0xff]  ;;  %v5950_v55 = vpop.f32.mrf.mxu1 }
 0x2cd   : > { %1334 = vst [vmem:[#allocation1] ss:$9 sm:$0xff] %v5858_v33  ;;  %v5962_v57 = vmul.f32 0.17677669, %v5950_v55  ;;  %v6006_v7 = vrot.slane %v5950_v55, 1 }
 0x2ce   : > { %1336 = vst [vmem:[#allocation1 + $0x1] ss:$9 sm:$0xff] %v5901_v38 }
 0x2cf   : > { %1338 = vst [vmem:[#allocation1 + $0x2] ss:$9 sm:$0xff] %v5906_v43  ;;  %v5967_v17 = vrot.slane %v5962_v57, 1 }
 0x2d0   : > { %1340 = vst [vmem:[#allocation1 + $0x3] ss:$9 sm:$0xff] %v5910_v44 }
 0x2d1   : > { %1342 = vst [vmem:[#allocation1 + $0x4] ss:$9 sm:$0xff] %v5914_v45 }
 0x2d2   : > { %1344 = vst [vmem:[#allocation1 + $0x5] ss:$9 sm:$0xff] %v5918_v46 }
 0x2d3   : > { %1346 = vst [vmem:[#allocation1 + $0x6] ss:$9 sm:$0xff] %v5922_v47 }
 0x2d4   : > { %1348 = vst [vmem:[#allocation1 + $0x7] ss:$9 sm:$0xff] %v5926_v31 }
 0x2db   : > { %v1349_v14 = vld [vmem:[#allocation1] sm:$0xff] }
 0x2dc   : > { %1350 = vst [vmem:[#allocation1] ss:$9 sm:$0xff] %v5892_v36  ;;  %1352 = vrot.lane.b32.xlu1 %v1349_v14, %s5352_s18 }
 0x2e3   : > { %v1351_v4 = vld [vmem:[#allocation1] sm:$0xff] }
 0x2e4   : > { %1388 = vst [vmem:[#allocation1] ss:$9 sm:$0xff] %v5933_v48  ;;  %1354 = vrot.lane.b32.xlu0 %v1351_v4, %s5352_s18 }
 0x2e5   : > { %1390 = vst [vmem:[#allocation1 + $0x1] ss:$9 sm:$0xff] %v5936_v49 }
 0x2e6   : > { %1392 = vst [vmem:[#allocation1 + $0x2] ss:$9 sm:$0xff] %v5939_v50 }
 0x2e7   : > { %1394 = vst [vmem:[#allocation1 + $0x3] ss:$9 sm:$0xff] %v5943_v22 }
 0x2e8   : > { %1396 = vst [vmem:[#allocation1 + $0x4] ss:$9 sm:$0xff] %v5947_v53 }
 0x2e9   : > { %1398 = vst [vmem:[#allocation1 + $0x5] ss:$9 sm:$0xff] %v5953_v54 }
 0x2ea   : > { %1400 = vst [vmem:[#allocation1 + $0x6] ss:$9 sm:$0xff] %v5957_v56 }
 0x2eb   : > { %1402 = vst [vmem:[#allocation1 + $0x7] ss:$9 sm:$0xff] %v5962_v57 }
 0x2f2   : > { %v5969_v19 = vld [vmem:[#allocation1] sm:$0xff] }
 0x2f3   : > { %1404 = vst [vmem:[#allocation1] ss:$9 sm:$0xff] %v5967_v17 }
 0x2fa   : > { %v5980_v21 = vld [vmem:[#allocation1] sm:$0xff] }
 0x2fb   : > { %1406 = vst [vmem:[#allocation1] ss:$9 sm:$0xff] %v5975_v18 }
 0x2fc   : > { %1408 = vst [vmem:[#allocation1 + $0x1] ss:$9 sm:$0xff] %v5978_v20 }
 0x2fd   : > { %1410 = vst [vmem:[#allocation1 + $0x2] ss:$9 sm:$0xff] %v5983_v23 }
 0x2fe   : > { %1412 = vst [vmem:[#allocation1 + $0x3] ss:$9 sm:$0xff] %v5987_v63 }
 0x2ff   : > { %1414 = vst [vmem:[#allocation1 + $0x4] ss:$9 sm:$0xff] %v5991_v27 }
 0x300   : > { %1416 = vst [vmem:[#allocation1 + $0x5] ss:$9 sm:$0xff] %v5995_v2 }
 0x301   : > { %1418 = vst [vmem:[#allocation1 + $0x6] ss:$9 sm:$0xff] %v5999_v6 }
 0x302   : > { %1420 = vst [vmem:[#allocation1 + $0x7] ss:$9 sm:$0xff] %v5950_v55 }
 0x309   : > { %v1421_v8 = vld [vmem:[#allocation1] sm:$0xff] }
 0x30a   : > { %1422 = vst [vmem:[#allocation1] ss:$9 sm:$0xff] %v6006_v7  ;;  %1424 = vrot.lane.b32.xlu0 %v1421_v8, %s5352_s18 }
 0x311   : > { %v1423_v9 = vld [vmem:[#allocation1] sm:$0xff] }
 0x312   : > { %1505 = vst [vmem:[#allocation1] ss:$9 sm:$0xff] %v5858_v33  ;;  %1426 = vrot.lane.b32.xlu2 %v1423_v9, %s5352_s18 }
 0x313   : > { %1507 = vst [vmem:[#allocation1 + $0x1] ss:$9 sm:$0xff] %v5901_v38 }
 0x314   : > { %1509 = vst [vmem:[#allocation1 + $0x2] ss:$9 sm:$0xff] %v5906_v43 }
 0x315   : > { %1511 = vst [vmem:[#allocation1 + $0x3] ss:$9 sm:$0xff] %v5910_v44 }
 0x316   : > { %1513 = vst [vmem:[#allocation1 + $0x4] ss:$9 sm:$0xff] %v5914_v45 }
 0x317   : > { %1515 = vst [vmem:[#allocation1 + $0x5] ss:$9 sm:$0xff] %v5918_v46 }
 0x318   : > { %1517 = vst [vmem:[#allocation1 + $0x6] ss:$9 sm:$0xff] %v5922_v47 }
 0x319   : > { %1519 = vst [vmem:[#allocation1 + $0x7] ss:$9 sm:$0xff] %v5926_v31 }
 0x320   : > { %v1520_v58 = vld [vmem:[#allocation1] sm:$0xff] }
 0x321   : > { %1521 = vst [vmem:[#allocation1] ss:$9 sm:$0xff] %v5892_v36  ;;  %1523 = vrot.lane.b32.xlu0 %v1520_v58, %s7468_s25 }
 0x328   : > { %v1522_v10 = vld [vmem:[#allocation1] sm:$0xff] }
 0x329   : > { %1560 = vst [vmem:[#allocation1] ss:$9 sm:$0xff] %v5975_v18  ;;  %1525 = vrot.lane.b32.xlu0 %v1522_v10, %s7468_s25 }
 0x32a   : > { %1562 = vst [vmem:[#allocation1 + $0x1] ss:$9 sm:$0xff] %v5978_v20 }
 0x32b   : > { %1564 = vst [vmem:[#allocation1 + $0x2] ss:$9 sm:$0xff] %v5983_v23 }
 0x32c   : > { %1566 = vst [vmem:[#allocation1 + $0x3] ss:$9 sm:$0xff] %v5987_v63 }
 0x32d   : > { %1568 = vst [vmem:[#allocation1 + $0x4] ss:$9 sm:$0xff] %v5991_v27 }
 0x32e   : > { %1570 = vst [vmem:[#allocation1 + $0x5] ss:$9 sm:$0xff] %v5995_v2 }
 0x32f   : > { %1572 = vst [vmem:[#allocation1 + $0x6] ss:$9 sm:$0xff] %v5999_v6 }
 0x330   : > { %1574 = vst [vmem:[#allocation1 + $0x7] ss:$9 sm:$0xff] %v5950_v55 }
 0x337   : > { %v6030_v13 = vld [vmem:[#allocation1] sm:$0xff] }
 0x338   : > { %1576 = vst [vmem:[#allocation1] ss:$9 sm:$0xff] %v6006_v7 }
 0x33f   : > { %v6033_v15 = vld [vmem:[#allocation1] sm:$0xff] }
 0x340   : > { %1614 = vst [vmem:[#allocation1] ss:$9 sm:$0xff] %v5861_v40 }
 0x341   : > { %1616 = vst [vmem:[#allocation1 + $0x1] ss:$9 sm:$0xff] %v5864_v41 }
 0x342   : > { %1618 = vst [vmem:[#allocation1 + $0x2] ss:$9 sm:$0xff] %v5867_v51 }
 0x343   : > { %1620 = vst [vmem:[#allocation1 + $0x3] ss:$9 sm:$0xff] %v5870_v1 }
 0x344   : > { %1622 = vst [vmem:[#allocation1 + $0x4] ss:$9 sm:$0xff] %v5874_v28 }
 0x345   : > { %1624 = vst [vmem:[#allocation1 + $0x5] ss:$9 sm:$0xff] %v5877_v5 }
 0x346   : > { %1626 = vst [vmem:[#allocation1 + $0x6] ss:$9 sm:$0xff] %v5881_v34 }
 0x347   : > { %1628 = vst [vmem:[#allocation1 + $0x7] ss:$9 sm:$0xff] %v5885_v35 }
 0x34e   : > { %v1629_v16 = vld [vmem:[#allocation1] sm:$0xff]  ;;  %v1353_v32 = vpop.permute.xlu1 %1352 }
 0x34f   : > { %1630 = vst [vmem:[#allocation1] ss:$9 sm:$0xff] %v5895_v30  ;;  %1632 = vrot.lane.b32.xlu0 %v1629_v16, %s5354_s26 }
 0x356   : > { %v1631_v59 = vld [vmem:[#allocation1] sm:$0xff]  ;;  %v1355_v12 = vpop.permute.xlu0 %1354 }
 0x357   : > { %1636 = vst [vmem:[#allocation1] ss:$9 sm:$0xff] %v5858_v33  ;;  %1634 = vrot.lane.b32.xlu0 %v1631_v59, %s5354_s26  ;;  %4686 = vmatpush.xpose.msk.msra.mxu3 %vm1356_vm15, %v1355_v12 }
 0x358   : > { %1638 = vst [vmem:[#allocation1 + $0x1] ss:$9 sm:$0xff] %v5901_v38 }
 0x359   : > { %1640 = vst [vmem:[#allocation1 + $0x2] ss:$9 sm:$0xff] %v5906_v43 }
 0x35a   : > { %1642 = vst [vmem:[#allocation1 + $0x3] ss:$9 sm:$0xff] %v5910_v44 }
 0x35b   : > { %1644 = vst [vmem:[#allocation1 + $0x4] ss:$9 sm:$0xff] %v5914_v45  ;;  %4687 = vmatpush.xpose.msk.msra.mxu3 %vm1356_vm15, %v1353_v32 }
 0x35c   : > { %1646 = vst [vmem:[#allocation1 + $0x5] ss:$9 sm:$0xff] %v5918_v46 }
 0x35d   : > { %1648 = vst [vmem:[#allocation1 + $0x6] ss:$9 sm:$0xff] %v5922_v47 }
 0x35e   : > { %1650 = vst [vmem:[#allocation1 + $0x7] ss:$9 sm:$0xff] %v5926_v31  ;;  %4688 = vmatmul.msk.f32.vlgmr.msra.gmra.mxu3 %vm1356_vm15, %v5897_v37 }
 0x365   : > { %v1651_v24 = vld [vmem:[#allocation1] sm:$0xff] }
 0x366   : > { %1652 = vst [vmem:[#allocation1] ss:$9 sm:$0xff] %v5892_v36  ;;  %1654 = vrot.lane.b32.xlu0 %v1651_v24, %s5355_s29  ;;  %4689 = vmatmul.msk.f32.gmra.mxu3 %vm1356_vm15, %v5903_v39 }
 0x36c   : > { %v1427_v14 = vpop.permute.xlu2 %1426 }
 0x36d   : > { %v1653_v0 = vld [vmem:[#allocation1] sm:$0xff]  ;;  %4690 = vmatpush.xpose.msk.msrb.mxu3 %vm1356_vm15, %v1427_v14 }
 0x36e   : > { %1689 = vst [vmem:[#allocation1] ss:$9 sm:$0xff] %v5933_v48  ;;  %1656 = vrot.lane.b32.xlu0 %v1653_v0, %s5355_s29 }
 0x36f   : > { %1691 = vst [vmem:[#allocation1 + $0x1] ss:$9 sm:$0xff] %v5936_v49 }
 0x370   : > { %1693 = vst [vmem:[#allocation1 + $0x2] ss:$9 sm:$0xff] %v5939_v50 }
 0x371   : > { %1695 = vst [vmem:[#allocation1 + $0x3] ss:$9 sm:$0xff] %v5943_v22 }
 0x372   : > { %1697 = vst [vmem:[#allocation1 + $0x4] ss:$9 sm:$0xff] %v5947_v53 }
 0x373   : > { %1699 = vst [vmem:[#allocation1 + $0x5] ss:$9 sm:$0xff] %v5953_v54 }
 0x374   : > { %1701 = vst [vmem:[#allocation1 + $0x6] ss:$9 sm:$0xff] %v5957_v56 }
 0x375   : > { %1703 = vst [vmem:[#allocation1 + $0x7] ss:$9 sm:$0xff] %v5962_v57 }
 0x37c   : > { %v1704_v25 = vld [vmem:[#allocation1] sm:$0xff]  ;;  %v1425_v37 = vpop.permute.xlu0 %1424 }
 0x37d   : > { %1705 = vst [vmem:[#allocation1] ss:$9 sm:$0xff] %v5967_v17  ;;  %1707 = vrot.lane.b32.xlu0 %v1704_v25, %s5354_s26  ;;  %4691 = vmatpush.xpose.msk.msrb.mxu3 %vm1356_vm15, %v1425_v37 }
 0x380   : > { %4692 = vmatmul.msk.f32.vlgmr.msrb.gmra.mxu3 %vm1356_vm15, %v5969_v19 }
 0x384   : > { %v1706_v52 = vld [vmem:[#allocation1] sm:$0xff] }
 0x385   : > { %1711 = vst [vmem:[#allocation1] ss:$9 sm:$0xff] %v5975_v18  ;;  %1709 = vrot.lane.b32.xlu0 %v1706_v52, %s5354_s26 }
 0x386   : > { %1713 = vst [vmem:[#allocation1 + $0x1] ss:$9 sm:$0xff] %v5978_v20 }
 0x387   : > { %1715 = vst [vmem:[#allocation1 + $0x2] ss:$9 sm:$0xff] %v5983_v23 }
 0x388   : > { %1717 = vst [vmem:[#allocation1 + $0x3] ss:$9 sm:$0xff] %v5987_v63  ;;  %4693 = vmatmul.msk.f32.gmra.mxu3 %vm1356_vm15, %v5980_v21 }
 0x389   : > { %1719 = vst [vmem:[#allocation1 + $0x4] ss:$9 sm:$0xff] %v5991_v27 }
 0x38a   : > { %1721 = vst [vmem:[#allocation1 + $0x5] ss:$9 sm:$0xff] %v5995_v2 }
 0x38b   : > { %1723 = vst [vmem:[#allocation1 + $0x6] ss:$9 sm:$0xff] %v5999_v6 }
 0x38c   : > { %1725 = vst [vmem:[#allocation1 + $0x7] ss:$9 sm:$0xff] %v5950_v55 }
 0x393   : > { %v1726_v60 = vld [vmem:[#allocation1] sm:$0xff]  ;;  %v1524_v9 = vpop.permute.xlu0 %1523 }
 0x394   : > { %1727 = vst [vmem:[#allocation1] ss:$9 sm:$0xff] %v6006_v7  ;;  %1729 = vrot.lane.b32.xlu0 %v1726_v60, %s5355_s29 }
 0x39b   : > { %v1728_v26 = vld [vmem:[#allocation1] sm:$0xff]  ;;  %v1526_v19 = vpop.permute.xlu0 %1525 }
 0x39c   : > { %1808 = vst [vmem:[#allocation1] ss:$9 sm:$0xff] %v5858_v33  ;;  %1731 = vrot.lane.b32.xlu1 %v1728_v26, %s5355_s29  ;;  %4694 = vmatpush.msk.msra.mxu2 %vm1534_vm0, %v1526_v19 }
 0x39d   : > { %1810 = vst [vmem:[#allocation1 + $0x1] ss:$9 sm:$0xff] %v5901_v38 }
 0x39e   : > { %1812 = vst [vmem:[#allocation1 + $0x2] ss:$9 sm:$0xff] %v5906_v43  ;;  %1552 = vmatpush.msra.mxu2 %v1524_v9 }
 0x39f   : > { %1814 = vst [vmem:[#allocation1 + $0x3] ss:$9 sm:$0xff] %v5910_v44 }
 0x3a0   : > { %1816 = vst [vmem:[#allocation1 + $0x4] ss:$9 sm:$0xff] %v5914_v45 }
 0x3a1   : > { %1818 = vst [vmem:[#allocation1 + $0x5] ss:$9 sm:$0xff] %v5918_v46 }
 0x3a2   : > { %1820 = vst [vmem:[#allocation1 + $0x6] ss:$9 sm:$0xff] %v5922_v47 }
 0x3a3   : > { %1822 = vst [vmem:[#allocation1 + $0x7] ss:$9 sm:$0xff] %v5926_v31 }
 0x3aa   : > { %v6087_v61 = vld [vmem:[#allocation1] sm:$0xff] }
 0x3ab   : > { %1824 = vst [vmem:[#allocation1] ss:$9 sm:$0xff] %v5892_v36 }
 0x3b2   : > { %v6090_v62 = vld [vmem:[#allocation1] sm:$0xff] }
 0x3b3   : > { %1862 = vst [vmem:[#allocation1] ss:$9 sm:$0xff] %v5975_v18 }
 0x3b4   : > { %1864 = vst [vmem:[#allocation1 + $0x1] ss:$9 sm:$0xff] %v5978_v20 }
 0x3b5   : > { %1866 = vst [vmem:[#allocation1 + $0x2] ss:$9 sm:$0xff] %v5983_v23 }
 0x3b6   : > { %1868 = vst [vmem:[#allocation1 + $0x3] ss:$9 sm:$0xff] %v5987_v63 }
 0x3b7   : > { %1870 = vst [vmem:[#allocation1 + $0x4] ss:$9 sm:$0xff] %v5991_v27 }
 0x3b8   : > { %1872 = vst [vmem:[#allocation1 + $0x5] ss:$9 sm:$0xff] %v5995_v2 }
 0x3b9   : > { %1874 = vst [vmem:[#allocation1 + $0x6] ss:$9 sm:$0xff] %v5999_v6 }
 0x3ba   : > { %1876 = vst [vmem:[#allocation1 + $0x7] ss:$9 sm:$0xff] %v5950_v55 }
 0x3c1   : > { %v6100_v3 = vld [vmem:[#allocation1] sm:$0xff]  ;;  %v1633_v10 = vpop.permute.xlu0 %1632 }
 0x3c2   : > { %1878 = vst [vmem:[#allocation1] ss:$9 sm:$0xff] %v6006_v7 }
 0x3c9   : > { %v6103_v11 = vld [vmem:[#allocation1] sm:$0xff]  ;;  %v1635_v59 = vpop.permute.xlu0 %1634 }
 0x3ca   : > { %1916 = vst [vmem:[#allocation1] ss:$9 sm:$0xff] %v5861_v40 }
 0x3cb   : > { %1918 = vst [vmem:[#allocation1 + $0x1] ss:$9 sm:$0xff] %v5864_v41 }
 0x3cc   : > { %1920 = vst [vmem:[#allocation1 + $0x2] ss:$9 sm:$0xff] %v5867_v51 }
 0x3cd   : > { %1922 = vst [vmem:[#allocation1 + $0x3] ss:$9 sm:$0xff] %v5870_v1 }
 0x3ce   : > { %1924 = vst [vmem:[#allocation1 + $0x4] ss:$9 sm:$0xff] %v5874_v28 }
 0x3cf   : > { %1926 = vst [vmem:[#allocation1 + $0x5] ss:$9 sm:$0xff] %v5877_v5 }
 0x3d0   : > { %1928 = vst [vmem:[#allocation1 + $0x6] ss:$9 sm:$0xff] %v5881_v34 }
 0x3d1   : > { %1930 = vst [vmem:[#allocation1 + $0x7] ss:$9 sm:$0xff] %v5885_v35 }
 0x3d8   : > { %v1931_v29 = vld [vmem:[#allocation1] sm:$0xff]  ;;  %v1655_v0 = vpop.permute.xlu0 %1654 }
 0x3d9   : > { %1932 = vst [vmem:[#allocation1] ss:$9 sm:$0xff] %v5895_v30  ;;  %1934 = vrot.lane.b32.xlu0 %v1931_v29, %s5356_s20 }
 0x3e0   : > { %v1933_v4 = vld [vmem:[#allocation1] sm:$0xff]  ;;  %v1657_v25 = vpop.permute.xlu0 %1656 }
 0x3e1   : > { %1938 = vst [vmem:[#allocation1] ss:$9 sm:$0xff] %v5858_v33  ;;  %1936 = vrot.lane.b32.xlu0 %v1933_v4, %s5356_s20  ;;  %4700 = vmatpush.xpose.msk.msrb.mxu0 %vm1356_vm15, %v1657_v25  ;;  %v4949_v25 = vpack.i.bf16 %v6100_v3, %v6087_v61 }
 0x3e2   : > { %1940 = vst [vmem:[#allocation1 + $0x1] ss:$9 sm:$0xff] %v5901_v38 }
 0x3e3   : > { %1942 = vst [vmem:[#allocation1 + $0x2] ss:$9 sm:$0xff] %v5906_v43 }
 0x3e4   : > { %1944 = vst [vmem:[#allocation1 + $0x3] ss:$9 sm:$0xff] %v5910_v44 }
 0x3e5   : > { %1946 = vst [vmem:[#allocation1 + $0x4] ss:$9 sm:$0xff] %v5914_v45  ;;  %4701 = vmatpush.xpose.msk.msrb.mxu0 %vm1356_vm15, %v1655_v0 }
 0x3e6   : > { %1948 = vst [vmem:[#allocation1 + $0x5] ss:$9 sm:$0xff] %v5918_v46 }
 0x3e7   : > { %1950 = vst [vmem:[#allocation1 + $0x6] ss:$9 sm:$0xff] %v5922_v47 }
 0x3e8   : > { %1952 = vst [vmem:[#allocation1 + $0x7] ss:$9 sm:$0xff] %v5926_v31  ;;  %4702 = vmatmul.msk.f32.vlgmr.msrb.gmra.mxu0 %vm1356_vm15, %v1633_v10 }
 0x3ef   : > { %v1953_v39 = vld [vmem:[#allocation1] sm:$0xff]  ;;  %v1708_v26 = vpop.permute.xlu0 %1707 }
 0x3f0   : > { %1954 = vst [vmem:[#allocation1] ss:$9 sm:$0xff] %v5892_v36  ;;  %1956 = vrot.lane.b32.xlu1 %v1953_v39, %s5357_s28  ;;  %4703 = vmatmul.msk.f32.gmra.mxu0 %vm1356_vm15, %v1635_v59 }
 0x3f7   : > { %v1955_v8 = vld [vmem:[#allocation1] sm:$0xff]  ;;  %v6188_v12 = vpop.permute.xlu0 %1709 }
 0x3f8   : > { %1991 = vst [vmem:[#allocation1] ss:$9 sm:$0xff] %v5933_v48  ;;  %1958 = vrot.lane.b32.xlu2 %v1955_v8, %s5357_s28 }
 0x3f9   : > { %1993 = vst [vmem:[#allocation1 + $0x1] ss:$9 sm:$0xff] %v5936_v49 }
 0x3fa   : > { %1995 = vst [vmem:[#allocation1 + $0x2] ss:$9 sm:$0xff] %v5939_v50 }
 0x3fb   : > { %1997 = vst [vmem:[#allocation1 + $0x3] ss:$9 sm:$0xff] %v5943_v22 }
 0x3fc   : > { %1999 = vst [vmem:[#allocation1 + $0x4] ss:$9 sm:$0xff] %v5947_v53 }
 0x3fd   : > { %2001 = vst [vmem:[#allocation1 + $0x5] ss:$9 sm:$0xff] %v5953_v54 }
 0x3fe   : > { %2003 = vst [vmem:[#allocation1 + $0x6] ss:$9 sm:$0xff] %v5957_v56 }
 0x3ff   : > { %2005 = vst [vmem:[#allocation1 + $0x7] ss:$9 sm:$0xff] %v5962_v57 }
 0x406   : > { %v2006_v21 = vld [vmem:[#allocation1] sm:$0xff]  ;;  %v1730_v4 = vpop.permute.xlu0 %1729 }
 0x407   : > { %2007 = vst [vmem:[#allocation1] ss:$9 sm:$0xff] %v5967_v17  ;;  %2009 = vrot.lane.b32.xlu2 %v2006_v21, %s5356_s20 }
 0x40e   : > { %v6150_v58 = vld [vmem:[#allocation1] sm:$0xff]  ;;  %v1732_v29 = vpop.permute.xlu1 %1731 }
 0x40f   : > { %2013 = vst [vmem:[#allocation1] ss:$9 sm:$0xff] %v5975_v18  ;;  %4704 = vmatpush.xpose.msk.msrb.mxu1 %vm1356_vm15, %v1732_v29  ;;  %4849 = vmatpush.xpose.msk.msrb.mxu2 %vm1356_vm15, %v1732_v29 }
 0x410   : > { %2015 = vst [vmem:[#allocation1 + $0x1] ss:$9 sm:$0xff] %v5978_v20 }
 0x411   : > { %2017 = vst [vmem:[#allocation1 + $0x2] ss:$9 sm:$0xff] %v5983_v23 }
 0x412   : > { %2019 = vst [vmem:[#allocation1 + $0x3] ss:$9 sm:$0xff] %v5987_v63 }
 0x413   : > { %2021 = vst [vmem:[#allocation1 + $0x4] ss:$9 sm:$0xff] %v5991_v27  ;;  %4705 = vmatpush.xpose.msk.msrb.mxu1 %vm1356_vm15, %v1730_v4  ;;  %4850 = vmatpush.xpose.msk.msrb.mxu2 %vm1356_vm15, %v1730_v4 }
 0x414   : > { %2023 = vst [vmem:[#allocation1 + $0x5] ss:$9 sm:$0xff] %v5995_v2 }
 0x415   : > { %2025 = vst [vmem:[#allocation1 + $0x6] ss:$9 sm:$0xff] %v5999_v6 }
 0x416   : > { %2027 = vst [vmem:[#allocation1 + $0x7] ss:$9 sm:$0xff] %v5950_v55  ;;  %4706 = vmatmul.msk.f32.vlgmr.msrb.gmra.mxu1 %vm1356_vm15, %v1708_v26 }
 0x41d   : > { %v2028_v16 = vld [vmem:[#allocation1] sm:$0xff] }
 0x41e   : > { %2029 = vst [vmem:[#allocation1] ss:$9 sm:$0xff] %v6006_v7  ;;  %2031 = vrot.lane.b32.xlu2 %v2028_v16, %s5357_s28 }
 0x425   : > { %v2030_v24 = vld [vmem:[#allocation1] sm:$0xff] }
 0x426   : > { %2110 = vst [vmem:[#allocation1] ss:$9 sm:$0xff] %v5858_v33  ;;  %2033 = vrot.lane.b32.xlu1 %v2030_v24, %s5357_s28 }
 0x427   : > { %2112 = vst [vmem:[#allocation1 + $0x1] ss:$9 sm:$0xff] %v5901_v38 }
 0x428   : > { %2114 = vst [vmem:[#allocation1 + $0x2] ss:$9 sm:$0xff] %v5906_v43 }
 0x429   : > { %2116 = vst [vmem:[#allocation1 + $0x3] ss:$9 sm:$0xff] %v5910_v44 }
 0x42a   : > { %2118 = vst [vmem:[#allocation1 + $0x4] ss:$9 sm:$0xff] %v5914_v45 }
 0x42b   : > { %2120 = vst [vmem:[#allocation1 + $0x5] ss:$9 sm:$0xff] %v5918_v46 }
 0x42c   : > { %2122 = vst [vmem:[#allocation1 + $0x6] ss:$9 sm:$0xff] %v5922_v47 }
 0x42d   : > { %2124 = vst [vmem:[#allocation1 + $0x7] ss:$9 sm:$0xff] %v5926_v31 }
 0x434   : > { %v6172_v52 = vld [vmem:[#allocation1] sm:$0xff] }
 0x435   : > { %2126 = vst [vmem:[#allocation1] ss:$9 sm:$0xff] %v5892_v36 }
 0x43c   : > { %v6177_v60 = vld [vmem:[#allocation1] sm:$0xff] }
 0x43d   : > { %2164 = vst [vmem:[#allocation1] ss:$9 sm:$0xff] %v5975_v18 }
 0x43e   : > { %2166 = vst [vmem:[#allocation1 + $0x1] ss:$9 sm:$0xff] %v5978_v20 }
 0x43f   : > { %2168 = vst [vmem:[#allocation1 + $0x2] ss:$9 sm:$0xff] %v5983_v23 }
 0x440   : > { %2170 = vst [vmem:[#allocation1 + $0x3] ss:$9 sm:$0xff] %v5987_v63 }
 0x441   : > { %2172 = vst [vmem:[#allocation1 + $0x4] ss:$9 sm:$0xff] %v5991_v27 }
 0x442   : > { %2174 = vst [vmem:[#allocation1 + $0x5] ss:$9 sm:$0xff] %v5995_v2 }
 0x443   : > { %2176 = vst [vmem:[#allocation1 + $0x6] ss:$9 sm:$0xff] %v5999_v6 }
 0x444   : > { %2178 = vst [vmem:[#allocation1 + $0x7] ss:$9 sm:$0xff] %v5950_v55 }
 0x44b   : > { %v6190_v32 = vld [vmem:[#allocation1] sm:$0xff]  ;;  %v1935_v39 = vpop.permute.xlu0 %1934 }
 0x44c   : > { %2180 = vst [vmem:[#allocation1] ss:$9 sm:$0xff] %v6006_v7 }
 0x453   : > { %v6195_v14 = vld [vmem:[#allocation1] sm:$0xff] }
 0x454   : > { %2218 = vst [vmem:[#allocation1] ss:$9 sm:$0xff] %v5861_v40  ;;  %v6208_v40 = vpop.f32.mrf.mxu3 }
 0x455   : > { %2220 = vst [vmem:[#allocation1 + $0x1] ss:$9 sm:$0xff] %v5864_v41  ;;  %v1460_v41 = vsel %vm1459_vm1, %v6208_v40, -inf }
 0x456   : > { %2222 = vst [vmem:[#allocation1 + $0x2] ss:$9 sm:$0xff] %v5867_v51  ;;  %1461 = vmax.xlane.f32.xlu2 %v1460_v41 }
 0x457   : > { %2224 = vst [vmem:[#allocation1 + $0x3] ss:$9 sm:$0xff] %v5870_v1 }
 0x458   : > { %2226 = vst [vmem:[#allocation1 + $0x4] ss:$9 sm:$0xff] %v5874_v28 }
 0x459   : > { %2228 = vst [vmem:[#allocation1 + $0x5] ss:$9 sm:$0xff] %v5877_v5 }
 0x45a   : > { %2230 = vst [vmem:[#allocation1 + $0x6] ss:$9 sm:$0xff] %v5881_v34  ;;  %v1959_v34 = vpop.permute.xlu2 %1958 }
 0x45b   : > { %2232 = vst [vmem:[#allocation1 + $0x7] ss:$9 sm:$0xff] %v5885_v35  ;;  %4714 = vmatpush.xpose.msk.msra.mxu0 %vm1356_vm15, %v1959_v34 }
 0x45c   : > { %v6213_v1 = vpop.f32.mrf.mxu3 }
 0x45d   : > { %v1464_v28 = vsel %vm1463_vm2, %v6213_v1, -inf }
 0x45e   : > { %1465 = vmax.xlane.f32.xlu2 %v1464_v28 }
 0x462   : > { %v2233_v51 = vld [vmem:[#allocation1] sm:$0xff]  ;;  %v1957_v37 = vpop.permute.xlu1 %1956 }
 0x463   : > { %2234 = vst [vmem:[#allocation1] ss:$9 sm:$0xff] %v5895_v30  ;;  %2236 = vrot.lane.b32.xlu1 %v2233_v51, %s5358_s23  ;;  %4715 = vmatpush.xpose.msk.msra.mxu0 %vm1356_vm15, %v1957_v37 }
 0x464   : > { %v1453_v19 = vpop.f32.mrf.mxu3 }
 0x465   : > { %v1467_v16 = vsel %vm1459_vm1, %v1453_v19, -inf }
 0x466   : > { %4716 = vmatmul.msk.f32.vlgmr.msra.gmra.mxu0 %vm1356_vm15, %v1935_v39 }
 0x46a   : > { %v2235_v5 = vld [vmem:[#allocation1] sm:$0xff] }
 0x46b   : > { %2240 = vst [vmem:[#allocation1] ss:$9 sm:$0xff] %v5858_v33 }
 0x46c   : > { %2242 = vst [vmem:[#allocation1 + $0x1] ss:$9 sm:$0xff] %v5901_v38  ;;  %v1456_v21 = vpop.f32.mrf.mxu3 }
 0x46d   : > { %2244 = vst [vmem:[#allocation1 + $0x2] ss:$9 sm:$0xff] %v5906_v43 }
 0x46e   : > { %2246 = vst [vmem:[#allocation1 + $0x3] ss:$9 sm:$0xff] %v5910_v44 }
 0x46f   : > { %2248 = vst [vmem:[#allocation1 + $0x4] ss:$9 sm:$0xff] %v5914_v45 }
 0x470   : > { %2250 = vst [vmem:[#allocation1 + $0x5] ss:$9 sm:$0xff] %v5918_v46 }
 0x471   : > { %2252 = vst [vmem:[#allocation1 + $0x6] ss:$9 sm:$0xff] %v5922_v47 }
 0x472   : > { %2254 = vst [vmem:[#allocation1 + $0x7] ss:$9 sm:$0xff] %v5926_v31 }
 0x476   : > { %2011 = vrot.lane.b32.xlu2 %v6150_v58, %s5356_s20  ;;  %v1470_v58 = vsel %vm1463_vm2, %v1456_v21, -inf }
 0x479   : > { %v2255_v35 = vld [vmem:[#allocation1] sm:$0xff] }
 0x47a   : > { %2256 = vst [vmem:[#allocation1] ss:$9 sm:$0xff] %v5892_v36  ;;  %2258 = vrot.lane.b32.xlu0 %v2255_v35, %s5359_s30 }
 0x481   : > { %v2257_v30 = vld [vmem:[#allocation1] sm:$0xff] }
 0x482   : > { %2293 = vst [vmem:[#allocation1] ss:$9 sm:$0xff] %v5933_v48  ;;  %2260 = vrot.lane.b32.xlu1 %v2257_v30, %s5359_s30 }
 0x483   : > { %2295 = vst [vmem:[#allocation1 + $0x1] ss:$9 sm:$0xff] %v5936_v49  ;;  %v1937_v49 = vpop.permute.xlu0 %1936 }
 0x484   : > { %2297 = vst [vmem:[#allocation1 + $0x2] ss:$9 sm:$0xff] %v5939_v50  ;;  %4717 = vmatmul.msk.f32.gmra.mxu0 %vm1356_vm15, %v1937_v49 }
 0x485   : > { %2299 = vst [vmem:[#allocation1 + $0x3] ss:$9 sm:$0xff] %v5943_v22 }
 0x486   : > { %2301 = vst [vmem:[#allocation1 + $0x4] ss:$9 sm:$0xff] %v5947_v53  ;;  %v2010_v53 = vpop.permute.xlu2 %2009 }
 0x487   : > { %2303 = vst [vmem:[#allocation1 + $0x5] ss:$9 sm:$0xff] %v5953_v54 }
 0x488   : > { %2305 = vst [vmem:[#allocation1 + $0x6] ss:$9 sm:$0xff] %v5957_v56 }
 0x489   : > { %2307 = vst [vmem:[#allocation1 + $0x7] ss:$9 sm:$0xff] %v5962_v57 }
 0x48e   : > { %v2032_v57 = vpop.permute.xlu2 %2031 }
 0x490   : > { %v6242_v48 = vld [vmem:[#allocation1] sm:$0xff] }
 0x491   : > { %2309 = vst [vmem:[#allocation1] ss:$9 sm:$0xff] %v5967_v17 }
 0x498   : > { %v6246_v50 = vld [vmem:[#allocation1] sm:$0xff]  ;;  %v2034_v56 = vpop.permute.xlu1 %2033 }
 0x499   : > { %2315 = vst [vmem:[#allocation1] ss:$9 sm:$0xff] %v5975_v18  ;;  %4718 = vmatpush.xpose.msk.msra.mxu1 %vm1356_vm15, %v2034_v56 }
 0x49a   : > { %2317 = vst [vmem:[#allocation1 + $0x1] ss:$9 sm:$0xff] %v5978_v20 }
 0x49b   : > { %2319 = vst [vmem:[#allocation1 + $0x2] ss:$9 sm:$0xff] %v5983_v23 }
 0x49c   : > { %2321 = vst [vmem:[#allocation1 + $0x3] ss:$9 sm:$0xff] %v5987_v63 }
 0x49d   : > { %2323 = vst [vmem:[#allocation1 + $0x4] ss:$9 sm:$0xff] %v5991_v27  ;;  %4719 = vmatpush.xpose.msk.msra.mxu1 %vm1356_vm15, %v2032_v57 }
 0x49e   : > { %2325 = vst [vmem:[#allocation1 + $0x5] ss:$9 sm:$0xff] %v5995_v2 }
 0x49f   : > { %2327 = vst [vmem:[#allocation1 + $0x6] ss:$9 sm:$0xff] %v5999_v6 }
 0x4a0   : > { %2329 = vst [vmem:[#allocation1 + $0x7] ss:$9 sm:$0xff] %v5950_v55  ;;  %4720 = vmatmul.msk.f32.vlgmr.msra.gmra.mxu1 %vm1356_vm15, %v2010_v53 }
 0x4a7   : > { %v2330_v22 = vld [vmem:[#allocation1] sm:$0xff] }
 0x4a8   : > { %2331 = vst [vmem:[#allocation1] ss:$9 sm:$0xff] %v6006_v7  ;;  %2333 = vrot.lane.b32.xlu1 %v2330_v22, %s5359_s30 }
 0x4af   : > { %v2332_v54 = vld [vmem:[#allocation1] sm:$0xff] }
 0x4b0   : > { %2412 = vst [vmem:[#allocation1] ss:$9 sm:$0xff] %v5858_v33  ;;  %2335 = vrot.lane.b32.xlu0 %v2332_v54, %s5359_s30 }
 0x4b1   : > { %2414 = vst [vmem:[#allocation1 + $0x1] ss:$9 sm:$0xff] %v5901_v38 }
 0x4b2   : > { %2416 = vst [vmem:[#allocation1 + $0x2] ss:$9 sm:$0xff] %v5906_v43 }
 0x4b3   : > { %2418 = vst [vmem:[#allocation1 + $0x3] ss:$9 sm:$0xff] %v5910_v44 }
 0x4b4   : > { %2420 = vst [vmem:[#allocation1 + $0x4] ss:$9 sm:$0xff] %v5914_v45 }
 0x4b5   : > { %2422 = vst [vmem:[#allocation1 + $0x5] ss:$9 sm:$0xff] %v5918_v46 }
 0x4b6   : > { %2424 = vst [vmem:[#allocation1 + $0x6] ss:$9 sm:$0xff] %v5922_v47 }
 0x4b7   : > { %2426 = vst [vmem:[#allocation1 + $0x7] ss:$9 sm:$0xff] %v5926_v31 }
 0x4b8   : > { %2238 = vrot.lane.b32.xlu0 %v2235_v5, %s5358_s23 }
 0x4be   : > { %v6271_v33 = vld [vmem:[#allocation1] sm:$0xff] }
 0x4bf   : > { %2428 = vst [vmem:[#allocation1] ss:$9 sm:$0xff] %v5892_v36 }
 0x4c6   : > { %v6274_v38 = vld [vmem:[#allocation1] sm:$0xff] }
 0x4c7   : > { %2466 = vst [vmem:[#allocation1] ss:$9 sm:$0xff] %v5975_v18 }
 0x4c8   : > { %2468 = vst [vmem:[#allocation1 + $0x1] ss:$9 sm:$0xff] %v5978_v20  ;;  %v1683_v20 = vpop.f32.mrf.mxu0 }
 0x4c9   : > { %2470 = vst [vmem:[#allocation1 + $0x2] ss:$9 sm:$0xff] %v5983_v23  ;;  %v1462_v43 = vpop.xlane.xlu2 %1461  ;;  %v1764_v23 = vsel %vm1459_vm1, %v1683_v20, -inf }
 0x4ca   : > { %2472 = vst [vmem:[#allocation1 + $0x3] ss:$9 sm:$0xff] %v5987_v63  ;;  %v1473_v36 = vsub.f32 %v6208_v40, %v1462_v43 }
 0x4cb   : > { %2474 = vst [vmem:[#allocation1 + $0x4] ss:$9 sm:$0xff] %v5991_v27  ;;  %v6292_v27 = vpop.f32.mrf.mxu1 }
 0x4cc   : > { %2476 = vst [vmem:[#allocation1 + $0x5] ss:$9 sm:$0xff] %v5995_v2  ;;  %v1477_v44 = vmul.f32 1.442695, %v1473_v36 }
 0x4cd   : > { %2478 = vst [vmem:[#allocation1 + $0x6] ss:$9 sm:$0xff] %v5999_v6  ;;  %v1770_v6 = vsel %vm1459_vm1, %v6292_v27, -inf }
 0x4ce   : > { %2480 = vst [vmem:[#allocation1 + $0x7] ss:$9 sm:$0xff] %v5950_v55  ;;  %5003 = vpow2.f32 %v1477_v44 }
 0x4d0   : > { %v1686_v24 = vpop.f32.mrf.mxu0 }
 0x4d1   : > { %v1466_v46 = vpop.xlane.xlu2 %1465 }
 0x4d2   : > { %v1474_v47 = vsub.f32 %v6213_v1, %v1466_v46 }
 0x4d4   : > { %v5004_v31 = vpop.eup %5003  ;;  %v1479_v17 = vmul.f32 1.442695, %v1474_v47 }
 0x4d5   : > { %v6285_v45 = vld [vmem:[#allocation1] sm:$0xff]  ;;  %v1485_v18 = vsel %vm1459_vm1, %v5004_v31, 0.0 }
 0x4d6   : > { %2482 = vst [vmem:[#allocation1] ss:$9 sm:$0xff] %v6006_v7  ;;  %5005 = vpow2.f32 %v1479_v17  ;;  %1486 = vadd.xlane.f32.xlu1 %v1485_v18  ;;  %v2237_v7 = vpop.permute.xlu1 %2236 }
 0x4d9   : > { %v2012_v55 = vpop.permute.xlu2 %2011 }
 0x4da   : > { %4721 = vmatmul.msk.f32.gmra.mxu1 %vm1356_vm15, %v2012_v55 }
 0x4dc   : > { %v5006_v63 = vpop.eup %5005 }
 0x4dd   : > { %v1488_v2 = vsel %vm1463_vm2, %v5006_v63, 0.0 }
 0x4de   : > { %1489 = vadd.xlane.f32.xlu2 %v1488_v2 }
 0x4e2   : > { %1765 = vmax.xlane.f32.xlu0 %v1764_v23 }
 0x4e3   : > { %v6322_v61 = vpop.f32.mrf.mxu0 }
 0x4e4   : > { %v2066_v5 = vsel %vm1459_vm1, %v6322_v61, -inf }
 0x4ea   : > { %1771 = vmax.xlane.f32.xlu0 %v1770_v6 }
 0x4ec   : > { %v2259_v9 = vpop.permute.xlu0 %2258 }
 0x4ef   : > { %2313 = vrot.lane.b32.xlu1 %v6246_v50, %s5358_s23 }
 0x4f4   : > { %v2261_v8 = vpop.permute.xlu1 %2260 }
 0x4f5   : > { %4728 = vmatpush.xpose.msk.msrb.mxu0 %vm1356_vm15, %v2261_v8 }
 0x4f6   : > { %2311 = vrot.lane.b32.xlu2 %v6242_v48, %s5358_s23 }
 0x4f9   : > { %4729 = vmatpush.xpose.msk.msrb.mxu0 %vm1356_vm15, %v2259_v9 }
 0x4fc   : > { %4730 = vmatmul.msk.f32.vlgmr.msrb.gmra.mxu0 %vm1356_vm15, %v2237_v7 }
 0x4fe   : > { %1828 = vrot.lane.b32.xlu0 %v6090_v62, %s7470_s21  ;;  %v1767_v62 = vsel %vm1463_vm2, %v1686_v24, -inf }
 0x519   : > { %1471 = vmax.xlane.f32.xlu1 %v1470_v58 }
 0x51a   : > { %v2334_v59 = vpop.permute.xlu1 %2333 }
 0x51d   : > { %v6329_v35 = vpop.f32.mrf.mxu1 }
 0x51e   : > { %v2072_v37 = vsel %vm1459_vm1, %v6329_v35, -inf }
 0x51f   : > { %1468 = vmax.xlane.f32.xlu2 %v1467_v16 }
 0x522   : > { %v2336_v10 = vpop.permute.xlu0 %2335 }
 0x523   : > { %4732 = vmatpush.xpose.msk.msrb.mxu1 %vm1356_vm15, %v2336_v10 }
 0x527   : > { %4733 = vmatpush.xpose.msk.msrb.mxu1 %vm1356_vm15, %v2334_v59  ;;  %1768 = vmax.xlane.f32.xlu2 %v1767_v62 }
 0x52a   : > { %v2239_v0 = vpop.permute.xlu0 %2238 }
 0x52b   : > { %4731 = vmatmul.msk.f32.gmra.mxu0 %vm1356_vm15, %v2239_v0 }
 0x532   : > { %1578 = vrot.lane.b32.xlu1 %v6030_v13, %s7468_s25 }
 0x53a   : > { %4950 = vrot.lane.b32.xlu1 %v4949_v25, %s7470_s21 }
 0x53f   : > { %1580 = vrot.lane.b32.xlu2 %v6033_v15, %s7468_s25 }
 0x549   : > { %v1487_v26 = vpop.xlane.xlu1 %1486 }
 0x54a   : > { %5007 = vrcp.f32 %v1487_v26 }
 0x550   : > { %v5008_v29 = vpop.eup %5007 }
 0x551   : > { %v1490_v4 = vpop.xlane.xlu2 %1489  ;;  %v1501_v40 = vmul.f32 %v5008_v29, %v5004_v31  ;;  %v6344_v31 = vpop.f32.mrf.mxu0 }
 0x552   : > { %5009 = vrcp.f32 %v1490_v4  ;;  %v2069_v8 = vsel %vm1463_vm2, %v6344_v31, -inf }
 0x553   : > { %4695 = vmatmul.msk.f32.vlgmr.msra.gmra.mxu2 %vm1459_vm1, %v1501_v40 }
 0x555   : > { %v1766_v41 = vpop.xlane.xlu0 %1765 }
 0x556   : > { %v1776_v28 = vsub.f32 %v1683_v20, %v1766_v41 }
 0x558   : > { %v5010_v51 = vpop.eup %5009  ;;  %v1780_v34 = vmul.f32 1.442695, %v1776_v28 }
 0x559   : > { %v2312_v1 = vpop.permute.xlu2 %2311  ;;  %v1502_v13 = vmul.f32 %v5010_v51, %v5006_v63 }
 0x55a   : > { %4734 = vmatmul.msk.f32.vlgmr.msrb.gmra.mxu1 %vm1356_vm15, %v2312_v1  ;;  %5011 = vpow2.f32 %v1780_v34 }
 0x55b   : > { %4696 = vmatmul.msk.f32.gmra.mxu2 %vm1459_vm1, %v1502_v13 }
 0x55d   : > { %v1772_v3 = vpop.xlane.xlu0 %1771 }
 0x55e   : > { %v1778_v2 = vsub.f32 %v6292_v27, %v1772_v3 }
 0x560   : > { %v6334_v39 = vpop.eup %5011  ;;  %v1784_v9 = vmul.f32 1.442695, %v1778_v2 }
 0x561   : > { %v2314_v15 = vpop.permute.xlu1 %2313 }
 0x562   : > { %4735 = vmatmul.msk.f32.gmra.mxu1 %vm1356_vm15, %v2314_v15 }
 0x563   : > { %4707 = vmatmul.msk.f32.vlgmr.msrb.gmra.mxu2 %vm1356_vm15, %v6188_v12  ;;  %v1788_v12 = vsel %vm1459_vm1, %v6334_v39, 0.0 }
 0x564   : > { %2067 = vmax.xlane.f32.xlu1 %v2066_v5 }
 0x56c   : > { %2073 = vmax.xlane.f32.xlu1 %v2072_v37 }
 0x570   : > { %v1829_v30 = vpop.permute.xlu0 %1828 }
 0x571   : > { %4708 = vmatpush.msk.msra.mxu2 %vm1534_vm0, %v1829_v30 }
 0x574   : > { %1789 = vadd.xlane.f32.xlu1 %v1788_v12 }
 0x579   : > { %v6353_v23 = vpop.f32.mrf.mxu0 }
 0x57a   : > { %v2368_v7 = vsel %vm1459_vm1, %v6353_v23, -inf }
 0x58c   : > { %v1472_v48 = vpop.xlane.xlu1 %1471 }
 0x58d   : > { %v1476_v22 = vsub.f32 %v1456_v21, %v1472_v48 }
 0x58f   : > { %v1483_v54 = vmul.f32 1.442695, %v1476_v22 }
 0x592   : > { %v1469_v49 = vpop.xlane.xlu2 %1468 }
 0x593   : > { %v1475_v50 = vsub.f32 %v1453_v19, %v1469_v49  ;;  %v6363_v19 = vpop.f32.mrf.mxu1 }
 0x594   : > { %v2075_v27 = vsel %vm1463_vm2, %v6363_v19, -inf }
 0x595   : > { %v1481_v53 = vmul.f32 1.442695, %v1475_v50 }
 0x597   : > { %5013 = vpow2.f32 %v1481_v53 }
 0x598   : > { %5015 = vpow2.f32 %v1483_v54 }
 0x59a   : > { %v1769_v56 = vpop.xlane.xlu2 %1768 }
 0x59b   : > { %v1777_v57 = vsub.f32 %v1686_v24, %v1769_v56 }
 0x59d   : > { %v6338_v43 = vpop.eup %5013  ;;  %v1782_v36 = vmul.f32 1.442695, %v1777_v57 }
 0x59e   : > { %v1491_v44 = vsel %vm1459_vm1, %v6338_v43, 0.0  ;;  %v6342_v47 = vpop.eup %5015 }
 0x59f   : > { %5017 = vpow2.f32 %v1782_v36  ;;  %1492 = vadd.xlane.f32.xlu0 %v1491_v44  ;;  %v1494_v55 = vsel %vm1463_vm2, %v6342_v47, 0.0 }
 0x5a0   : > { %5019 = vpow2.f32 %v1784_v9 }
 0x5a2   : > { %v1581_v46 = vpop.permute.xlu2 %1580 }
 0x5a3   : > { %4697 = vmatpush.msk.msra.mxu3 %vm1534_vm0, %v1581_v46 }
 0x5a4   : > { %v1579_v17 = vpop.permute.xlu1 %1578 }
 0x5a5   : > { %v6347_v18 = vpop.eup %5017  ;;  %1606 = vmatpush.msra.mxu3 %v1579_v17 }
 0x5a6   : > { %v1791_v20 = vsel %vm1463_vm2, %v6347_v18, 0.0  ;;  %v6371_v10 = vpop.eup %5019 }
 0x5a7   : > { %1792 = vadd.xlane.f32.xlu2 %v1791_v20  ;;  %1495 = vadd.xlane.f32.xlu0 %v1494_v55  ;;  %v1794_v16 = vsel %vm1459_vm1, %v6371_v10, 0.0 }
 0x5a8   : > { %v6365_v21 = vpop.f32.mrf.mxu0 }
 0x5a9   : > { %v2371_v58 = vsel %vm1463_vm2, %v6365_v21, -inf }
 0x5ac   : > { %v6355_v63 = vpop.permute.xlu1 %4950 }
 0x5ad   : > { %v4952_v6 = vunpack.i.l.bf16 %v6355_v63  ;;  %v4953_v9 = vunpack.i.h.bf16 %v6355_v63 }
 0x5af   : > { %2369 = vmax.xlane.f32.xlu2 %v2368_v7  ;;  %2070 = vmax.xlane.f32.xlu0 %v2069_v8 }
 0x5b0   : > { %1854 = vmatpush.msra.mxu2 %v4952_v6 }
 0x5b7   : > { %2076 = vmax.xlane.f32.xlu0 %v2075_v27  ;;  %2372 = vmax.xlane.f32.xlu2 %v2371_v58 }
 0x5bf   : > { %1795 = vadd.xlane.f32.xlu0 %v1794_v16 }
 0x5d6   : > { %v6375_v59 = vpop.f32.mrf.mxu2 }
 0x5d7   : > { %v2068_v24 = vpop.xlane.xlu1 %2067  ;;  %v6377_v0 = vpop.f32.mrf.mxu1 }
 0x5d8   : > { %v2078_v62 = vsub.f32 %v6322_v61, %v2068_v24  ;;  %v2374_v25 = vsel %vm1459_vm1, %v6377_v0, -inf }
 0x5d9   : > { %2375 = vmax.xlane.f32.xlu1 %v2374_v25 }
 0x5da   : > { %v2082_v26 = vmul.f32 1.442695, %v2078_v62 }
 0x5dc   : > { %5021 = vpow2.f32 %v2082_v26 }
 0x5de   : > { %v6382_v29 = vpop.f32.mrf.mxu2 }
 0x5df   : > { %v2074_v4 = vpop.xlane.xlu1 %2073  ;;  %v6384_v40 = vpop.f32.mrf.mxu1 }
 0x5e0   : > { %v2377_v41 = vsel %vm1463_vm2, %v6384_v40, -inf  ;;  %v2080_v34 = vsub.f32 %v6329_v35, %v2074_v4 }
 0x5e1   : > { %2378 = vmax.xlane.f32.xlu2 %v2377_v41 }
 0x5e2   : > { %v6388_v51 = vpop.eup %5021  ;;  %v2086_v48 = vmul.f32 1.442695, %v2080_v34 }
 0x5e3   : > { %v2090_v1 = vsel %vm1459_vm1, %v6388_v51, 0.0 }
 0x5e4   : > { %2091 = vadd.xlane.f32.xlu1 %v2090_v1 }
 0x5e6   : > { %v6392_v13 = vpop.f32.mrf.mxu2 }
 0x5e7   : > { %v1790_v61 = vpop.xlane.xlu1 %1789  ;;  %v1773_v3 = vsel %vm1463_vm2, %v6392_v13, -inf }
 0x5e8   : > { %5023 = vrcp.f32 %v1790_v61 }
 0x5e9   : > { %1774 = vmax.xlane.f32.xlu2 %v1773_v3  ;;  %v2483_v3 = vld [vmem:[#allocation1] sm:$0xff] }
 0x5ee   : > { %v5024_v15 = vpop.eup %5023 }
 0x5ef   : > { %v1804_v28 = vmul.f32 %v5024_v15, %v6334_v39 }
 0x5f1   : > { %4709 = vmatmul.msk.f32.vlgmr.msra.gmra.mxu2 %vm1459_vm1, %v1804_v28 }
 0x5fd   : > { %2130 = vrot.lane.b32.xlu1 %v6177_v60, %s7466_s19 }
 0x601   : > { %1882 = vrot.lane.b32.xlu2 %v6103_v11, %s7470_s21 }
 0x605   : > { %2430 = vrot.lane.b32.xlu1 %v6271_v33, %s7462_s3 }
 0x612   : > { %v1493_v5 = vpop.xlane.xlu0 %1492 }
 0x613   : > { %5025 = vrcp.f32 %v1493_v5 }
 0x619   : > { %v5026_v30 = vpop.eup %5025 }
 0x61a   : > { %v1503_v37 = vmul.f32 %v5026_v30, %v6338_v43  ;;  %v1793_v39 = vpop.xlane.xlu2 %1792  ;;  %v1496_v12 = vpop.xlane.xlu0 %1495 }
 0x61b   : > { %5027 = vrcp.f32 %v1793_v39 }
 0x61c   : > { %5029 = vrcp.f32 %v1496_v12  ;;  %4698 = vmatmul.msk.f32.vlgmr.msra.gmra.mxu3 %vm1459_vm1, %v1503_v37 }
 0x61d   : > { %5031 = vpow2.f32 %v2086_v48 }
 0x621   : > { %v5028_v11 = vpop.eup %5027 }
 0x622   : > { %v5030_v60 = vpop.eup %5029  ;;  %v2370_v49 = vpop.xlane.xlu2 %2369  ;;  %v1805_v33 = vmul.f32 %v5028_v11, %v6347_v18 }
 0x623   : > { %v2071_v50 = vpop.xlane.xlu0 %2070  ;;  %v2380_v22 = vsub.f32 %v6353_v23, %v2370_v49  ;;  %v1504_v53 = vmul.f32 %v5030_v60, %v6342_v47  ;;  %v6413_v57 = vpop.eup %5031 }
 0x624   : > { %v2079_v35 = vsub.f32 %v6344_v31, %v2071_v50  ;;  %4710 = vmatmul.msk.f32.gmra.mxu2 %vm1459_vm1, %v1805_v33  ;;  %v2096_v43 = vsel %vm1459_vm1, %v6413_v57, 0.0  ;;  %v4954_v31 = vpack.i.bf16 %v6190_v32, %v6172_v52 }
 0x625   : > { %v2384_v54 = vmul.f32 1.442695, %v2380_v22  ;;  %4699 = vmatmul.msk.f32.gmra.mxu3 %vm1459_vm1, %v1504_v53 }
 0x626   : > { %v2084_v56 = vmul.f32 1.442695, %v2079_v35 }
 0x627   : > { %5033 = vpow2.f32 %v2384_v54 }
 0x628   : > { %5035 = vpow2.f32 %v2084_v56 }
 0x62a   : > { %2097 = vadd.xlane.f32.xlu2 %v2096_v43  ;;  %v2373_v17 = vpop.xlane.xlu2 %2372 }
 0x62b   : > { %v2077_v18 = vpop.xlane.xlu0 %2076  ;;  %v2381_v55 = vsub.f32 %v6365_v21, %v2373_v17 }
 0x62c   : > { %v2081_v7 = vsub.f32 %v6363_v19, %v2077_v18 }
 0x62d   : > { %v6417_v36 = vpop.eup %5033  ;;  %v2386_v6 = vmul.f32 1.442695, %v2381_v55 }
 0x62e   : > { %v6419_v44 = vpop.eup %5035  ;;  %v2392_v46 = vsel %vm1459_vm1, %v6417_v36, 0.0  ;;  %v2088_v58 = vmul.f32 1.442695, %v2081_v7 }
 0x62f   : > { %v2093_v47 = vsel %vm1463_vm2, %v6419_v44, 0.0  ;;  %2393 = vadd.xlane.f32.xlu1 %v2392_v46 }
 0x630   : > { %2094 = vadd.xlane.f32.xlu0 %v2093_v47 }
 0x633   : > { %v1796_v23 = vpop.xlane.xlu0 %1795 }
 0x634   : > { %5037 = vrcp.f32 %v1796_v23 }
 0x635   : > { %5039 = vpow2.f32 %v2386_v6 }
 0x63a   : > { %v5038_v32 = vpop.eup %5037 }
 0x63b   : > { %v6440_v21 = vpop.eup %5039 }
 0x63c   : > { %v2395_v16 = vsel %vm1463_vm2, %v6440_v21, 0.0 }
 0x642   : > { %2432 = vrot.lane.b32.xlu2 %v6274_v38, %s7462_s3 }
 0x644   : > { %4955 = vrot.lane.b32.xlu0 %v4954_v31, %s7466_s19 }
 0x648   : > { %2484 = vrot.lane.b32.xlu1 %v6285_v45, %s7462_s3 }
 0x64c   : > { %2184 = vrot.lane.b32.xlu0 %v6195_v14, %s7466_s19  ;;  %v2376_v38 = vpop.xlane.xlu1 %2375  ;;  %v1806_v14 = vmul.f32 %v5038_v32, %v6371_v10 }
 0x64d   : > { %v2382_v19 = vsub.f32 %v6377_v0, %v2376_v38 }
 0x64f   : > { %v2388_v62 = vmul.f32 1.442695, %v2382_v19  ;;  %v2603_v19 = vld [vmem:[%s7443_s8 + $0x18] sm:$0xff] }
 0x650   : > { %2654 = vmatpush.msra.mxu0 %v2603_v19 }
 0x654   : > { %v2379_v20 = vpop.xlane.xlu2 %2378 }
 0x655   : > { %v2383_v52 = vsub.f32 %v6384_v40, %v2379_v20 }
 0x657   : > { %v2390_v45 = vmul.f32 1.442695, %v2383_v52  ;;  %v2092_v27 = vpop.xlane.xlu1 %2091 }
 0x659   : > { %5041 = vpow2.f32 %v2390_v45 }
 0x65a   : > { %5043 = vpow2.f32 %v2088_v58 }
 0x65b   : > { %5045 = vpow2.f32 %v2388_v62 }
 0x65c   : > { %v1775_v2 = vpop.xlane.xlu2 %1774 }
 0x65d   : > { %v1779_v26 = vsub.f32 %v6392_v13, %v1775_v2 }
 0x65f   : > { %v6446_v63 = vpop.eup %5041  ;;  %v1786_v0 = vmul.f32 1.442695, %v1779_v26 }
 0x660   : > { %v2401_v10 = vsel %vm1463_vm2, %v6446_v63, 0.0  ;;  %v6451_v25 = vpop.eup %5043 }
 0x661   : > { %v2099_v4 = vsel %vm1463_vm2, %v6451_v25, 0.0  ;;  %v6456_v40 = vpop.eup %5045  ;;  %5047 = vpow2.f32 %v1786_v0 }
 0x662   : > { %v2398_v41 = vsel %vm1459_vm1, %v6456_v40, 0.0  ;;  %5049 = vrcp.f32 %v2092_v27 }
 0x664   : > { %v1883_v8 = vpop.permute.xlu2 %1882 }
 0x665   : > { %4711 = vmatpush.msk.msrb.mxu3 %vm1534_vm0, %v1883_v8 }
 0x667   : > { %1908 = vmatpush.msrb.mxu3 %v4953_v9  ;;  %v5048_v1 = vpop.eup %5047 }
 0x668   : > { %4712 = vmatmul.msk.f32.vlgmr.msrb.gmra.mxu3 %vm1459_vm1, %v1806_v14  ;;  %v1797_v61 = vsel %vm1463_vm2, %v5048_v1, 0.0  ;;  %v5050_v34 = vpop.eup %5049 }
 0x669   : > { %v2106_v39 = vmul.f32 %v5050_v34, %v6388_v51 }
 0x66b   : > { %2396 = vadd.xlane.f32.xlu2 %v2395_v16 }
 0x66f   : > { %v2131_v24 = vpop.permute.xlu1 %2130 }
 0x670   : > { %4722 = vmatpush.msk.msrb.mxu2 %vm1534_vm0, %v2131_v24  ;;  %v2601_v24 = vld [vmem:[%s7443_s8 + $0x8] sm:$0xff] }
 0x672   : > { %2402 = vadd.xlane.f32.xlu1 %v2401_v10  ;;  %v2600_v10 = vld [vmem:[%s7443_s8] sm:$0xff] }
 0x674   : > { %v1856_v13 = vpop.f32.mrf.mxu2 }
 0x676   : > { %2100 = vadd.xlane.f32.xlu0 %v2099_v4 }
 0x677   : > { %v2431_v5 = vpop.permute.xlu1 %2430 }
 0x67e   : > { %2399 = vadd.xlane.f32.xlu0 %v2398_v41 }
 0x686   : > { %1798 = vadd.xlane.f32.xlu0 %v1797_v61 }
 0x69a   : > { %2486 = vrot.lane.b32.xlu0 %v2483_v3, %s7462_s3 }
 0x69d   : > { %v2098_v28 = vpop.xlane.xlu2 %2097 }
 0x69f   : > { %v6483_v38 = vpop.f32.mrf.mxu3 }
 0x6a2   : > { %2524 = vrot.lane.b32.xlu0 %v1856_v13, %s7464_s16  ;;  %v2394_v48 = vpop.xlane.xlu1 %2393 }
 0x6a3   : > { %v2095_v15 = vpop.xlane.xlu0 %2094 }
 0x6a4   : > { %5051 = vrcp.f32 %v2095_v15 }
 0x6a5   : > { %v2433_v12 = vpop.permute.xlu2 %2432  ;;  %5053 = vrcp.f32 %v2394_v48 }
 0x6a7   : > { %v1859_v52 = vpop.f32.mrf.mxu2 }
 0x6a8   : > { %v6485_v32 = vpop.f32.mrf.mxu3 }
 0x6aa   : > { %v5052_v11 = vpop.eup %5051 }
 0x6ab   : > { %v2107_v50 = vmul.f32 %v5052_v11, %v6419_v44  ;;  %v5054_v51 = vpop.eup %5053 }
 0x6ac   : > { %v2408_v33 = vmul.f32 %v5054_v51, %v6417_v36 }
 0x6b6   : > { %v4956_v30 = vpop.permute.xlu0 %4955 }
 0x6b7   : > { %v4957_v37 = vunpack.i.l.bf16 %v4956_v30  ;;  %v4958_v49 = vunpack.i.h.bf16 %v4956_v30 }
 0x6b9   : > { %2156 = vmatpush.msrb.mxu2 %v4957_v37 }
 0x6ba   : > { %4723 = vmatmul.msk.f32.vlgmr.msrb.gmra.mxu2 %vm1459_vm1, %v2106_v39  ;;  %v2485_v17 = vpop.permute.xlu1 %2484 }
 0x6bb   : > { %4736 = vmatpush.msk.msra.mxu2 %vm1534_vm0, %v2433_v12 }
 0x6bd   : > { %2458 = vmatpush.msra.mxu2 %v2431_v5 }
 0x6be   : > { %v2185_v60 = vpop.permute.xlu0 %2184 }
 0x6bf   : > { %4725 = vmatpush.msk.msra.mxu3 %vm1534_vm0, %v2185_v60 }
 0x6c1   : > { %2210 = vmatpush.msra.mxu3 %v4958_v49 }
 0x6c2   : > { %4724 = vmatmul.msk.f32.gmra.mxu2 %vm1459_vm1, %v2107_v50 }
 0x6ca   : > { %4737 = vmatmul.msk.f32.vlgmr.msra.gmra.mxu2 %vm1459_vm1, %v2408_v33 }
 0x6de   : > { %v2397_v22 = vpop.xlane.xlu2 %2396 }
 0x6df   : > { %5055 = vrcp.f32 %v2397_v22 }
 0x6e5   : > { %v5056_v35 = vpop.eup %5055  ;;  %v2403_v55 = vpop.xlane.xlu1 %2402 }
 0x6e6   : > { %v2409_v53 = vmul.f32 %v5056_v35, %v6440_v21 }
 0x6e8   : > { %4738 = vmatmul.msk.f32.gmra.mxu2 %vm1459_vm1, %v2409_v53 }
 0x6e9   : > { %v2101_v54 = vpop.xlane.xlu0 %2100 }
 0x6eb   : > { %v1910_v45 = vpop.f32.mrf.mxu3 }
 0x6f1   : > { %v2400_v56 = vpop.xlane.xlu0 %2399 }
 0x6f9   : > { %v1799_v43 = vpop.xlane.xlu0 %1798 }
 0x6fa   : > { %5057 = vrcp.f32 %v1799_v43 }
 0x6fb   : > { %5059 = vrcp.f32 %v2098_v28 }
 0x6fc   : > { %5061 = vrcp.f32 %v2101_v54 }
 0x6fd   : > { %5063 = vrcp.f32 %v2400_v56 }
 0x6fe   : > { %5065 = vrcp.f32 %v2403_v55  ;;  %v4983_v55 = vld [vmem:[%s7444_s9] ss:$0 sm:$0xff] }
 0x700   : > { %v5058_v44 = vpop.eup %5057 }
 0x701   : > { %v1807_v46 = vmul.f32 %v5058_v44, %v5048_v1  ;;  %v5060_v47 = vpop.eup %5059 }
 0x702   : > { %v2108_v36 = vmul.f32 %v5060_v47, %v6413_v57  ;;  %v5062_v18 = vpop.eup %5061 }
 0x703   : > { %4713 = vmatmul.msk.f32.gmra.mxu3 %vm1459_vm1, %v1807_v46  ;;  %v2109_v20 = vmul.f32 %v5062_v18, %v6451_v25  ;;  %v5064_v23 = vpop.eup %5063 }
 0x704   : > { %v2410_v2 = vmul.f32 %v5064_v23, %v6456_v40  ;;  %v5066_v57 = vpop.eup %5065 }
 0x705   : > { %v2411_v6 = vmul.f32 %v5066_v57, %v6446_v63  ;;  %v2602_v63 = vld [vmem:[%s7443_s8 + $0x10] sm:$0xff] }
 0x706   : > { %2655 = vmatpush.msra.mxu0 %v2602_v63 }
 0x708   : > { %2656 = vmatpush.msra.mxu0 %v2601_v24 }
 0x70a   : > { %2657 = vmatpush.msra.mxu0 %v2600_v10 }
 0x70b   : > { %4726 = vmatmul.msk.f32.vlgmr.msra.gmra.mxu3 %vm1459_vm1, %v2108_v36 }
 0x70c   : > { %v2487_v31 = vpop.permute.xlu0 %2486 }
 0x70d   : > { %4739 = vmatpush.msk.msrb.mxu3 %vm1534_vm0, %v2487_v31 }
 0x70f   : > { %2512 = vmatpush.msrb.mxu3 %v2485_v17 }
 0x713   : > { %4727 = vmatmul.msk.f32.gmra.mxu3 %vm1459_vm1, %v2109_v20 }
 0x714   : > { %v2525_v25 = vpop.permute.xlu0 %2524 }
 0x715   : > { %v2568_v26 = vsel %vm1356_vm15, %v6375_v59, %v2525_v25 }
 0x71b   : > { %4740 = vmatmul.msk.f32.vlgmr.msrb.gmra.mxu3 %vm1459_vm1, %v2410_v2 }
 0x723   : > { %4741 = vmatmul.msk.f32.gmra.mxu3 %vm1459_vm1, %v2411_v6 }
 0x73d   : > { %v2158_v7 = vpop.f32.mrf.mxu2 }
 0x73e   : > { %2540 = vrot.lane.b32.xlu0 %v2158_v7, %s5364_s22 }
 0x745   : > { %v2161_v8 = vpop.f32.mrf.mxu2 }
 0x746   : > { %2528 = vrot.lane.b32.xlu0 %v1910_v45, %s7464_s16 }
 0x74d   : > { %v2460_v9 = vpop.f32.mrf.mxu2 }
 0x74e   : > { %2556 = vrot.lane.b32.xlu2 %v2460_v9, %s5365_s24  ;;  %2526 = vrot.lane.b32.xlu0 %v1859_v52, %s7464_s16 }
 0x756   : > { %2542 = vrot.lane.b32.xlu2 %v2161_v8, %s5364_s22 }
 0x76b   : > { %v2463_v27 = vpop.f32.mrf.mxu2 }
 0x786   : > { %v1913_v14 = vpop.f32.mrf.mxu3 }
 0x787   : > { %2530 = vrot.lane.b32.xlu2 %v1913_v14, %s7464_s16  ;;  %s7496_s16 = sld [smem:[#allocation16_spill]] }
 0x78d   : > { %s578_s27 = sand.u32 1, %s7496_s16  }
 0x78e   : > { %v2212_v21 = vpop.f32.mrf.mxu3  ;;  %s4675_s0 = sshll.u32 %s578_s27, 1 }
 0x78f   : > { %2544 = vrot.lane.b32.xlu0 %v2212_v21, %s5364_s22  ;;  %s580_s25 = scalar_lea.vmem [#allocation10], %s4675_s0 }
 0x796   : > { %v2215_v58 = vpop.f32.mrf.mxu3 }
 0x797   : > { %2558 = vrot.lane.b32.xlu0 %v2463_v27, %s5365_s24 }
 0x79e   : > { %v2514_v16 = vpop.f32.mrf.mxu3 }
 0x79f   : > { %2546 = vrot.lane.b32.xlu0 %v2215_v58, %s5364_s22  ;;  %2560 = vrot.lane.b32.xlu1 %v2514_v16, %s5365_s24 }
 0x7a6   : > { %v2517_v62 = vpop.f32.mrf.mxu3 }
 0x7a7   : > { %2562 = vrot.lane.b32.xlu2 %v2517_v62, %s5365_s24 }
 0x7a8   : > { %v2557_v0 = vpop.permute.xlu2 %2556 }
 0x7b0   : > { %v2541_v4 = vpop.permute.xlu0 %2540  ;;  %v2543_v12 = vpop.permute.xlu2 %2542 }
 0x7b1   : > { %v2573_v40 = vsel %vm2572_vm5, %v2568_v26, %v2541_v4 }
 0x7b2   : > { %v2578_v41 = vsel %vm2577_vm6, %v2573_v40, %v2557_v0  ;;  %v2751_v0 = vld [vmem:[%s7447_s12 + $0x18] sm:$0xff]  ;;  %v2750_v40 = vld [vmem:[%s7447_s12 + $0x10] sm:$0xff] }
 0x7b3   : > { %v2586_v1 = vrot.slane %v2578_v41, 1  ;;  %v2587_v61 = vrot.slane %v2578_v41, 2  ;;  %v2588_v3 = vrot.slane %v2578_v41, 3  ;;  %2608 = vst [vmem:[#allocation1] ss:$9 sm:$0xff] %v2578_v41  ;;  %v2589_v13 = vrot.slane %v2578_v41, 4  ;;  %2777 = vmatpush.msra.mxu1 %v2751_v0 }
 0x7b4   : > { %v2590_v15 = vrot.slane %v2578_v41, 5  ;;  %v2591_v28 = vrot.slane %v2578_v41, 6  ;;  %v2592_v5 = vrot.slane %v2578_v41, 7  ;;  %v2749_v41 = vld [vmem:[%s7447_s12 + $0x8] sm:$0xff] }
 0x7b5   : > { %2610 = vst [vmem:[#allocation1 + $0x1] ss:$9 sm:$0xff] %v2586_v1  ;;  %2778 = vmatpush.msra.mxu1 %v2750_v40  ;;  %v2748_v1 = vld [vmem:[%s7447_s12] sm:$0xff] }
 0x7b6   : > { %2612 = vst [vmem:[#allocation1 + $0x2] ss:$9 sm:$0xff] %v2587_v61 }
 0x7b7   : > { %2614 = vst [vmem:[#allocation1 + $0x3] ss:$9 sm:$0xff] %v2588_v3  ;;  %2779 = vmatpush.msra.mxu1 %v2749_v41 }
 0x7b8   : > { %2616 = vst [vmem:[#allocation1 + $0x4] ss:$9 sm:$0xff] %v2589_v13  ;;  %v2529_v34 = vpop.permute.xlu0 %2528 }
 0x7b9   : > { %2618 = vst [vmem:[#allocation1 + $0x5] ss:$9 sm:$0xff] %v2590_v15  ;;  %v2570_v49 = vsel %vm1356_vm15, %v6483_v38, %v2529_v34  ;;  %2780 = vmatpush.msra.mxu1 %v2748_v1  ;;  %v4987_v1 = vld [vmem:[%s7450_s15] ss:$0 sm:$0xff] }
 0x7ba   : > { %2620 = vst [vmem:[#allocation1 + $0x6] ss:$9 sm:$0xff] %v2591_v28 }
 0x7bb   : > { %2622 = vst [vmem:[#allocation1 + $0x7] ss:$9 sm:$0xff] %v2592_v5 }
 0x7c0   : > { %v2527_v30 = vpop.permute.xlu0 %2526 }
 0x7c1   : > { %v2569_v39 = vsel %vm1356_vm15, %v6382_v29, %v2527_v30 }
 0x7c2   : > { %v2623_v59 = vld [vmem:[#allocation1] sm:$0xff]  ;;  %v2574_v48 = vsel %vm2572_vm5, %v2569_v39, %v2543_v12 }
 0x7c3   : > { %4742 = vmatmul.msk.f32.vlgmr.msra.gmra.mxu0 %vm878_vm3, %v2623_v59 }
 0x7e1   : > { %v2531_v43 = vpop.permute.xlu2 %2530 }
 0x7e2   : > { %v2571_v46 = vsel %vm1356_vm15, %v6485_v32, %v2531_v43 }
 0x801   : > { %v2545_v37 = vpop.permute.xlu0 %2544  ;;  %v2563_v31 = vpop.permute.xlu2 %2562 }
 0x802   : > { %v2575_v50 = vsel %vm2572_vm5, %v2570_v49, %v2545_v37  ;;  %v4984_v37 = vld [vmem:[%s7445_s10] ss:$0 sm:$0xff] }
 0x809   : > { %v2559_v11 = vpop.permute.xlu0 %2558 }
 0x80a   : > { %v2579_v60 = vsel %vm2577_vm6, %v2574_v48, %v2559_v11  ;;  %v4985_v48 = vld [vmem:[#allocation7] ss:$0 sm:$0xff] }
 0x80b   : > { %2624 = vst [vmem:[#allocation1] ss:$9 sm:$0xff] %v2579_v60 }
 0x811   : > { %v2561_v51 = vpop.permute.xlu1 %2560  ;;  %v2547_v44 = vpop.permute.xlu0 %2546 }
 0x812   : > { %v2580_v33 = vsel %vm2577_vm6, %v2575_v50, %v2561_v51  ;;  %v2576_v47 = vsel %vm2572_vm5, %v2571_v46, %v2547_v44  ;;  %v2797_v46 = vld [vmem:[%s7449_s14 + $0x18] sm:$0xff] }
 0x813   : > { %v2593_v22 = vrot.slane %v2580_v33, 1  ;;  %v2594_v35 = vrot.slane %v2580_v33, 2  ;;  %v2595_v53 = vrot.slane %v2580_v33, 3  ;;  %2625 = vst [vmem:[#allocation1 + $0x1] ss:$9 sm:$0xff] %v2580_v33  ;;  %v2596_v29 = vrot.slane %v2580_v33, 4 }
 0x814   : > { %v2597_v54 = vrot.slane %v2580_v33, 5  ;;  %v2598_v56 = vrot.slane %v2580_v33, 6  ;;  %v2599_v36 = vrot.slane %v2580_v33, 7  ;;  %v2581_v18 = vsel %vm2577_vm6, %v2576_v47, %v2563_v31  ;;  %v2801_v33 = vld [vmem:[%s7449_s14 + $0x38] sm:$0xff] }
 0x815   : > { %2626 = vst [vmem:[#allocation1 + $0x2] ss:$9 sm:$0xff] %v2593_v22  ;;  %v2800_v22 = vld [vmem:[%s7449_s14 + $0x30] sm:$0xff]  ;;  %2820 = vmatpush.msrb.mxu2 %v2801_v33 }
 0x816   : > { %2627 = vst [vmem:[#allocation1 + $0x3] ss:$9 sm:$0xff] %v2594_v35  ;;  %v2799_v35 = vld [vmem:[%s7449_s14 + $0x28] sm:$0xff] }
 0x817   : > { %2628 = vst [vmem:[#allocation1 + $0x4] ss:$9 sm:$0xff] %v2595_v53  ;;  %2821 = vmatpush.msrb.mxu2 %v2800_v22 }
 0x818   : > { %2629 = vst [vmem:[#allocation1 + $0x5] ss:$9 sm:$0xff] %v2596_v29 }
 0x819   : > { %2630 = vst [vmem:[#allocation1 + $0x6] ss:$9 sm:$0xff] %v2597_v54  ;;  %v2798_v54 = vld [vmem:[%s7449_s14 + $0x20] sm:$0xff]  ;;  %2822 = vmatpush.msrb.mxu2 %v2799_v35 }
 0x81a   : > { %2631 = vst [vmem:[#allocation1 + $0x7] ss:$9 sm:$0xff] %v2598_v56 }
 0x81b   : > { %2823 = vmatpush.msrb.mxu2 %v2798_v54 }
 0x81d   : > { %2824 = vmatpush.msrb.mxu2 %v2797_v46  ;;  %v4753_v46 = vld [vmem:[%s7442_s7 + $0x20] sm:$0xff] }
 0x821   : > { %v2632_v17 = vld [vmem:[#allocation1] sm:$0xff] }
 0x822   : > { %2633 = vst [vmem:[#allocation1] ss:$9 sm:$0xff] %v2599_v36  ;;  %4743 = vmatmul.msk.f32.gmra.mxu0 %vm878_vm3, %v2632_v17 }
 0x823   : > { %2634 = vst [vmem:[#allocation1 + $0x1] ss:$9 sm:$0xff] %v2581_v18 }
 0x82a   : > { %v2635_v20 = vld [vmem:[#allocation1] sm:$0xff] }
 0x82b   : > { %4744 = vmatmul.msk.f32.gmra.mxu0 %vm878_vm3, %v2635_v20 }
 0x840   : > { %v2659_v23 = vpop.f32.mrf.mxu0 }
 0x841   : > { %v6532_v2 = vadd.f32 %v4983_v55, %v2659_v23 }
 0x843   : > { %v2670_v57 = vsel %vm878_vm3, %v6532_v2, 0.0 }
 0x844   : > { %2671 = vadd.xlane.f32.xlu0 %v2670_v57 }
 0x89f   : > { %v2662_v6 = vpop.f32.mrf.mxu0 }
 0x8a0   : > { %v6536_v38 = vadd.f32 %v4983_v55, %v2662_v6 }
 0x8a2   : > { %v2673_v52 = vsel %vm878_vm3, %v6536_v38, 0.0 }
 0x8a3   : > { %2674 = vadd.xlane.f32.xlu1 %v2673_v52 }
 0x8a8   : > { %v2665_v32 = vpop.f32.mrf.mxu0 }
 0x8a9   : > { %v6540_v7 = vadd.f32 %v4983_v55, %v2665_v32 }
 0x8ab   : > { %v2676_v45 = vsel %vm885_vm4, %v6540_v7, 0.0 }
 0x8ac   : > { %2677 = vadd.xlane.f32.xlu2 %v2676_v45 }
 0x8b7   : > { %v2672_v8 = vpop.xlane.xlu0 %2671 }
 0x8b8   : > { %v2679_v9 = vmul.f32 %v2672_v8, %v5624_v42 }
 0x8ba   : > { %v2682_v14 = vsub.f32 %v6532_v2, %v2679_v9  ;;  %v2796_v9 = vld [vmem:[%s7449_s14 + $0x10] sm:$0xff] }
 0x8bb   : > { %2825 = vmatpush.msrb.mxu2 %v2796_v9 }
 0x8bc   : > { %v2685_v21 = vmul.f32 %v2682_v14, %v2682_v14 }
 0x8be   : > { %v2688_v27 = vsel %vm878_vm3, %v2685_v21, 0.0 }
 0x8bf   : > { %2689 = vadd.xlane.f32.xlu0 %v2688_v27 }
 0x916   : > { %v2675_v58 = vpop.xlane.xlu1 %2674 }
 0x917   : > { %v2680_v16 = vmul.f32 %v2675_v58, %v5624_v42  ;;  %v2794_v58 = vld [vmem:[%s7449_s14] sm:$0xff] }
 0x919   : > { %v6549_v19 = vsub.f32 %v6536_v38, %v2680_v16 }
 0x91b   : > { %v2686_v63 = vmul.f32 %v6549_v19, %v6549_v19 }
 0x91d   : > { %v2691_v24 = vsel %vm878_vm3, %v2686_v63, 0.0  ;;  %v4986_v63 = vld [vmem:[#allocation8] ss:$0 sm:$0xff] }
 0x91e   : > { %2692 = vadd.xlane.f32.xlu1 %v2691_v24 }
 0x91f   : > { %v2678_v62 = vpop.xlane.xlu2 %2677 }
 0x920   : > { %v2681_v10 = vmul.f32 %v2678_v62, %v5624_v42 }
 0x922   : > { %v6556_v25 = vsub.f32 %v6540_v7, %v2681_v10 }
 0x924   : > { %v2687_v26 = vmul.f32 %v6556_v25, %v6556_v25 }
 0x926   : > { %v2694_v4 = vsel %vm885_vm4, %v2687_v26, 0.0 }
 0x927   : > { %2695 = vadd.xlane.f32.xlu2 %v2694_v4 }
 0x932   : > { %v2690_v61 = vpop.xlane.xlu0 %2689 }
 0x933   : > { %v2697_v3 = vmul.f32 %v2690_v61, %v5624_v42 }
 0x935   : > { %v2700_v13 = vadd.f32 1e-05, %v2697_v3 }
 0x937   : > { %5067 = vrsqrt.f32 %v2700_v13  ;;  %vm2709_vm8 = vweird.f32 %v2700_v13 }
 0x93d   : > { %v5068_v15 = vpop.eup %5067 }
 0x93e   : > { %v2704_v28 = vmul.f32 %v5068_v15, %v2700_v13  ;;  %vm2710_vm7 = vweird.f32 %v5068_v15 }
 0x93f   : > { %vm2711_vm9 = vmor %vm2709_vm8, %vm2710_vm7  ;;  %vm2802_vm8 = vcmask 523264  }
 0x940   : > { %v2705_v5 = vmul.f32 %v5068_v15, %v2704_v28 }
 0x942   : > { %v2706_v59 = vmul.f32 0.5, %v2705_v5 }
 0x944   : > { %v2707_v34 = vsub.f32 1.5, %v2706_v59 }
 0x946   : > { %v2708_v30 = vmul.f32 %v5068_v15, %v2707_v34 }
 0x948   : > { %v2712_v39 = vsel %vm2711_vm9, %v5068_v15, %v2708_v30 }
 0x949   : > { %v2733_v12 = vmul.f32 %v2712_v39, %v2682_v14  ;;  %v2795_v14 = vld [vmem:[%s7449_s14 + $0x8] sm:$0xff] }
 0x94a   : > { %2826 = vmatpush.msrb.mxu2 %v2795_v14 }
 0x94b   : > { %v2739_v11 = vmul.f32 %v4984_v37, %v2733_v12 }
 0x94c   : > { %2827 = vmatpush.msrb.mxu2 %v2794_v58 }
 0x94d   : > { %v2745_v60 = vadd.f32 %v4985_v48, %v2739_v11 }
 0x94f   : > { %4745 = vmatmul.msk.f32.vlgmr.msra.gmra.mxu1 %vm878_vm3, %v2745_v60 }
 0x991   : > { %v2693_v49 = vpop.xlane.xlu1 %2692 }
 0x992   : > { %v2698_v50 = vmul.f32 %v2693_v49, %v5624_v42 }
 0x994   : > { %v2701_v51 = vadd.f32 1e-05, %v2698_v50 }
 0x996   : > { %5069 = vrsqrt.f32 %v2701_v51  ;;  %vm2719_vm11 = vweird.f32 %v2701_v51 }
 0x99a   : > { %v2696_v53 = vpop.xlane.xlu2 %2695 }
 0x99b   : > { %v2699_v29 = vmul.f32 %v2696_v53, %v5624_v42 }
 0x99c   : > { %v5070_v56 = vpop.eup %5069 }
 0x99d   : > { %v2714_v43 = vmul.f32 %v5070_v56, %v2701_v51  ;;  %v2702_v44 = vadd.f32 1e-05, %v2699_v29  ;;  %vm2720_vm10 = vweird.f32 %v5070_v56 }
 0x99e   : > { %vm2721_vm12 = vmor %vm2719_vm11, %vm2720_vm10 }
 0x99f   : > { %v2715_v47 = vmul.f32 %v5070_v56, %v2714_v43  ;;  %5071 = vrsqrt.f32 %v2702_v44  ;;  %vm2729_vm14 = vweird.f32 %v2702_v44  ;;  %v4755_v43 = vld [vmem:[%s7442_s7 + $0x30] sm:$0xff] }
 0x9a1   : > { %v2716_v36 = vmul.f32 0.5, %v2715_v47 }
 0x9a3   : > { %v2717_v31 = vsub.f32 1.5, %v2716_v36 }
 0x9a5   : > { %v5072_v17 = vpop.eup %5071  ;;  %v2718_v18 = vmul.f32 %v5070_v56, %v2717_v31 }
 0x9a6   : > { %v2724_v20 = vmul.f32 %v5072_v17, %v2702_v44  ;;  %vm2730_vm13 = vweird.f32 %v5072_v17  ;;  %v4754_v44 = vld [vmem:[%s7442_s7 + $0x28] sm:$0xff] }
 0x9a7   : > { %v2722_v55 = vsel %vm2721_vm12, %v5070_v56, %v2718_v18  ;;  %vm2731_vm7 = vmor %vm2729_vm14, %vm2730_vm13  ;;  %v4756_v56 = vld [vmem:[%s7442_s7 + $0x38] sm:$0xff] }
 0x9a8   : > { %v2725_v23 = vmul.f32 %v5072_v17, %v2724_v20  ;;  %v2734_v57 = vmul.f32 %v2722_v55, %v6549_v19  ;;  %2956 = vmatpush.msra.mxu3 %v4756_v56 }
 0x9aa   : > { %v2726_v6 = vmul.f32 0.5, %v2725_v23  ;;  %v2740_v52 = vmul.f32 %v4984_v37, %v2734_v57  ;;  %2957 = vmatpush.msra.mxu3 %v4755_v43 }
 0x9ac   : > { %v2727_v32 = vsub.f32 1.5, %v2726_v6  ;;  %v2746_v45 = vadd.f32 %v4985_v48, %v2740_v52  ;;  %2958 = vmatpush.msra.mxu3 %v4754_v44  ;;  %v4988_v6 = vld [vmem:[%s7440_s5 + $0x1] ss:$0 sm:$0xff] }
 0x9ae   : > { %v2728_v8 = vmul.f32 %v5072_v17, %v2727_v32  ;;  %4746 = vmatmul.msk.f32.gmra.mxu1 %vm878_vm3, %v2746_v45  ;;  %2959 = vmatpush.msra.mxu3 %v4753_v46  ;;  %v4989_v45 = vld [vmem:[%s7441_s6 + $0x1] ss:$0 sm:$0xff] }
 0x9b0   : > { %v2732_v21 = vsel %vm2731_vm7, %v5072_v17, %v2728_v8 }
 0x9b1   : > { %v2735_v27 = vmul.f32 %v2732_v21, %v6556_v25 }
 0x9b3   : > { %v2741_v16 = vmul.f32 %v4984_v37, %v2735_v27 }
 0x9b5   : > { %v2747_v19 = vadd.f32 %v4985_v48, %v2741_v16 }
 0x9b7   : > { %4747 = vmatmul.msk.f32.gmra.mxu1 %vm878_vm3, %v2747_v19 }
 0x9cc   : > { %v2782_v24 = vpop.f32.mrf.mxu1 }
 0x9cd   : > { %v2783_v62 = vadd.f32 %v4986_v63, %v2782_v24 }
 0x9cf   : > { %v2791_v10 = vmax.f32 %v2783_v62, 0.0 }
 0x9d1   : > { %4748 = vmatmul.msk.f32.vlgmr.msrb.gmra.mxu2 %vm2802_vm8, %v2791_v10 }
 0xa2b   : > { %v2785_v26 = vpop.f32.mrf.mxu1 }
 0xa2c   : > { %v2786_v4 = vadd.f32 %v4986_v63, %v2785_v26 }
 0xa2e   : > { %v2792_v25 = vmax.f32 %v2786_v4, 0.0 }
 0xa30   : > { %4749 = vmatmul.msk.f32.gmra.mxu2 %vm2802_vm8, %v2792_v25 }
 0xa34   : > { %v2788_v0 = vpop.f32.mrf.mxu1 }
 0xa35   : > { %v2789_v40 = vadd.f32 %v4986_v63, %v2788_v0 }
 0xa37   : > { %v2793_v41 = vmax.f32 %v2789_v40, 0.0 }
 0xa39   : > { %4750 = vmatmul.msk.f32.gmra.mxu2 %vm2802_vm8, %v2793_v41 }
 0xa54   : > { %v2829_v61 = vpop.f32.mrf.mxu2 }
 0xa55   : > { %v2838_v3 = vadd.f32 %v2829_v61, %v6532_v2 }
 0xa57   : > { %v2845_v13 = vadd.f32 %v4987_v1, %v2838_v3 }
 0xa59   : > { %v2852_v15 = vsel %vm878_vm3, %v2845_v13, 0.0 }
 0xa5a   : > { %2853 = vadd.xlane.f32.xlu0 %v2852_v15 }
 0xab3   : > { %v2832_v28 = vpop.f32.mrf.mxu2 }
 0xab4   : > { %v2839_v5 = vadd.f32 %v2832_v28, %v6536_v38 }
 0xab6   : > { %v2846_v59 = vadd.f32 %v4987_v1, %v2839_v5 }
 0xab8   : > { %v2855_v34 = vsel %vm878_vm3, %v2846_v59, 0.0 }
 0xab9   : > { %2856 = vadd.xlane.f32.xlu1 %v2855_v34 }
 0xabc   : > { %v2835_v30 = vpop.f32.mrf.mxu2 }
 0xabd   : > { %v2840_v37 = vadd.f32 %v2835_v30, %v6540_v7 }
 0xabf   : > { %v2847_v39 = vadd.f32 %v4987_v1, %v2840_v37 }
 0xac1   : > { %v2858_v12 = vsel %vm885_vm4, %v2847_v39, 0.0 }
 0xac2   : > { %2859 = vadd.xlane.f32.xlu2 %v2858_v12 }
 0xacd   : > { %v2854_v48 = vpop.xlane.xlu0 %2853 }
 0xace   : > { %v2861_v2 = vmul.f32 %v2854_v48, %v5624_v42 }
 0xad0   : > { %v2864_v11 = vsub.f32 %v2845_v13, %v2861_v2 }
 0xad2   : > { %v2867_v60 = vmul.f32 %v2864_v11, %v2864_v11 }
 0xad4   : > { %v2870_v49 = vsel %vm878_vm3, %v2867_v60, 0.0 }
 0xad5   : > { %2871 = vadd.xlane.f32.xlu0 %v2870_v49 }
 0xb2c   : > { %v2857_v38 = vpop.xlane.xlu1 %2856 }
 0xb2d   : > { %v2862_v50 = vmul.f32 %v2857_v38, %v5624_v42 }
 0xb2f   : > { %v2865_v51 = vsub.f32 %v2846_v59, %v2862_v50 }
 0xb31   : > { %v2868_v33 = vmul.f32 %v2865_v51, %v2865_v51 }
 0xb33   : > { %v2873_v22 = vsel %vm878_vm3, %v2868_v33, 0.0 }
 0xb34   : > { %2874 = vadd.xlane.f32.xlu1 %v2873_v22 }
 0xb35   : > { %v2860_v7 = vpop.xlane.xlu2 %2859 }
 0xb36   : > { %v2863_v35 = vmul.f32 %v2860_v7, %v5624_v42 }
 0xb38   : > { %v6625_v53 = vsub.f32 %v2847_v39, %v2863_v35 }
 0xb3a   : > { %v2869_v29 = vmul.f32 %v6625_v53, %v6625_v53 }
 0xb3c   : > { %v2876_v54 = vsel %vm885_vm4, %v2869_v29, 0.0 }
 0xb3d   : > { %2877 = vadd.xlane.f32.xlu2 %v2876_v54 }
 0xb48   : > { %v2872_v47 = vpop.xlane.xlu0 %2871 }
 0xb49   : > { %v2879_v36 = vmul.f32 %v2872_v47, %v5624_v42 }
 0xb4b   : > { %v2882_v31 = vadd.f32 1e-05, %v2879_v36 }
 0xb4d   : > { %5073 = vrsqrt.f32 %v2882_v31  ;;  %vm2891_vm10 = vweird.f32 %v2882_v31 }
 0xb53   : > { %v5074_v17 = vpop.eup %5073 }
 0xb54   : > { %v2886_v18 = vmul.f32 %v5074_v17, %v2882_v31  ;;  %vm2892_vm9 = vweird.f32 %v5074_v17 }
 0xb55   : > { %vm2893_vm11 = vmor %vm2891_vm10, %vm2892_vm9 }
 0xb56   : > { %v2887_v20 = vmul.f32 %v5074_v17, %v2886_v18 }
 0xb58   : > { %v2888_v55 = vmul.f32 0.5, %v2887_v20 }
 0xb5a   : > { %v2889_v23 = vsub.f32 1.5, %v2888_v55 }
 0xb5c   : > { %v2890_v57 = vmul.f32 %v5074_v17, %v2889_v23 }
 0xb5e   : > { %v2894_v52 = vsel %vm2893_vm11, %v5074_v17, %v2890_v57 }
 0xb5f   : > { %v2915_v32 = vmul.f32 %v2894_v52, %v2864_v11 }
 0xb61   : > { %v2921_v8 = vmul.f32 %v4988_v6, %v2915_v32 }
 0xb63   : > { %v2927_v9 = vadd.f32 %v4989_v45, %v2921_v8 }
 0xb65   : > { %4757 = vmatmul.msk.f32.vlgmr.msra.gmra.mxu3 %vm878_vm3, %v2927_v9 }
 0xba7   : > { %v2875_v14 = vpop.xlane.xlu1 %2874 }
 0xba8   : > { %v2880_v21 = vmul.f32 %v2875_v14, %v5624_v42 }
 0xbaa   : > { %v2883_v27 = vadd.f32 1e-05, %v2880_v21 }
 0xbac   : > { %5075 = vrsqrt.f32 %v2883_v27  ;;  %vm2901_vm13 = vweird.f32 %v2883_v27 }
 0xbb0   : > { %v2878_v58 = vpop.xlane.xlu2 %2877 }
 0xbb1   : > { %v2881_v16 = vmul.f32 %v2878_v58, %v5624_v42 }
 0xbb2   : > { %v5076_v19 = vpop.eup %5075 }
 0xbb3   : > { %v2896_v63 = vmul.f32 %v5076_v19, %v2883_v27  ;;  %v2884_v24 = vadd.f32 1e-05, %v2881_v16  ;;  %vm2902_vm12 = vweird.f32 %v5076_v19 }
 0xbb4   : > { %vm2903_vm14 = vmor %vm2901_vm13, %vm2902_vm12 }
 0xbb5   : > { %v2897_v62 = vmul.f32 %v5076_v19, %v2896_v63  ;;  %5077 = vrsqrt.f32 %v2884_v24  ;;  %vm2911_vm9 = vweird.f32 %v2884_v24 }
 0xbb7   : > { %v2898_v10 = vmul.f32 0.5, %v2897_v62 }
 0xbb9   : > { %v2899_v26 = vsub.f32 1.5, %v2898_v10 }
 0xbbb   : > { %v5078_v4 = vpop.eup %5077  ;;  %v2900_v25 = vmul.f32 %v5076_v19, %v2899_v26 }
 0xbbc   : > { %v2906_v0 = vmul.f32 %v5078_v4, %v2884_v24  ;;  %vm2912_vm7 = vweird.f32 %v5078_v4 }
 0xbbd   : > { %v2904_v40 = vsel %vm2903_vm14, %v5076_v19, %v2900_v25  ;;  %vm2913_vm10 = vmor %vm2911_vm9, %vm2912_vm7 }
 0xbbe   : > { %v2907_v41 = vmul.f32 %v5078_v4, %v2906_v0  ;;  %v2916_v1 = vmul.f32 %v2904_v40, %v2865_v51 }
 0xbc0   : > { %v2908_v61 = vmul.f32 0.5, %v2907_v41  ;;  %v2922_v3 = vmul.f32 %v4988_v6, %v2916_v1 }
 0xbc2   : > { %v2909_v13 = vsub.f32 1.5, %v2908_v61  ;;  %v2928_v15 = vadd.f32 %v4989_v45, %v2922_v3 }
 0xbc4   : > { %v2910_v28 = vmul.f32 %v5078_v4, %v2909_v13  ;;  %4758 = vmatmul.msk.f32.gmra.mxu3 %vm878_vm3, %v2928_v15 }
 0xbc6   : > { %v2914_v5 = vsel %vm2913_vm10, %v5078_v4, %v2910_v28 }
 0xbc7   : > { %v2917_v59 = vmul.f32 %v2914_v5, %v6625_v53 }
 0xbc9   : > { %v2923_v34 = vmul.f32 %v4988_v6, %v2917_v59 }
 0xbcb   : > { %v2929_v30 = vadd.f32 %v4989_v45, %v2923_v34 }
 0xbcd   : > { %4759 = vmatmul.msk.f32.gmra.mxu3 %vm878_vm3, %v2929_v30 }
 0xbe8   : > { %v6655_v37 = vpop.f32.mrf.mxu3 }
 0xbe9   : > { %v6658_v39 = vmul.f32 0.17677669, %v6655_v37  ;;  %v6698_v22 = vrot.slane %v6655_v37, 1  ;;  %v6703_v35 = vrot.slane %v6655_v37, 2  ;;  %v6707_v53 = vrot.slane %v6655_v37, 3 }
 0xbea   : > { %v6711_v29 = vrot.slane %v6655_v37, 4  ;;  %v6715_v54 = vrot.slane %v6655_v37, 5  ;;  %v6719_v56 = vrot.slane %v6655_v37, 6  ;;  %v6723_v43 = vrot.slane %v6655_v37, 7 }
 0xbeb   : > { %v6661_v12 = vrot.slane %v6658_v39, 1  ;;  %v6664_v48 = vrot.slane %v6658_v39, 2  ;;  %v6667_v2 = vrot.slane %v6658_v39, 3  ;;  %3009 = vst [vmem:[#allocation1] ss:$9 sm:$0xff] %v6658_v39  ;;  %v6671_v11 = vrot.slane %v6658_v39, 4 }
 0xbec   : > { %v6674_v60 = vrot.slane %v6658_v39, 5  ;;  %v6678_v49 = vrot.slane %v6658_v39, 6  ;;  %v6682_v38 = vrot.slane %v6658_v39, 7 }
 0xbed   : > { %3011 = vst [vmem:[#allocation1 + $0x1] ss:$9 sm:$0xff] %v6661_v12 }
 0xbee   : > { %3013 = vst [vmem:[#allocation1 + $0x2] ss:$9 sm:$0xff] %v6664_v48 }
 0xbef   : > { %3015 = vst [vmem:[#allocation1 + $0x3] ss:$9 sm:$0xff] %v6667_v2 }
 0xbf0   : > { %3017 = vst [vmem:[#allocation1 + $0x4] ss:$9 sm:$0xff] %v6671_v11 }
 0xbf1   : > { %3019 = vst [vmem:[#allocation1 + $0x5] ss:$9 sm:$0xff] %v6674_v60 }
 0xbf2   : > { %3021 = vst [vmem:[#allocation1 + $0x6] ss:$9 sm:$0xff] %v6678_v49 }
 0xbf3   : > { %3023 = vst [vmem:[#allocation1 + $0x7] ss:$9 sm:$0xff] %v6682_v38 }
 0xbfa   : > { %v6694_v33 = vld [vmem:[#allocation1] sm:$0xff] }
 0xc47   : > { %v6689_v50 = vpop.f32.mrf.mxu3 }
 0xc48   : > { %v6692_v51 = vmul.f32 0.17677669, %v6689_v50  ;;  %v6772_v32 = vrot.slane %v6689_v50, 1  ;;  %v6775_v45 = vrot.slane %v6689_v50, 2  ;;  %v6780_v9 = vrot.slane %v6689_v50, 3 }
 0xc49   : > { %v6784_v14 = vrot.slane %v6689_v50, 4  ;;  %v6788_v21 = vrot.slane %v6689_v50, 5  ;;  %v6792_v27 = vrot.slane %v6689_v50, 6  ;;  %v6796_v58 = vrot.slane %v6689_v50, 7 }
 0xc4a   : > { %3025 = vst [vmem:[#allocation1] ss:$9 sm:$0xff] %v6692_v51  ;;  %v6731_v46 = vrot.slane %v6692_v51, 1  ;;  %v6734_v47 = vrot.slane %v6692_v51, 2  ;;  %v6737_v31 = vrot.slane %v6692_v51, 3  ;;  %v6742_v17 = vrot.slane %v6692_v51, 4 }
 0xc4b   : > { %v6746_v18 = vrot.slane %v6692_v51, 5  ;;  %v6752_v55 = vrot.slane %v6692_v51, 6  ;;  %v6756_v23 = vrot.slane %v6692_v51, 7 }
 0xc50   : > { %v6749_v20 = vpop.f32.mrf.mxu3 }
 0xc51   : > { %v6700_v7 = vld [vmem:[#allocation1] sm:$0xff]  ;;  %v6761_v57 = vmul.f32 0.17677669, %v6749_v20  ;;  %v6803_v16 = vrot.slane %v6749_v20, 1 }
 0xc52   : > { %3027 = vst [vmem:[#allocation1] ss:$9 sm:$0xff] %v6655_v37 }
 0xc53   : > { %3029 = vst [vmem:[#allocation1 + $0x1] ss:$9 sm:$0xff] %v6698_v22  ;;  %v6766_v6 = vrot.slane %v6761_v57, 1 }
 0xc54   : > { %3031 = vst [vmem:[#allocation1 + $0x2] ss:$9 sm:$0xff] %v6703_v35 }
 0xc55   : > { %3033 = vst [vmem:[#allocation1 + $0x3] ss:$9 sm:$0xff] %v6707_v53 }
 0xc56   : > { %3035 = vst [vmem:[#allocation1 + $0x4] ss:$9 sm:$0xff] %v6711_v29 }
 0xc57   : > { %3037 = vst [vmem:[#allocation1 + $0x5] ss:$9 sm:$0xff] %v6715_v54 }
 0xc58   : > { %3039 = vst [vmem:[#allocation1 + $0x6] ss:$9 sm:$0xff] %v6719_v56 }
 0xc59   : > { %3041 = vst [vmem:[#allocation1 + $0x7] ss:$9 sm:$0xff] %v6723_v43 }
 0xc60   : > { %v3042_v44 = vld [vmem:[#allocation1] sm:$0xff] }
 0xc61   : > { %3043 = vst [vmem:[#allocation1] ss:$9 sm:$0xff] %v6689_v50  ;;  %3045 = vrot.lane.b32.xlu1 %v3042_v44, %s5352_s18 }
 0xc68   : > { %v3044_v36 = vld [vmem:[#allocation1] sm:$0xff] }
 0xc69   : > { %3080 = vst [vmem:[#allocation1] ss:$9 sm:$0xff] %v6731_v46  ;;  %3047 = vrot.lane.b32.xlu0 %v3044_v36, %s5352_s18 }
 0xc6a   : > { %3082 = vst [vmem:[#allocation1 + $0x1] ss:$9 sm:$0xff] %v6734_v47 }
 0xc6b   : > { %3084 = vst [vmem:[#allocation1 + $0x2] ss:$9 sm:$0xff] %v6737_v31 }
 0xc6c   : > { %3086 = vst [vmem:[#allocation1 + $0x3] ss:$9 sm:$0xff] %v6742_v17 }
 0xc6d   : > { %3088 = vst [vmem:[#allocation1 + $0x4] ss:$9 sm:$0xff] %v6746_v18 }
 0xc6e   : > { %3090 = vst [vmem:[#allocation1 + $0x5] ss:$9 sm:$0xff] %v6752_v55 }
 0xc6f   : > { %3092 = vst [vmem:[#allocation1 + $0x6] ss:$9 sm:$0xff] %v6756_v23 }
 0xc70   : > { %3094 = vst [vmem:[#allocation1 + $0x7] ss:$9 sm:$0xff] %v6761_v57 }
 0xc77   : > { %v6768_v52 = vld [vmem:[#allocation1] sm:$0xff] }
 0xc78   : > { %3096 = vst [vmem:[#allocation1] ss:$9 sm:$0xff] %v6766_v6 }
 0xc7f   : > { %v6777_v8 = vld [vmem:[#allocation1] sm:$0xff] }
 0xc80   : > { %3098 = vst [vmem:[#allocation1] ss:$9 sm:$0xff] %v6772_v32 }
 0xc81   : > { %3100 = vst [vmem:[#allocation1 + $0x1] ss:$9 sm:$0xff] %v6775_v45 }
 0xc82   : > { %3102 = vst [vmem:[#allocation1 + $0x2] ss:$9 sm:$0xff] %v6780_v9 }
 0xc83   : > { %3104 = vst [vmem:[#allocation1 + $0x3] ss:$9 sm:$0xff] %v6784_v14 }
 0xc84   : > { %3106 = vst [vmem:[#allocation1 + $0x4] ss:$9 sm:$0xff] %v6788_v21 }
 0xc85   : > { %3108 = vst [vmem:[#allocation1 + $0x5] ss:$9 sm:$0xff] %v6792_v27 }
 0xc86   : > { %3110 = vst [vmem:[#allocation1 + $0x6] ss:$9 sm:$0xff] %v6796_v58 }
 0xc87   : > { %3112 = vst [vmem:[#allocation1 + $0x7] ss:$9 sm:$0xff] %v6749_v20 }
 0xc8e   : > { %v3113_v19 = vld [vmem:[#allocation1] sm:$0xff] }
 0xc8f   : > { %3114 = vst [vmem:[#allocation1] ss:$9 sm:$0xff] %v6803_v16  ;;  %3116 = vrot.lane.b32.xlu0 %v3113_v19, %s5352_s18 }
 0xc96   : > { %v3115_v63 = vld [vmem:[#allocation1] sm:$0xff] }
 0xc97   : > { %3195 = vst [vmem:[#allocation1] ss:$9 sm:$0xff] %v6655_v37  ;;  %3118 = vrot.lane.b32.xlu2 %v3115_v63, %s5352_s18  ;;  %s7491_s18 = smov 56  }
 0xc98   : > { %3197 = vst [vmem:[#allocation1 + $0x1] ss:$9 sm:$0xff] %v6698_v22 }
 0xc99   : > { %3199 = vst [vmem:[#allocation1 + $0x2] ss:$9 sm:$0xff] %v6703_v35 }
 0xc9a   : > { %3201 = vst [vmem:[#allocation1 + $0x3] ss:$9 sm:$0xff] %v6707_v53 }
 0xc9b   : > { %3203 = vst [vmem:[#allocation1 + $0x4] ss:$9 sm:$0xff] %v6711_v29 }
 0xc9c   : > { %3205 = vst [vmem:[#allocation1 + $0x5] ss:$9 sm:$0xff] %v6715_v54 }
 0xc9d   : > { %3207 = vst [vmem:[#allocation1 + $0x6] ss:$9 sm:$0xff] %v6719_v56 }
 0xc9e   : > { %3209 = vst [vmem:[#allocation1 + $0x7] ss:$9 sm:$0xff] %v6723_v43 }
 0xca5   : > { %v6816_v24 = vld [vmem:[#allocation1] sm:$0xff] }
 0xca6   : > { %3211 = vst [vmem:[#allocation1] ss:$9 sm:$0xff] %v6689_v50 }
 0xcad   : > { %v6819_v62 = vld [vmem:[#allocation1] sm:$0xff] }
 0xcae   : > { %3249 = vst [vmem:[#allocation1] ss:$9 sm:$0xff] %v6772_v32 }
 0xcaf   : > { %3251 = vst [vmem:[#allocation1 + $0x1] ss:$9 sm:$0xff] %v6775_v45 }
 0xcb0   : > { %3253 = vst [vmem:[#allocation1 + $0x2] ss:$9 sm:$0xff] %v6780_v9 }
 0xcb1   : > { %3255 = vst [vmem:[#allocation1 + $0x3] ss:$9 sm:$0xff] %v6784_v14 }
 0xcb2   : > { %3257 = vst [vmem:[#allocation1 + $0x4] ss:$9 sm:$0xff] %v6788_v21 }
 0xcb3   : > { %3259 = vst [vmem:[#allocation1 + $0x5] ss:$9 sm:$0xff] %v6792_v27 }
 0xcb4   : > { %3261 = vst [vmem:[#allocation1 + $0x6] ss:$9 sm:$0xff] %v6796_v58 }
 0xcb5   : > { %3263 = vst [vmem:[#allocation1 + $0x7] ss:$9 sm:$0xff] %v6749_v20 }
 0xcbc   : > { %v6829_v10 = vld [vmem:[#allocation1] sm:$0xff] }
 0xcbd   : > { %3265 = vst [vmem:[#allocation1] ss:$9 sm:$0xff] %v6803_v16 }
 0xcc4   : > { %v6832_v26 = vld [vmem:[#allocation1] sm:$0xff] }
 0xcc5   : > { %3303 = vst [vmem:[#allocation1] ss:$9 sm:$0xff] %v6658_v39 }
 0xcc6   : > { %3305 = vst [vmem:[#allocation1 + $0x1] ss:$9 sm:$0xff] %v6661_v12 }
 0xcc7   : > { %3307 = vst [vmem:[#allocation1 + $0x2] ss:$9 sm:$0xff] %v6664_v48 }
 0xcc8   : > { %3309 = vst [vmem:[#allocation1 + $0x3] ss:$9 sm:$0xff] %v6667_v2 }
 0xcc9   : > { %3311 = vst [vmem:[#allocation1 + $0x4] ss:$9 sm:$0xff] %v6671_v11 }
 0xcca   : > { %3313 = vst [vmem:[#allocation1 + $0x5] ss:$9 sm:$0xff] %v6674_v60 }
 0xccb   : > { %3315 = vst [vmem:[#allocation1 + $0x6] ss:$9 sm:$0xff] %v6678_v49 }
 0xccc   : > { %3317 = vst [vmem:[#allocation1 + $0x7] ss:$9 sm:$0xff] %v6682_v38 }
 0xcd3   : > { %v3318_v4 = vld [vmem:[#allocation1] sm:$0xff]  ;;  %v3046_v3 = vpop.permute.xlu1 %3045 }
 0xcd4   : > { %3319 = vst [vmem:[#allocation1] ss:$9 sm:$0xff] %v6692_v51  ;;  %3321 = vrot.lane.b32.xlu2 %v3318_v4, %s5354_s26 }
 0xcdb   : > { %v3320_v25 = vld [vmem:[#allocation1] sm:$0xff]  ;;  %v3048_v1 = vpop.permute.xlu0 %3047 }
 0xcdc   : > { %3325 = vst [vmem:[#allocation1] ss:$9 sm:$0xff] %v6655_v37  ;;  %3323 = vrot.lane.b32.xlu2 %v3320_v25, %s5354_s26  ;;  %4760 = vmatpush.xpose.msk.msrb.mxu0 %vm1356_vm15, %v3048_v1 }
 0xcdd   : > { %3327 = vst [vmem:[#allocation1 + $0x1] ss:$9 sm:$0xff] %v6698_v22 }
 0xcde   : > { %3329 = vst [vmem:[#allocation1 + $0x2] ss:$9 sm:$0xff] %v6703_v35 }
 0xcdf   : > { %3331 = vst [vmem:[#allocation1 + $0x3] ss:$9 sm:$0xff] %v6707_v53 }
 0xce0   : > { %3333 = vst [vmem:[#allocation1 + $0x4] ss:$9 sm:$0xff] %v6711_v29  ;;  %4761 = vmatpush.xpose.msk.msrb.mxu0 %vm1356_vm15, %v3046_v3 }
 0xce1   : > { %3335 = vst [vmem:[#allocation1 + $0x5] ss:$9 sm:$0xff] %v6715_v54 }
 0xce2   : > { %3337 = vst [vmem:[#allocation1 + $0x6] ss:$9 sm:$0xff] %v6719_v56 }
 0xce3   : > { %3339 = vst [vmem:[#allocation1 + $0x7] ss:$9 sm:$0xff] %v6723_v43  ;;  %4762 = vmatmul.msk.f32.vlgmr.msrb.gmra.mxu0 %vm1356_vm15, %v6694_v33 }
 0xcea   : > { %v3340_v0 = vld [vmem:[#allocation1] sm:$0xff] }
 0xceb   : > { %3341 = vst [vmem:[#allocation1] ss:$9 sm:$0xff] %v6689_v50  ;;  %3343 = vrot.lane.b32.xlu0 %v3340_v0, %s5355_s29  ;;  %4763 = vmatmul.msk.f32.gmra.mxu0 %vm1356_vm15, %v6700_v7 }
 0xcf1   : > { %v3119_v13 = vpop.permute.xlu2 %3118 }
 0xcf2   : > { %v3342_v40 = vld [vmem:[#allocation1] sm:$0xff]  ;;  %4764 = vmatpush.xpose.msk.msrb.mxu1 %vm1356_vm15, %v3119_v13 }
 0xcf3   : > { %3378 = vst [vmem:[#allocation1] ss:$9 sm:$0xff] %v6731_v46  ;;  %3345 = vrot.lane.b32.xlu1 %v3342_v40, %s5355_s29 }
 0xcf4   : > { %3380 = vst [vmem:[#allocation1 + $0x1] ss:$9 sm:$0xff] %v6734_v47 }
 0xcf5   : > { %3382 = vst [vmem:[#allocation1 + $0x2] ss:$9 sm:$0xff] %v6737_v31 }
 0xcf6   : > { %3384 = vst [vmem:[#allocation1 + $0x3] ss:$9 sm:$0xff] %v6742_v17 }
 0xcf7   : > { %3386 = vst [vmem:[#allocation1 + $0x4] ss:$9 sm:$0xff] %v6746_v18 }
 0xcf8   : > { %3388 = vst [vmem:[#allocation1 + $0x5] ss:$9 sm:$0xff] %v6752_v55 }
 0xcf9   : > { %3390 = vst [vmem:[#allocation1 + $0x6] ss:$9 sm:$0xff] %v6756_v23 }
 0xcfa   : > { %3392 = vst [vmem:[#allocation1 + $0x7] ss:$9 sm:$0xff] %v6761_v57 }
 0xd01   : > { %v3393_v41 = vld [vmem:[#allocation1] sm:$0xff]  ;;  %v3117_v5 = vpop.permute.xlu0 %3116 }
 0xd02   : > { %3394 = vst [vmem:[#allocation1] ss:$9 sm:$0xff] %v6766_v6  ;;  %3396 = vrot.lane.b32.xlu1 %v3393_v41, %s5354_s26  ;;  %4765 = vmatpush.xpose.msk.msrb.mxu1 %vm1356_vm15, %v3117_v5 }
 0xd05   : > { %4766 = vmatmul.msk.f32.vlgmr.msrb.gmra.mxu1 %vm1356_vm15, %v6768_v52 }
 0xd09   : > { %v3395_v61 = vld [vmem:[#allocation1] sm:$0xff] }
 0xd0a   : > { %3400 = vst [vmem:[#allocation1] ss:$9 sm:$0xff] %v6772_v32  ;;  %3398 = vrot.lane.b32.xlu1 %v3395_v61, %s5354_s26  ;;  %s7492_s26 = smov 64  }
 0xd0b   : > { %3402 = vst [vmem:[#allocation1 + $0x1] ss:$9 sm:$0xff] %v6775_v45 }
 0xd0c   : > { %3404 = vst [vmem:[#allocation1 + $0x2] ss:$9 sm:$0xff] %v6780_v9 }
 0xd0d   : > { %3406 = vst [vmem:[#allocation1 + $0x3] ss:$9 sm:$0xff] %v6784_v14  ;;  %4767 = vmatmul.msk.f32.gmra.mxu1 %vm1356_vm15, %v6777_v8 }
 0xd0e   : > { %3408 = vst [vmem:[#allocation1 + $0x4] ss:$9 sm:$0xff] %v6788_v21 }
 0xd0f   : > { %3410 = vst [vmem:[#allocation1 + $0x5] ss:$9 sm:$0xff] %v6792_v27 }
 0xd10   : > { %3412 = vst [vmem:[#allocation1 + $0x6] ss:$9 sm:$0xff] %v6796_v58 }
 0xd11   : > { %3414 = vst [vmem:[#allocation1 + $0x7] ss:$9 sm:$0xff] %v6749_v20 }
 0xd18   : > { %v3415_v15 = vld [vmem:[#allocation1] sm:$0xff] }
 0xd19   : > { %3416 = vst [vmem:[#allocation1] ss:$9 sm:$0xff] %v6803_v16  ;;  %3418 = vrot.lane.b32.xlu0 %v3415_v15, %s5355_s29 }
 0xd20   : > { %v3417_v28 = vld [vmem:[#allocation1] sm:$0xff] }
 0xd21   : > { %3497 = vst [vmem:[#allocation1] ss:$9 sm:$0xff] %v6655_v37  ;;  %3420 = vrot.lane.b32.xlu1 %v3417_v28, %s5355_s29  ;;  %s7493_s29 = smov 48  }
 0xd22   : > { %3499 = vst [vmem:[#allocation1 + $0x1] ss:$9 sm:$0xff] %v6698_v22 }
 0xd23   : > { %3501 = vst [vmem:[#allocation1 + $0x2] ss:$9 sm:$0xff] %v6703_v35 }
 0xd24   : > { %3503 = vst [vmem:[#allocation1 + $0x3] ss:$9 sm:$0xff] %v6707_v53 }
 0xd25   : > { %3505 = vst [vmem:[#allocation1 + $0x4] ss:$9 sm:$0xff] %v6711_v29 }
 0xd26   : > { %3507 = vst [vmem:[#allocation1 + $0x5] ss:$9 sm:$0xff] %v6715_v54 }
 0xd27   : > { %3509 = vst [vmem:[#allocation1 + $0x6] ss:$9 sm:$0xff] %v6719_v56 }
 0xd28   : > { %3511 = vst [vmem:[#allocation1 + $0x7] ss:$9 sm:$0xff] %v6723_v43 }
 0xd2e   : > { %v3322_v63 = vpop.permute.xlu2 %3321 }
 0xd2f   : > { %v6898_v59 = vld [vmem:[#allocation1] sm:$0xff] }
 0xd30   : > { %3513 = vst [vmem:[#allocation1] ss:$9 sm:$0xff] %v6689_v50 }
 0xd36   : > { %v3324_v25 = vpop.permute.xlu2 %3323 }
 0xd37   : > { %v6901_v34 = vld [vmem:[#allocation1] sm:$0xff] }
 0xd38   : > { %3551 = vst [vmem:[#allocation1] ss:$9 sm:$0xff] %v6772_v32 }
 0xd39   : > { %3553 = vst [vmem:[#allocation1 + $0x1] ss:$9 sm:$0xff] %v6775_v45 }
 0xd3a   : > { %3555 = vst [vmem:[#allocation1 + $0x2] ss:$9 sm:$0xff] %v6780_v9 }
 0xd3b   : > { %3557 = vst [vmem:[#allocation1 + $0x3] ss:$9 sm:$0xff] %v6784_v14 }
 0xd3c   : > { %3559 = vst [vmem:[#allocation1 + $0x4] ss:$9 sm:$0xff] %v6788_v21 }
 0xd3d   : > { %3561 = vst [vmem:[#allocation1 + $0x5] ss:$9 sm:$0xff] %v6792_v27 }
 0xd3e   : > { %3563 = vst [vmem:[#allocation1 + $0x6] ss:$9 sm:$0xff] %v6796_v58 }
 0xd3f   : > { %3565 = vst [vmem:[#allocation1 + $0x7] ss:$9 sm:$0xff] %v6749_v20 }
 0xd46   : > { %v6911_v30 = vld [vmem:[#allocation1] sm:$0xff] }
 0xd47   : > { %3567 = vst [vmem:[#allocation1] ss:$9 sm:$0xff] %v6803_v16 }
 0xd4e   : > { %v6914_v33 = vld [vmem:[#allocation1] sm:$0xff] }
 0xd4f   : > { %3605 = vst [vmem:[#allocation1] ss:$9 sm:$0xff] %v6658_v39 }
 0xd50   : > { %3607 = vst [vmem:[#allocation1 + $0x1] ss:$9 sm:$0xff] %v6661_v12 }
 0xd51   : > { %3609 = vst [vmem:[#allocation1 + $0x2] ss:$9 sm:$0xff] %v6664_v48 }
 0xd52   : > { %3611 = vst [vmem:[#allocation1 + $0x3] ss:$9 sm:$0xff] %v6667_v2 }
 0xd53   : > { %3613 = vst [vmem:[#allocation1 + $0x4] ss:$9 sm:$0xff] %v6671_v11 }
 0xd54   : > { %3615 = vst [vmem:[#allocation1 + $0x5] ss:$9 sm:$0xff] %v6674_v60 }
 0xd55   : > { %3617 = vst [vmem:[#allocation1 + $0x6] ss:$9 sm:$0xff] %v6678_v49 }
 0xd56   : > { %3619 = vst [vmem:[#allocation1 + $0x7] ss:$9 sm:$0xff] %v6682_v38 }
 0xd5d   : > { %v3620_v7 = vld [vmem:[#allocation1] sm:$0xff]  ;;  %v3344_v19 = vpop.permute.xlu0 %3343 }
 0xd5e   : > { %3623 = vrot.lane.b32.xlu0 %v3620_v7, %s5356_s20  ;;  %3621 = vst [vmem:[#allocation1] ss:$9 sm:$0xff] %v6692_v51 }
 0xd65   : > { %v3622_v44 = vld [vmem:[#allocation1] sm:$0xff]  ;;  %v3346_v52 = vpop.permute.xlu1 %3345 }
 0xd66   : > { %3627 = vst [vmem:[#allocation1] ss:$9 sm:$0xff] %v6655_v37  ;;  %4774 = vmatpush.xpose.msk.msra.mxu0 %vm1356_vm15, %v3346_v52 }
 0xd67   : > { %3629 = vst [vmem:[#allocation1 + $0x1] ss:$9 sm:$0xff] %v6698_v22 }
 0xd68   : > { %3631 = vst [vmem:[#allocation1 + $0x2] ss:$9 sm:$0xff] %v6703_v35 }
 0xd69   : > { %3633 = vst [vmem:[#allocation1 + $0x3] ss:$9 sm:$0xff] %v6707_v53 }
 0xd6a   : > { %3635 = vst [vmem:[#allocation1 + $0x4] ss:$9 sm:$0xff] %v6711_v29  ;;  %4775 = vmatpush.xpose.msk.msra.mxu0 %vm1356_vm15, %v3344_v19 }
 0xd6b   : > { %3637 = vst [vmem:[#allocation1 + $0x5] ss:$9 sm:$0xff] %v6715_v54 }
 0xd6c   : > { %3639 = vst [vmem:[#allocation1 + $0x6] ss:$9 sm:$0xff] %v6719_v56 }
 0xd6d   : > { %3641 = vst [vmem:[#allocation1 + $0x7] ss:$9 sm:$0xff] %v6723_v43  ;;  %4776 = vmatmul.msk.f32.vlgmr.msra.gmra.mxu0 %vm1356_vm15, %v3322_v63 }
 0xd74   : > { %v3642_v36 = vld [vmem:[#allocation1] sm:$0xff]  ;;  %v3397_v4 = vpop.permute.xlu1 %3396 }
 0xd75   : > { %3645 = vrot.lane.b32.xlu2 %v3642_v36, %s5357_s28  ;;  %3643 = vst [vmem:[#allocation1] ss:$9 sm:$0xff] %v6689_v50  ;;  %4777 = vmatmul.msk.f32.gmra.mxu0 %vm1356_vm15, %v3324_v25 }
 0xd7c   : > { %v3644_v8 = vld [vmem:[#allocation1] sm:$0xff]  ;;  %v3399_v40 = vpop.permute.xlu1 %3398 }
 0xd7d   : > { %3647 = vrot.lane.b32.xlu0 %v3644_v8, %s5357_s28  ;;  %3680 = vst [vmem:[#allocation1] ss:$9 sm:$0xff] %v6731_v46 }
 0xd7e   : > { %3682 = vst [vmem:[#allocation1 + $0x1] ss:$9 sm:$0xff] %v6734_v47 }
 0xd7f   : > { %3684 = vst [vmem:[#allocation1 + $0x2] ss:$9 sm:$0xff] %v6737_v31 }
 0xd80   : > { %3686 = vst [vmem:[#allocation1 + $0x3] ss:$9 sm:$0xff] %v6742_v17 }
 0xd81   : > { %3688 = vst [vmem:[#allocation1 + $0x4] ss:$9 sm:$0xff] %v6746_v18 }
 0xd82   : > { %3690 = vst [vmem:[#allocation1 + $0x5] ss:$9 sm:$0xff] %v6752_v55 }
 0xd83   : > { %3692 = vst [vmem:[#allocation1 + $0x6] ss:$9 sm:$0xff] %v6756_v23 }
 0xd84   : > { %3694 = vst [vmem:[#allocation1 + $0x7] ss:$9 sm:$0xff] %v6761_v57 }
 0xd85   : > { %3625 = vrot.lane.b32.xlu0 %v3622_v44, %s5356_s20 }
 0xd8b   : > { %v3695_v0 = vld [vmem:[#allocation1] sm:$0xff]  ;;  %v3419_v61 = vpop.permute.xlu0 %3418 }
 0xd8c   : > { %3698 = vrot.lane.b32.xlu2 %v3695_v0, %s5356_s20  ;;  %3696 = vst [vmem:[#allocation1] ss:$9 sm:$0xff] %v6766_v6 }
 0xd93   : > { %v3697_v41 = vld [vmem:[#allocation1] sm:$0xff]  ;;  %v3421_v1 = vpop.permute.xlu1 %3420 }
 0xd94   : > { %3702 = vst [vmem:[#allocation1] ss:$9 sm:$0xff] %v6772_v32  ;;  %4778 = vmatpush.xpose.msk.msra.mxu1 %vm1356_vm15, %v3421_v1 }
 0xd95   : > { %3704 = vst [vmem:[#allocation1 + $0x1] ss:$9 sm:$0xff] %v6775_v45 }
 0xd96   : > { %3706 = vst [vmem:[#allocation1 + $0x2] ss:$9 sm:$0xff] %v6780_v9 }
 0xd97   : > { %3708 = vst [vmem:[#allocation1 + $0x3] ss:$9 sm:$0xff] %v6784_v14 }
 0xd98   : > { %3710 = vst [vmem:[#allocation1 + $0x4] ss:$9 sm:$0xff] %v6788_v21  ;;  %4779 = vmatpush.xpose.msk.msra.mxu1 %vm1356_vm15, %v3419_v61 }
 0xd99   : > { %3712 = vst [vmem:[#allocation1 + $0x5] ss:$9 sm:$0xff] %v6792_v27 }
 0xd9a   : > { %3714 = vst [vmem:[#allocation1 + $0x6] ss:$9 sm:$0xff] %v6796_v58 }
 0xd9b   : > { %3716 = vst [vmem:[#allocation1 + $0x7] ss:$9 sm:$0xff] %v6749_v20  ;;  %4780 = vmatmul.msk.f32.vlgmr.msra.gmra.mxu1 %vm1356_vm15, %v3397_v4 }
 0xda2   : > { %v3717_v3 = vld [vmem:[#allocation1] sm:$0xff] }
 0xda3   : > { %3720 = vrot.lane.b32.xlu1 %v3717_v3, %s5357_s28  ;;  %3718 = vst [vmem:[#allocation1] ss:$9 sm:$0xff] %v6803_v16  ;;  %4781 = vmatmul.msk.f32.gmra.mxu1 %vm1356_vm15, %v3399_v40 }
 0xdaa   : > { %v3719_v13 = vld [vmem:[#allocation1] sm:$0xff] }
 0xdab   : > { %3722 = vrot.lane.b32.xlu2 %v3719_v13, %s5357_s28  ;;  %3799 = vst [vmem:[#allocation1] ss:$9 sm:$0xff] %v6655_v37  ;;  %s7495_s28 = smov 8  }
 0xdac   : > { %3801 = vst [vmem:[#allocation1 + $0x1] ss:$9 sm:$0xff] %v6698_v22 }
 0xdad   : > { %3803 = vst [vmem:[#allocation1 + $0x2] ss:$9 sm:$0xff] %v6703_v35 }
 0xdae   : > { %3805 = vst [vmem:[#allocation1 + $0x3] ss:$9 sm:$0xff] %v6707_v53 }
 0xdaf   : > { %3807 = vst [vmem:[#allocation1 + $0x4] ss:$9 sm:$0xff] %v6711_v29 }
 0xdb0   : > { %3809 = vst [vmem:[#allocation1 + $0x5] ss:$9 sm:$0xff] %v6715_v54 }
 0xdb1   : > { %3811 = vst [vmem:[#allocation1 + $0x6] ss:$9 sm:$0xff] %v6719_v56 }
 0xdb2   : > { %3813 = vst [vmem:[#allocation1 + $0x7] ss:$9 sm:$0xff] %v6723_v43 }
 0xdb3   : > { %3700 = vrot.lane.b32.xlu2 %v3697_v41, %s5356_s20  ;;  %s7494_s20 = smov 40  }
 0xdb9   : > { %v6976_v15 = vld [vmem:[#allocation1] sm:$0xff] }
 0xdba   : > { %3815 = vst [vmem:[#allocation1] ss:$9 sm:$0xff] %v6689_v50 }
 0xdc1   : > { %v6979_v28 = vld [vmem:[#allocation1] sm:$0xff] }
 0xdc2   : > { %3853 = vst [vmem:[#allocation1] ss:$9 sm:$0xff] %v6772_v32 }
 0xdc3   : > { %3855 = vst [vmem:[#allocation1 + $0x1] ss:$9 sm:$0xff] %v6775_v45 }
 0xdc4   : > { %3857 = vst [vmem:[#allocation1 + $0x2] ss:$9 sm:$0xff] %v6780_v9 }
 0xdc5   : > { %3859 = vst [vmem:[#allocation1 + $0x3] ss:$9 sm:$0xff] %v6784_v14 }
 0xdc6   : > { %3861 = vst [vmem:[#allocation1 + $0x4] ss:$9 sm:$0xff] %v6788_v21 }
 0xdc7   : > { %3863 = vst [vmem:[#allocation1 + $0x5] ss:$9 sm:$0xff] %v6792_v27 }
 0xdc8   : > { %3865 = vst [vmem:[#allocation1 + $0x6] ss:$9 sm:$0xff] %v6796_v58 }
 0xdc9   : > { %3867 = vst [vmem:[#allocation1 + $0x7] ss:$9 sm:$0xff] %v6749_v20 }
 0xdd0   : > { %v6989_v5 = vld [vmem:[#allocation1] sm:$0xff] }
 0xdd1   : > { %3869 = vst [vmem:[#allocation1] ss:$9 sm:$0xff] %v6803_v16 }
 0xdd8   : > { %v6992_v7 = vld [vmem:[#allocation1] sm:$0xff] }
 0xdd9   : > { %3907 = vst [vmem:[#allocation1] ss:$9 sm:$0xff] %v6658_v39 }
 0xdda   : > { %3909 = vst [vmem:[#allocation1 + $0x1] ss:$9 sm:$0xff] %v6661_v12  ;;  %v3646_v12 = vpop.permute.xlu2 %3645 }
 0xddb   : > { %3911 = vst [vmem:[#allocation1 + $0x2] ss:$9 sm:$0xff] %v6664_v48  ;;  %v3624_v48 = vpop.permute.xlu0 %3623 }
 0xddc   : > { %3913 = vst [vmem:[#allocation1 + $0x3] ss:$9 sm:$0xff] %v6667_v2 }
 0xddd   : > { %3915 = vst [vmem:[#allocation1 + $0x4] ss:$9 sm:$0xff] %v6671_v11 }
 0xdde   : > { %3917 = vst [vmem:[#allocation1 + $0x5] ss:$9 sm:$0xff] %v6674_v60 }
 0xddf   : > { %3919 = vst [vmem:[#allocation1 + $0x6] ss:$9 sm:$0xff] %v6678_v49 }
 0xde0   : > { %3921 = vst [vmem:[#allocation1 + $0x7] ss:$9 sm:$0xff] %v6682_v38 }
 0xde6   : > { %v3699_v11 = vpop.permute.xlu2 %3698 }
 0xde7   : > { %v3922_v44 = vld [vmem:[#allocation1] sm:$0xff] }
 0xde8   : > { %3925 = vrot.lane.b32.xlu1 %v3922_v44, %s5358_s23  ;;  %3923 = vst [vmem:[#allocation1] ss:$9 sm:$0xff] %v6692_v51 }
 0xdef   : > { %v7004_v39 = vld [vmem:[#allocation1] sm:$0xff]  ;;  %v3648_v60 = vpop.permute.xlu0 %3647 }
 0xdf0   : > { %3929 = vst [vmem:[#allocation1] ss:$9 sm:$0xff] %v6655_v37  ;;  %4788 = vmatpush.xpose.msk.msrb.mxu0 %vm1356_vm15, %v3648_v60 }
 0xdf1   : > { %3931 = vst [vmem:[#allocation1 + $0x1] ss:$9 sm:$0xff] %v6698_v22 }
 0xdf2   : > { %3933 = vst [vmem:[#allocation1 + $0x2] ss:$9 sm:$0xff] %v6703_v35 }
 0xdf3   : > { %3935 = vst [vmem:[#allocation1 + $0x3] ss:$9 sm:$0xff] %v6707_v53 }
 0xdf4   : > { %3937 = vst [vmem:[#allocation1 + $0x4] ss:$9 sm:$0xff] %v6711_v29  ;;  %4789 = vmatpush.xpose.msk.msrb.mxu0 %vm1356_vm15, %v3646_v12 }
 0xdf5   : > { %3939 = vst [vmem:[#allocation1 + $0x5] ss:$9 sm:$0xff] %v6715_v54 }
 0xdf6   : > { %3941 = vst [vmem:[#allocation1 + $0x6] ss:$9 sm:$0xff] %v6719_v56 }
 0xdf7   : > { %3943 = vst [vmem:[#allocation1 + $0x7] ss:$9 sm:$0xff] %v6723_v43  ;;  %4790 = vmatmul.msk.f32.vlgmr.msrb.gmra.mxu0 %vm1356_vm15, %v3624_v48  ;;  %v3626_v51 = vpop.permute.xlu0 %3625 }
 0xdfe   : > { %v3944_v2 = vld [vmem:[#allocation1] sm:$0xff] }
 0xdff   : > { %3947 = vrot.lane.b32.xlu0 %v3944_v2, %s5359_s30  ;;  %3945 = vst [vmem:[#allocation1] ss:$9 sm:$0xff] %v6689_v50  ;;  %4791 = vmatmul.msk.f32.gmra.mxu0 %vm1356_vm15, %v3626_v51 }
 0xe05   : > { %v3723_v38 = vpop.permute.xlu2 %3722 }
 0xe06   : > { %v3946_v49 = vld [vmem:[#allocation1] sm:$0xff]  ;;  %4792 = vmatpush.xpose.msk.msrb.mxu1 %vm1356_vm15, %v3723_v38 }
 0xe07   : > { %3949 = vrot.lane.b32.xlu1 %v3946_v49, %s5359_s30  ;;  %3982 = vst [vmem:[#allocation1] ss:$9 sm:$0xff] %v6731_v46 }
 0xe08   : > { %3984 = vst [vmem:[#allocation1 + $0x1] ss:$9 sm:$0xff] %v6734_v47 }
 0xe09   : > { %3986 = vst [vmem:[#allocation1 + $0x2] ss:$9 sm:$0xff] %v6737_v31 }
 0xe0a   : > { %3988 = vst [vmem:[#allocation1 + $0x3] ss:$9 sm:$0xff] %v6742_v17 }
 0xe0b   : > { %3990 = vst [vmem:[#allocation1 + $0x4] ss:$9 sm:$0xff] %v6746_v18 }
 0xe0c   : > { %3992 = vst [vmem:[#allocation1 + $0x5] ss:$9 sm:$0xff] %v6752_v55 }
 0xe0d   : > { %3994 = vst [vmem:[#allocation1 + $0x6] ss:$9 sm:$0xff] %v6756_v23  ;;  %v3701_v17 = vpop.permute.xlu2 %3700  ;;  %v7052_v23 = vpop.f32.mrf.mxu1 }
 0xe0e   : > { %3996 = vst [vmem:[#allocation1 + $0x7] ss:$9 sm:$0xff] %v6761_v57  ;;  %v3074_v57 = vpop.f32.mrf.mxu0 }
 0xe15   : > { %v3997_v46 = vld [vmem:[#allocation1] sm:$0xff]  ;;  %v3721_v31 = vpop.permute.xlu1 %3720 }
 0xe16   : > { %4000 = vrot.lane.b32.xlu1 %v3997_v46, %s5358_s23  ;;  %3998 = vst [vmem:[#allocation1] ss:$9 sm:$0xff] %v6766_v6  ;;  %4793 = vmatpush.xpose.msk.msrb.mxu1 %vm1356_vm15, %v3721_v31 }
 0xe19   : > { %4794 = vmatmul.msk.f32.vlgmr.msrb.gmra.mxu1 %vm1356_vm15, %v3699_v11 }
 0xe1d   : > { %v3999_v47 = vld [vmem:[#allocation1] sm:$0xff] }
 0xe1e   : > { %4004 = vst [vmem:[#allocation1] ss:$9 sm:$0xff] %v6772_v32 }
 0xe1f   : > { %4006 = vst [vmem:[#allocation1 + $0x1] ss:$9 sm:$0xff] %v6775_v45 }
 0xe20   : > { %4008 = vst [vmem:[#allocation1 + $0x2] ss:$9 sm:$0xff] %v6780_v9 }
 0xe21   : > { %4010 = vst [vmem:[#allocation1 + $0x3] ss:$9 sm:$0xff] %v6784_v14  ;;  %4795 = vmatmul.msk.f32.gmra.mxu1 %vm1356_vm15, %v3701_v17 }
 0xe22   : > { %4012 = vst [vmem:[#allocation1 + $0x4] ss:$9 sm:$0xff] %v6788_v21 }
 0xe23   : > { %4014 = vst [vmem:[#allocation1 + $0x5] ss:$9 sm:$0xff] %v6792_v27 }
 0xe24   : > { %4016 = vst [vmem:[#allocation1 + $0x6] ss:$9 sm:$0xff] %v6796_v58 }
 0xe25   : > { %4018 = vst [vmem:[#allocation1 + $0x7] ss:$9 sm:$0xff] %v6749_v20 }
 0xe2c   : > { %v4019_v18 = vld [vmem:[#allocation1] sm:$0xff] }
 0xe2d   : > { %4022 = vrot.lane.b32.xlu2 %v4019_v18, %s5359_s30  ;;  %4020 = vst [vmem:[#allocation1] ss:$9 sm:$0xff] %v6803_v16 }
 0xe34   : > { %v4021_v55 = vld [vmem:[#allocation1] sm:$0xff] }
 0xe35   : > { %4002 = vrot.lane.b32.xlu2 %v3999_v47, %s5358_s23  ;;  %4024 = vrot.lane.b32.xlu0 %v4021_v55, %s5359_s30  ;;  %4101 = vst [vmem:[#allocation1] ss:$9 sm:$0xff] %v6655_v37  ;;  %v3151_v37 = vsel %vm1459_vm1, %v3074_v57, -inf  ;;  %s4546_s30 = scalar_lea.sflag [#allocation4], %s578_s27 }
 0xe36   : > { %4103 = vst [vmem:[#allocation1 + $0x1] ss:$9 sm:$0xff] %v6698_v22 }
 0xe37   : > { %4105 = vst [vmem:[#allocation1 + $0x2] ss:$9 sm:$0xff] %v6703_v35  ;;  %v7062_v35 = vpop.f32.mrf.mxu1 }
 0xe38   : > { %4107 = vst [vmem:[#allocation1 + $0x3] ss:$9 sm:$0xff] %v6707_v53  ;;  %v3160_v53 = vsel %vm1463_vm2, %v7062_v35, -inf }
 0xe39   : > { %4109 = vst [vmem:[#allocation1 + $0x4] ss:$9 sm:$0xff] %v6711_v29 }
 0xe3a   : > { %4111 = vst [vmem:[#allocation1 + $0x5] ss:$9 sm:$0xff] %v6715_v54  ;;  %v3157_v54 = vsel %vm1459_vm1, %v7052_v23, -inf }
 0xe3b   : > { %4113 = vst [vmem:[#allocation1 + $0x6] ss:$9 sm:$0xff] %v6719_v56  ;;  %v3077_v56 = vpop.f32.mrf.mxu0 }
 0xe3c   : > { %4115 = vst [vmem:[#allocation1 + $0x7] ss:$9 sm:$0xff] %v6723_v43  ;;  %v3154_v43 = vsel %vm1463_vm2, %v3077_v56, -inf }
 0xe3d   : > { %3927 = vrot.lane.b32.xlu0 %v7004_v39, %s5358_s23 }
 0xe40   : > { %3152 = vmax.xlane.f32.xlu1 %v3151_v37 }
 0xe43   : > { %v7060_v22 = vld [vmem:[#allocation1] sm:$0xff] }
 0xe44   : > { %4117 = vst [vmem:[#allocation1] ss:$9 sm:$0xff] %v6689_v50 }
 0xe48   : > { %3161 = vmax.xlane.f32.xlu1 %v3160_v53 }
 0xe4b   : > { %v7067_v29 = vld [vmem:[#allocation1] sm:$0xff] }
 0xe4c   : > { %4155 = vst [vmem:[#allocation1] ss:$9 sm:$0xff] %v6772_v32  ;;  %v4959_v32 = vpack.i.bf16 %v6829_v10, %v6816_v24 }
 0xe4d   : > { %4157 = vst [vmem:[#allocation1 + $0x1] ss:$9 sm:$0xff] %v6775_v45 }
 0xe4e   : > { %4159 = vst [vmem:[#allocation1 + $0x2] ss:$9 sm:$0xff] %v6780_v9  ;;  %v7097_v9 = vpop.f32.mrf.mxu1 }
 0xe4f   : > { %4161 = vst [vmem:[#allocation1 + $0x3] ss:$9 sm:$0xff] %v6784_v14  ;;  %v4964_v14 = vpack.i.bf16 %v6911_v30, %v6898_v59 }
 0xe50   : > { %4163 = vst [vmem:[#allocation1 + $0x4] ss:$9 sm:$0xff] %v6788_v21  ;;  %v3459_v21 = vsel %vm1459_vm1, %v7097_v9, -inf }
 0xe51   : > { %4165 = vst [vmem:[#allocation1 + $0x5] ss:$9 sm:$0xff] %v6792_v27  ;;  %v7104_v27 = vpop.f32.mrf.mxu0 }
 0xe52   : > { %4167 = vst [vmem:[#allocation1 + $0x6] ss:$9 sm:$0xff] %v6796_v58 }
 0xe53   : > { %4169 = vst [vmem:[#allocation1 + $0x7] ss:$9 sm:$0xff] %v6749_v20 }
 0xe56   : > { %v7121_v19 = vpop.f32.mrf.mxu1 }
 0xe57   : > { %v3462_v63 = vsel %vm1463_vm2, %v7121_v19, -inf }
 0xe59   : > { %v7106_v58 = vpop.f32.mrf.mxu0 }
 0xe5a   : > { %v7077_v50 = vld [vmem:[#allocation1] sm:$0xff]  ;;  %v3926_v6 = vpop.permute.xlu1 %3925 }
 0xe5b   : > { %4171 = vst [vmem:[#allocation1] ss:$9 sm:$0xff] %v6803_v16  ;;  %v3456_v16 = vsel %vm1463_vm2, %v7106_v58, -inf }
 0xe5e   : > { %3158 = vmax.xlane.f32.xlu2 %v3157_v54 }
 0xe61   : > { %3517 = vrot.lane.b32.xlu1 %v6901_v34, %s7491_s18  ;;  %v3453_v34 = vsel %vm1459_vm1, %v7104_v27, -inf }
 0xe67   : > { %3155 = vmax.xlane.f32.xlu0 %v3154_v43 }
 0xe71   : > { %v3948_v45 = vpop.permute.xlu0 %3947 }
 0xe74   : > { %v7135_v2 = vpop.f32.mrf.mxu0 }
 0xe75   : > { %v3755_v18 = vsel %vm1459_vm1, %v7135_v2, -inf }
 0xe76   : > { %4960 = vrot.lane.b32.xlu2 %v4959_v32, %s7492_s26 }
 0xe79   : > { %v3950_v20 = vpop.permute.xlu1 %3949 }
 0xe7a   : > { %4802 = vmatpush.xpose.msk.msra.mxu0 %vm1356_vm15, %v3950_v20 }
 0xe7b   : > { %3215 = vrot.lane.b32.xlu0 %v6819_v62, %s7492_s26 }
 0xe7c   : > { %v7145_v51 = vpop.f32.mrf.mxu0 }
 0xe7d   : > { %v3758_v31 = vsel %vm1463_vm2, %v7145_v51, -inf }
 0xe7e   : > { %3571 = vrot.lane.b32.xlu2 %v6914_v33, %s7491_s18  ;;  %4803 = vmatpush.xpose.msk.msra.mxu0 %vm1356_vm15, %v3948_v45 }
 0xe81   : > { %4804 = vmatmul.msk.f32.vlgmr.msra.gmra.mxu0 %vm1356_vm15, %v3926_v6 }
 0xe83   : > { %3269 = vrot.lane.b32.xlu0 %v6832_v26, %s7492_s26  ;;  %s7497_s26 = sld [smem:[#allocation26_spill]] }
 0xe87   : > { %v4023_v62 = vpop.permute.xlu2 %4022 }
 0xe88   : > { %v4001_v10 = vpop.permute.xlu1 %4000 }
 0xe89   : > { %s5289_s0 = scalar_lea.hbm %s7497_s26, 4 }
 0xe8b   : > { %4965 = vrot.lane.b32.xlu0 %v4964_v14, %s7491_s18  ;;  %3460 = vmax.xlane.f32.xlu1 %v3459_v21 }
 0xe8f   : > { %v4003_v33 = vpop.permute.xlu2 %4002 }
 0xe96   : > { %v7125_v4 = vpop.f32.mrf.mxu1 }
 0xe97   : > { %v3761_v25 = vsel %vm1459_vm1, %v7125_v4, -inf }
 0xea7   : > { %3457 = vmax.xlane.f32.xlu2 %v3456_v16  ;;  %v4025_v24 = vpop.permute.xlu0 %4024 }
 0xea8   : > { %4806 = vmatpush.xpose.msk.msra.mxu1 %vm1356_vm15, %v4025_v24 }
 0xeac   : > { %4807 = vmatpush.xpose.msk.msra.mxu1 %vm1356_vm15, %v4023_v62 }
 0xeaf   : > { %4808 = vmatmul.msk.f32.vlgmr.msra.gmra.mxu1 %vm1356_vm15, %v4001_v10  ;;  %v3928_v26 = vpop.permute.xlu0 %3927 }
 0xeb0   : > { %4805 = vmatmul.msk.f32.gmra.mxu0 %vm1356_vm15, %v3928_v26 }
 0xeb3   : > { %v3153_v59 = vpop.xlane.xlu1 %3152 }
 0xeb4   : > { %v3163_v30 = vsub.f32 %v3074_v57, %v3153_v59 }
 0xeb5   : > { %3454 = vmax.xlane.f32.xlu0 %v3453_v34 }
 0xeb6   : > { %v3167_v36 = vmul.f32 1.442695, %v3163_v30 }
 0xeb7   : > { %4809 = vmatmul.msk.f32.gmra.mxu1 %vm1356_vm15, %v4003_v33 }
 0xeb8   : > { %5079 = vpow2.f32 %v3167_v36 }
 0xebb   : > { %v3162_v0 = vpop.xlane.xlu1 %3161 }
 0xebc   : > { %v3166_v1 = vsub.f32 %v7062_v35, %v3162_v0 }
 0xebe   : > { %v7117_v52 = vpop.eup %5079  ;;  %v3173_v3 = vmul.f32 1.442695, %v3166_v1 }
 0xebf   : > { %v3175_v8 = vsel %vm1459_vm1, %v7117_v52, 0.0 }
 0xec0   : > { %3176 = vadd.xlane.f32.xlu0 %v3175_v8 }
 0xec8   : > { %3463 = vmax.xlane.f32.xlu0 %v3462_v63 }
 0xed0   : > { %3762 = vmax.xlane.f32.xlu0 %v3761_v25 }
 0xed1   : > { %v3159_v40 = vpop.xlane.xlu2 %3158 }
 0xed2   : > { %v3165_v41 = vsub.f32 %v7052_v23, %v3159_v40  ;;  %v7153_v23 = vpop.f32.mrf.mxu1 }
 0xed3   : > { %v3518_v55 = vpop.permute.xlu1 %3517  ;;  %v3764_v35 = vsel %vm1463_vm2, %v7153_v23, -inf }
 0xed4   : > { %v3171_v61 = vmul.f32 1.442695, %v3165_v41 }
 0xed6   : > { %5081 = vpow2.f32 %v3171_v61 }
 0xed7   : > { %5083 = vpow2.f32 %v3173_v3 }
 0xed9   : > { %v4961_v46 = vpop.permute.xlu2 %4960 }
 0xeda   : > { %v3156_v13 = vpop.xlane.xlu0 %3155  ;;  %v4962_v17 = vunpack.i.l.bf16 %v4961_v46  ;;  %v4963_v37 = vunpack.i.h.bf16 %v4961_v46 }
 0xedb   : > { %v3164_v44 = vsub.f32 %v3077_v56, %v3156_v13 }
 0xedc   : > { %v7131_v39 = vpop.eup %5081 }
 0xedd   : > { %v3169_v12 = vmul.f32 1.442695, %v3164_v44  ;;  %v3181_v48 = vsel %vm1459_vm1, %v7131_v39, 0.0  ;;  %v7137_v11 = vpop.eup %5083 }
 0xede   : > { %3182 = vadd.xlane.f32.xlu1 %v3181_v48  ;;  %v3184_v49 = vsel %vm1463_vm2, %v7137_v11, 0.0 }
 0xedf   : > { %5085 = vpow2.f32 %v3169_v12 }
 0xee1   : > { %v3572_v53 = vpop.permute.xlu2 %3571 }
 0xee5   : > { %v7139_v60 = vpop.eup %5085 }
 0xee6   : > { %3185 = vadd.xlane.f32.xlu1 %v3184_v49  ;;  %v3178_v38 = vsel %vm1463_vm2, %v7139_v60, 0.0 }
 0xee7   : > { %3179 = vadd.xlane.f32.xlu2 %v3178_v38 }
 0xeed   : > { %v3216_v47 = vpop.permute.xlu0 %3215 }
 0xeee   : > { %3759 = vmax.xlane.f32.xlu1 %v3758_v31  ;;  %4768 = vmatpush.msk.msra.mxu2 %vm1534_vm0, %v3216_v47 }
 0xeef   : > { %3756 = vmax.xlane.f32.xlu2 %v3755_v18 }
 0xef0   : > { %3241 = vmatpush.msra.mxu2 %v4962_v17 }
 0xef2   : > { %4782 = vmatpush.msk.msrb.mxu2 %vm1534_vm0, %v3518_v55 }
 0xef5   : > { %v3270_v57 = vpop.permute.xlu0 %3269 }
 0xef6   : > { %4771 = vmatpush.msk.msrb.mxu3 %vm1534_vm0, %v3270_v57  ;;  %v4172_v57 = vld [vmem:[#allocation1] sm:$0xff] }
 0xef7   : > { %3765 = vmax.xlane.f32.xlu2 %v3764_v35 }
 0xef8   : > { %3295 = vmatpush.msrb.mxu3 %v4963_v37 }
 0xefa   : > { %4785 = vmatpush.msk.msra.mxu3 %vm1534_vm0, %v3572_v53 }
 0xefd   : > { %v4966_v54 = vpop.permute.xlu0 %4965 }
 0xefe   : > { %v4968_v56 = vunpack.i.h.bf16 %v4966_v54  ;;  %v4967_v43 = vunpack.i.l.bf16 %v4966_v54  ;;  %v3461_v6 = vpop.xlane.xlu1 %3460  ;;  %v7164_v21 = vpop.f32.mrf.mxu0 }
 0xeff   : > { %v3467_v32 = vsub.f32 %v7097_v9, %v3461_v6  ;;  %v4057_v16 = vsel %vm1459_vm1, %v7164_v21, -inf  ;;  %v4969_v6 = vpack.i.bf16 %v6989_v5, %v6976_v15 }
 0xf00   : > { %3543 = vmatpush.msrb.mxu2 %v4967_v43  ;;  %3597 = vmatpush.msra.mxu3 %v4968_v56 }
 0xf01   : > { %v3473_v20 = vmul.f32 1.442695, %v3467_v32 }
 0xf03   : > { %5087 = vpow2.f32 %v3473_v20 }
 0xf09   : > { %v7160_v45 = vpop.eup %5087 }
 0xf0a   : > { %v3483_v14 = vsel %vm1459_vm1, %v7160_v45, 0.0 }
 0xf0b   : > { %3484 = vadd.xlane.f32.xlu1 %v3483_v14 }
 0xf13   : > { %4058 = vmax.xlane.f32.xlu1 %v4057_v16 }
 0xf1a   : > { %v3458_v24 = vpop.xlane.xlu2 %3457 }
 0xf1b   : > { %v3466_v62 = vsub.f32 %v7106_v58, %v3458_v24 }
 0xf1d   : > { %v3471_v9 = vmul.f32 1.442695, %v3466_v62 }
 0xf1f   : > { %5089 = vpow2.f32 %v3471_v9 }
 0xf25   : > { %v7169_v10 = vpop.eup %5089 }
 0xf26   : > { %v3480_v26 = vsel %vm1463_vm2, %v7169_v10, 0.0 }
 0xf27   : > { %3481 = vadd.xlane.f32.xlu2 %v3480_v26 }
 0xf28   : > { %v3455_v59 = vpop.xlane.xlu0 %3454 }
 0xf29   : > { %v3465_v34 = vsub.f32 %v7104_v27, %v3455_v59 }
 0xf2b   : > { %v3469_v30 = vmul.f32 1.442695, %v3465_v34 }
 0xf2c   : > { %v7174_v33 = vpop.f32.mrf.mxu1 }
 0xf2d   : > { %5091 = vpow2.f32 %v3469_v30  ;;  %v7176_v36 = vpop.f32.mrf.mxu0  ;;  %v4063_v58 = vsel %vm1459_vm1, %v7174_v33, -inf }
 0xf2e   : > { %v4060_v8 = vsel %vm1463_vm2, %v7176_v36, -inf }
 0xf2f   : > { %4061 = vmax.xlane.f32.xlu1 %v4060_v8  ;;  %4064 = vmax.xlane.f32.xlu2 %v4063_v58 }
 0xf33   : > { %v7182_v63 = vpop.eup %5091  ;;  %v3177_v25 = vpop.xlane.xlu0 %3176 }
 0xf34   : > { %v3477_v27 = vsel %vm1459_vm1, %v7182_v63, 0.0  ;;  %5093 = vrcp.f32 %v3177_v25 }
 0xf35   : > { %3478 = vadd.xlane.f32.xlu0 %v3477_v27 }
 0xf3a   : > { %v5094_v0 = vpop.eup %5093 }
 0xf3b   : > { %v3191_v40 = vmul.f32 %v5094_v0, %v7117_v52  ;;  %v3464_v41 = vpop.xlane.xlu0 %3463 }
 0xf3c   : > { %v3468_v1 = vsub.f32 %v7121_v19, %v3464_v41 }
 0xf3d   : > { %4769 = vmatmul.msk.f32.vlgmr.msra.gmra.mxu2 %vm1459_vm1, %v3191_v40 }
 0xf3e   : > { %v3475_v61 = vmul.f32 1.442695, %v3468_v1 }
 0xf40   : > { %5095 = vpow2.f32 %v3475_v61 }
 0xf43   : > { %v3763_v49 = vpop.xlane.xlu0 %3762 }
 0xf46   : > { %v7189_v3 = vpop.eup %5095 }
 0xf47   : > { %3819 = vrot.lane.b32.xlu2 %v6979_v28, %s7493_s29  ;;  %v3486_v13 = vsel %vm1463_vm2, %v7189_v3, 0.0  ;;  %v3769_v28 = vsub.f32 %v7125_v4, %v3763_v49  ;;  %v4974_v4 = vpack.i.bf16 %v7077_v50, %v7060_v22 }
 0xf48   : > { %3487 = vadd.xlane.f32.xlu0 %v3486_v13 }
 0xf49   : > { %v3775_v31 = vmul.f32 1.442695, %v3769_v28 }
 0xf51   : > { %v3183_v44 = vpop.xlane.xlu1 %3182 }
 0xf52   : > { %5097 = vrcp.f32 %v3183_v44 }
 0xf58   : > { %v5098_v12 = vpop.eup %5097 }
 0xf59   : > { %v3193_v52 = vmul.f32 %v5098_v12, %v7131_v39  ;;  %v3186_v48 = vpop.xlane.xlu1 %3185 }
 0xf5a   : > { %5099 = vrcp.f32 %v3186_v48  ;;  %v3180_v19 = vpop.xlane.xlu2 %3179 }
 0xf5b   : > { %5101 = vrcp.f32 %v3180_v19  ;;  %4772 = vmatmul.msk.f32.vlgmr.msrb.gmra.mxu3 %vm1459_vm1, %v3193_v52 }
 0xf5c   : > { %3873 = vrot.lane.b32.xlu0 %v6992_v7, %s7493_s29  ;;  %5103 = vpow2.f32 %v3775_v31 }
 0xf60   : > { %v5100_v38 = vpop.eup %5099 }
 0xf61   : > { %v5102_v46 = vpop.eup %5101  ;;  %v3194_v47 = vmul.f32 %v5100_v38, %v7137_v11  ;;  %v3760_v22 = vpop.xlane.xlu1 %3759 }
 0xf62   : > { %v3757_v17 = vpop.xlane.xlu2 %3756  ;;  %v3192_v39 = vmul.f32 %v5102_v46, %v7139_v60  ;;  %v7209_v11 = vpop.eup %5103  ;;  %v3768_v26 = vsub.f32 %v7145_v51, %v3760_v22 }
 0xf63   : > { %v3767_v18 = vsub.f32 %v7135_v2, %v3757_v17  ;;  %4773 = vmatmul.msk.f32.gmra.mxu3 %vm1459_vm1, %v3194_v47  ;;  %v3785_v55 = vsel %vm1459_vm1, %v7209_v11, 0.0 }
 0xf64   : > { %4770 = vmatmul.msk.f32.gmra.mxu2 %vm1459_vm1, %v3192_v39  ;;  %4121 = vrot.lane.b32.xlu0 %v7067_v29, %s7494_s20  ;;  %v7218_v29 = vpop.f32.mrf.mxu1  ;;  %v3773_v34 = vmul.f32 1.442695, %v3768_v26 }
 0xf65   : > { %v3771_v7 = vmul.f32 1.442695, %v3767_v18  ;;  %v4066_v50 = vsel %vm1463_vm2, %v7218_v29, -inf }
 0xf67   : > { %5105 = vpow2.f32 %v3771_v7 }
 0xf6a   : > { %v3766_v20 = vpop.xlane.xlu2 %3765 }
 0xf6c   : > { %4975 = vrot.lane.b32.xlu0 %v4974_v4, %s7494_s20 }
 0xf6d   : > { %v7212_v60 = vpop.eup %5105 }
 0xf6e   : > { %v3779_v2 = vsel %vm1459_vm1, %v7212_v60, 0.0 }
 0xf6f   : > { %3780 = vadd.xlane.f32.xlu1 %v3779_v2 }
 0xf70   : > { %3786 = vadd.xlane.f32.xlu2 %v3785_v55 }
 0xf74   : > { %4175 = vrot.lane.b32.xlu0 %v4172_v57, %s7494_s20  ;;  %s4556_s20 = scalar_lea.hbm %s7497_s26, %s5548_s2 }
 0xf75   : > { %s4559_s23 = sshll.u32 %s4556_s20, 4  ;;  %s4560_s23 = int_to_ptr.hbm [resolvable:$true] %s4559_s23 }
 0xf76   : > { %s5283_s19 = sshra.s32 %s4560_s23, 4  ;;  %s5284_s19 = int_to_ptr.hbm [resolvable:$true] %s5283_s19 }
 0xf77   : > { %4067 = vmax.xlane.f32.xlu1 %v4066_v50  ;;  %s5285_s3 = scalar_lea.hbm %s5284_s19, 2  ;;  %p5290_p3 = scmp.lt.s32.totalorder %s5284_s19, %s7497_s26 }
 0xf78   : > { %p5286_p0 = scmp.ne.s32.totalorder %s5284_s19, %s5285_s3  ;;  %p5291_p4 = scmp.lt.s32.totalorder %s5289_s0, %s5285_s3 }
 0xf7a   : > { %p5287_p1 = pnand %p5286_p0, %p5490_p5  ;;  %p5292_p7 = por %p5291_p4, %p5290_p3 }
 0xf7c   : > { %p5288_p2 = pneg %p5287_p1 }
 0xf7e   : > { %v3485_v37 = vpop.xlane.xlu1 %3484  ;;  %p5293_p8 = pnand %p5292_p7, %p5288_p2 }
 0xf7f   : > { %5107 = vrcp.f32 %v3485_v37 }
 0xf85   : > { %v5108_v35 = vpop.eup %5107 }
 0xf86   : > { %v3495_v53 = vmul.f32 %v5108_v35, %v7160_v45  ;;  %v4059_v54 = vpop.xlane.xlu1 %4058 }
 0xf87   : > { %v4069_v56 = vsub.f32 %v7164_v21, %v4059_v54 }
 0xf88   : > { %4786 = vmatmul.msk.f32.vlgmr.msra.gmra.mxu3 %vm1459_vm1, %v3495_v53 }
 0xf89   : > { %v4073_v43 = vmul.f32 1.442695, %v4069_v56 }
 0xf8b   : > { %5109 = vpow2.f32 %v4073_v43 }
 0xf90   : > { %4970 = vrot.lane.b32.xlu1 %v4969_v6, %s7493_s29 }
 0xf91   : > { %v7229_v32 = vpop.eup %5109 }
 0xf92   : > { %v4081_v14 = vsel %vm1459_vm1, %v7229_v32, 0.0 }
 0xf93   : > { %4082 = vadd.xlane.f32.xlu2 %v4081_v14 }
 0xf9a   : > { %v3482_v45 = vpop.xlane.xlu2 %3481 }
 0xfa2   : > { %v4065_v16 = vpop.xlane.xlu2 %4064  ;;  %v4062_v24 = vpop.xlane.xlu1 %4061 }
 0xfa3   : > { %v4071_v21 = vsub.f32 %v7174_v33, %v4065_v16  ;;  %v4070_v9 = vsub.f32 %v7176_v36, %v4062_v24  ;;  %v3770_v36 = vsub.f32 %v7153_v23, %v3766_v20 }
 0xfa5   : > { %v4077_v62 = vmul.f32 1.442695, %v4071_v21  ;;  %v4075_v5 = vmul.f32 1.442695, %v4070_v9  ;;  %v3777_v25 = vmul.f32 1.442695, %v3770_v36 }
 0xfa7   : > { %5111 = vpow2.f32 %v4077_v62 }
 0xfa8   : > { %v3479_v15 = vpop.xlane.xlu0 %3478 }
 0xfa9   : > { %5113 = vrcp.f32 %v3479_v15 }
 0xfaa   : > { %v3820_v59 = vpop.permute.xlu2 %3819  ;;  %5115 = vpow2.f32 %v4075_v5 }
 0xfab   : > { %4796 = vmatpush.msk.msra.mxu2 %vm1534_vm0, %v3820_v59  ;;  %5117 = vrcp.f32 %v3482_v45 }
 0xfac   : > { %5119 = vpow2.f32 %v3773_v34 }
 0xfad   : > { %v7237_v30 = vpop.eup %5111  ;;  %5121 = vpow2.f32 %v3777_v25 }
 0xfae   : > { %v4087_v33 = vsel %vm1459_vm1, %v7237_v30, 0.0 }
 0xfaf   : > { %v5114_v58 = vpop.eup %5113  ;;  %4088 = vadd.xlane.f32.xlu2 %v4087_v33 }
 0xfb0   : > { %v3493_v51 = vmul.f32 %v5114_v58, %v7182_v63  ;;  %v7244_v8 = vpop.eup %5115 }
 0xfb1   : > { %v5118_v27 = vpop.eup %5117  ;;  %v4084_v40 = vsel %vm1463_vm2, %v7244_v8, 0.0 }
 0xfb2   : > { %4783 = vmatmul.msk.f32.vlgmr.msrb.gmra.mxu2 %vm1459_vm1, %v3493_v51  ;;  %v5120_v0 = vpop.eup %5119  ;;  %v3494_v41 = vmul.f32 %v5118_v27, %v7169_v10 }
 0xfb3   : > { %v3782_v1 = vsel %vm1463_vm2, %v5120_v0, 0.0  ;;  %v5122_v63 = vpop.eup %5121 }
 0xfb4   : > { %v3788_v61 = vsel %vm1463_vm2, %v5122_v63, 0.0 }
 0xfb7   : > { %4085 = vadd.xlane.f32.xlu2 %v4084_v40  ;;  %v4819_v40 = vld [vmem:[%s7443_s8 + $0x38] sm:$0xff] }
 0xfb8   : > { %4343 = vmatpush.msrb.mxu0 %v4819_v40 }
 0xfba   : > { %3783 = vadd.xlane.f32.xlu1 %v3782_v1  ;;  %4784 = vmatmul.msk.f32.gmra.mxu2 %vm1459_vm1, %v3494_v41  ;;  %v4818_v41 = vld [vmem:[%s7443_s8 + $0x30] sm:$0xff]  ;;  %v4817_v1 = vld [vmem:[%s7443_s8 + $0x28] sm:$0xff] }
 0xfbb   : > { %v3488_v23 = vpop.xlane.xlu0 %3487  ;;  %4344 = vmatpush.msrb.mxu0 %v4818_v41 }
 0xfbc   : > { %5123 = vrcp.f32 %v3488_v23  ;;  %v4816_v23 = vld [vmem:[%s7443_s8 + $0x20] sm:$0xff] }
 0xfbd   : > { %4345 = vmatpush.msrb.mxu0 %v4817_v1 }
 0xfbf   : > { %4346 = vmatpush.msrb.mxu0 %v4816_v23 }
 0xfc0   : > { %v7263_v57 = vpop.f32.mrf.mxu2 }
 0xfc2   : > { %v5124_v13 = vpop.eup %5123  ;;  %3789 = vadd.xlane.f32.xlu1 %v3788_v61 }
 0xfc3   : > { %v3496_v44 = vmul.f32 %v5124_v13, %v7189_v3 }
 0xfc5   : > { %4787 = vmatmul.msk.f32.gmra.mxu3 %vm1459_vm1, %v3496_v44 }
 0xfce   : > { %v3874_v12 = vpop.permute.xlu0 %3873 }
 0xfcf   : > { %4799 = vmatpush.msk.msrb.mxu3 %vm1534_vm0, %v3874_v12 }
 0xfd6   : > { %v4122_v49 = vpop.permute.xlu0 %4121 }
 0xfde   : > { %v4976_v3 = vpop.permute.xlu0 %4975  ;;  %v7265_v22 = vpop.f32.mrf.mxu3 }
 0xfdf   : > { %v4978_v55 = vunpack.i.h.bf16 %v4976_v3 }
 0xfe2   : > { %v3781_v10 = vpop.xlane.xlu1 %3780 }
 0xfe3   : > { %v3787_v46 = vpop.xlane.xlu2 %3786 }
 0xfe6   : > { %v4176_v2 = vpop.permute.xlu0 %4175  ;;  %v7269_v53 = vpop.f32.mrf.mxu3 }
 0xfea   : > { %v4068_v52 = vpop.xlane.xlu1 %4067 }
 0xfeb   : > { %v4072_v48 = vsub.f32 %v7218_v29, %v4068_v52  ;;  %v4977_v29 = vunpack.i.l.bf16 %v4976_v3 }
 0xfed   : > { %v4079_v19 = vmul.f32 1.442695, %v4072_v48 }
 0xfef   : > { %5125 = vpow2.f32 %v4079_v19 }
 0xff0   : > { %5127 = vrcp.f32 %v3781_v10 }
 0xff1   : > { %5129 = vrcp.f32 %v3787_v46 }
 0xff5   : > { %v5126_v28 = vpop.eup %5125 }
 0xff6   : > { %v4090_v38 = vsel %vm1463_vm2, %v5126_v28, 0.0  ;;  %v5128_v47 = vpop.eup %5127 }
 0xff7   : > { %4091 = vadd.xlane.f32.xlu2 %v4090_v38  ;;  %v5130_v31 = vpop.eup %5129  ;;  %v3795_v7 = vmul.f32 %v5128_v47, %v7212_v60 }
 0xff8   : > { %v3797_v4 = vmul.f32 %v5130_v31, %v7209_v11  ;;  %v7267_v11 = vpop.f32.mrf.mxu2 }
0x1002   : > { %v4971_v17 = vpop.permute.xlu1 %4970 }
0x1003   : > { %v4973_v39 = vunpack.i.h.bf16 %v4971_v17  ;;  %v4972_v18 = vunpack.i.l.bf16 %v4971_v17 }
0x1005   : > { %3845 = vmatpush.msra.mxu2 %v4972_v18  ;;  %3899 = vmatpush.msrb.mxu3 %v4973_v39 }
0x1006   : > { %4797 = vmatmul.msk.f32.vlgmr.msra.gmra.mxu2 %vm1459_vm1, %v3795_v7  ;;  %4800 = vmatmul.msk.f32.vlgmr.msrb.gmra.mxu3 %vm1459_vm1, %v3797_v4  ;;  %v4083_v60 = vpop.xlane.xlu2 %4082 }
0x1007   : > { %4810 = vmatpush.msk.msrb.mxu2 %vm1534_vm0, %v4122_v49  ;;  %4813 = vmatpush.msk.msra.mxu3 %vm1534_vm0, %v4176_v2 }
0x1009   : > { %4147 = vmatpush.msrb.mxu2 %v4977_v29  ;;  %4201 = vmatpush.msra.mxu3 %v4978_v55 }
0x100b   : > { %v3599_v16 = vpop.f32.mrf.mxu3 }
0x1022   : > { %v4089_v37 = vpop.xlane.xlu2 %4088 }
0x102a   : > { %v4086_v6 = vpop.xlane.xlu2 %4085 }
0x102d   : > { %v3784_v50 = vpop.xlane.xlu1 %3783 }
0x102e   : > { %5131 = vrcp.f32 %v3784_v50 }
0x102f   : > { %5133 = vrcp.f32 %v4083_v60 }
0x1034   : > { %v5132_v35 = vpop.eup %5131 }
0x1035   : > { %v3790_v54 = vpop.xlane.xlu1 %3789  ;;  %v3545_v56 = vpop.f32.mrf.mxu2  ;;  %v3796_v43 = vmul.f32 %v5132_v35, %v5120_v0 }
0x1036   : > { %5135 = vrcp.f32 %v3790_v54  ;;  %4213 = vrot.lane.b32.xlu0 %v3545_v56, %s7495_s28  ;;  %v5134_v20 = vpop.eup %5133 }
0x1037   : > { %4798 = vmatmul.msk.f32.gmra.mxu2 %vm1459_vm1, %v3796_v43  ;;  %5137 = vrcp.f32 %v4089_v37  ;;  %v4097_v45 = vmul.f32 %v5134_v20, %v7229_v32 }
0x1038   : > { %5139 = vrcp.f32 %v4086_v6 }
0x103c   : > { %v5136_v14 = vpop.eup %5135 }
0x103d   : > { %v3798_v24 = vmul.f32 %v5136_v14, %v5122_v63  ;;  %v5138_v21 = vpop.eup %5137  ;;  %v3548_v59 = vpop.f32.mrf.mxu2 }
0x103e   : > { %4217 = vrot.lane.b32.xlu0 %v3599_v16, %s7495_s28  ;;  %v5140_v62 = vpop.eup %5139  ;;  %v4099_v9 = vmul.f32 %v5138_v21, %v7237_v30  ;;  %v4990_v21 = vld [vmem:[%s7444_s9 + $0x1] ss:$0 sm:$0xff] }
0x103f   : > { %4801 = vmatmul.msk.f32.gmra.mxu3 %vm1459_vm1, %v3798_v24  ;;  %4811 = vmatmul.msk.f32.vlgmr.msrb.gmra.mxu2 %vm1459_vm1, %v4097_v45  ;;  %v4098_v26 = vmul.f32 %v5140_v62, %v7244_v8 }
0x1047   : > { %4812 = vmatmul.msk.f32.gmra.mxu2 %vm1459_vm1, %v4098_v26  ;;  %4814 = vmatmul.msk.f32.vlgmr.msra.gmra.mxu3 %vm1459_vm1, %v4099_v9 }
0x1048   : > { %v3602_v34 = vpop.f32.mrf.mxu3 }
0x106a   : > { %v4092_v15 = vpop.xlane.xlu2 %4091 }
0x106b   : > { %5141 = vrcp.f32 %v4092_v15 }
0x1071   : > { %v5142_v32 = vpop.eup %5141 }
0x1072   : > { %v4100_v5 = vmul.f32 %v5142_v32, %v5126_v28 }
0x1074   : > { %4815 = vmatmul.msk.f32.gmra.mxu3 %vm1459_vm1, %v4100_v5 }
0x1089   : > { %v3847_v58 = vpop.f32.mrf.mxu2  ;;  %v3901_v33 = vpop.f32.mrf.mxu3 }
0x108a   : > { %4229 = vrot.lane.b32.xlu2 %v3847_v58, %s5364_s22  ;;  %4233 = vrot.lane.b32.xlu0 %v3901_v33, %s5364_s22 }
0x1092   : > { %4215 = vrot.lane.b32.xlu0 %v3548_v59, %s7495_s28 }
0x10a8   : > { %v4214_v0 = vpop.permute.xlu0 %4213 }
0x10a9   : > { %v4257_v44 = vsel %vm1356_vm15, %v7263_v57, %v4214_v0 }
0x10b0   : > { %v4218_v63 = vpop.permute.xlu0 %4217 }
0x10b1   : > { %v4259_v4 = vsel %vm1356_vm15, %v7265_v22, %v4218_v63 }
0x10ba   : > { %v3850_v30 = vpop.f32.mrf.mxu2 }
0x10c2   : > { %v3904_v36 = vpop.f32.mrf.mxu3  ;;  %v4149_v51 = vpop.f32.mrf.mxu2 }
0x10c3   : > { %4245 = vrot.lane.b32.xlu1 %v4149_v51, %s5365_s24 }
0x10ca   : > { %v4152_v8 = vpop.f32.mrf.mxu2  ;;  %v4203_v25 = vpop.f32.mrf.mxu3 }
0x10cb   : > { %4231 = vrot.lane.b32.xlu1 %v3850_v30, %s5364_s22  ;;  %4247 = vrot.lane.b32.xlu0 %v4152_v8, %s5365_s24 }
0x10cc   : > { %4249 = vrot.lane.b32.xlu2 %v4203_v25, %s5365_s24 }
0x10d3   : > { %4235 = vrot.lane.b32.xlu1 %v3904_v36, %s5364_s22 }
0x10d4   : > { %4219 = vrot.lane.b32.xlu2 %v3602_v34, %s7495_s28  ;;  %s4557_s28 = sshll.u32 %s580_s25, 4  ;;  %s4558_s28 = int_to_ptr.vmem [resolvable:$true] %s4557_s28 }
0x10e4   : > { %v4230_v13 = vpop.permute.xlu2 %4229 }
0x10e5   : > { %v4261_v12 = vsel %vm2572_vm5, %v4257_v44, %v4230_v13  ;;  %v4828_v13 = vld [vmem:[%s7447_s12 + $0x38] sm:$0xff]  ;;  %v4827_v44 = vld [vmem:[%s7447_s12 + $0x30] sm:$0xff] }
0x10e6   : > { %4470 = vmatpush.msrb.mxu1 %v4828_v13 }
0x10e8   : > { %4471 = vmatpush.msrb.mxu1 %v4827_v44  ;;  %v4994_v44 = vld [vmem:[%s7450_s15 + $0x1] ss:$0 sm:$0xff] }
0x10f7   : > { %v4206_v27 = vpop.f32.mrf.mxu3 }
0x10f8   : > { %4251 = vrot.lane.b32.xlu0 %v4206_v27, %s5365_s24 }
0x10fc   : > { %v4234_v61 = vpop.permute.xlu0 %4233 }
0x10fd   : > { %v4263_v2 = vsel %vm2572_vm5, %v4259_v4, %v4234_v61 }
0x1104   : > { %v4216_v38 = vpop.permute.xlu0 %4215 }
0x1105   : > { %v4258_v17 = vsel %vm1356_vm15, %v7267_v11, %v4216_v38 }
0x1126   : > { %v4250_v39 = vpop.permute.xlu2 %4249 }
0x1127   : > { %v4267_v55 = vsel %vm2577_vm6, %v4263_v2, %v4250_v39  ;;  %v4992_v2 = vld [vmem:[#allocation7 + $0x1] ss:$0 sm:$0xff] }
0x1128   : > { %v4280_v60 = vrot.slane %v4267_v55, 1  ;;  %v4281_v50 = vrot.slane %v4267_v55, 2  ;;  %v4282_v11 = vrot.slane %v4267_v55, 3  ;;  %v4283_v37 = vrot.slane %v4267_v55, 4 }
0x1129   : > { %v4284_v35 = vrot.slane %v4267_v55, 5  ;;  %v4285_v22 = vrot.slane %v4267_v55, 6  ;;  %v4286_v54 = vrot.slane %v4267_v55, 7 }
0x112e   : > { %v4220_v43 = vpop.permute.xlu2 %4219 }
0x112f   : > { %v4260_v20 = vsel %vm1356_vm15, %v7269_v53, %v4220_v43 }
0x1135   : > { %v4246_v10 = vpop.permute.xlu1 %4245 }
0x1136   : > { %v4265_v52 = vsel %vm2577_vm6, %v4261_v12, %v4246_v10 }
0x1137   : > { %v4273_v48 = vrot.slane %v4265_v52, 1  ;;  %v4274_v19 = vrot.slane %v4265_v52, 2  ;;  %v4275_v49 = vrot.slane %v4265_v52, 3  ;;  %4297 = vst [vmem:[#allocation1] ss:$9 sm:$0xff] %v4265_v52  ;;  %v4276_v28 = vrot.slane %v4265_v52, 4 }
0x1138   : > { %v4277_v46 = vrot.slane %v4265_v52, 5  ;;  %v4278_v3 = vrot.slane %v4265_v52, 6  ;;  %v4279_v47 = vrot.slane %v4265_v52, 7  ;;  %v4826_v52 = vld [vmem:[%s7447_s12 + $0x28] sm:$0xff] }
0x1139   : > { %4299 = vst [vmem:[#allocation1 + $0x1] ss:$9 sm:$0xff] %v4273_v48  ;;  %4472 = vmatpush.msrb.mxu1 %v4826_v52 }
0x113a   : > { %4301 = vst [vmem:[#allocation1 + $0x2] ss:$9 sm:$0xff] %v4274_v19  ;;  %v4825_v19 = vld [vmem:[%s7447_s12 + $0x20] sm:$0xff] }
0x113b   : > { %4303 = vst [vmem:[#allocation1 + $0x3] ss:$9 sm:$0xff] %v4275_v49  ;;  %4473 = vmatpush.msrb.mxu1 %v4825_v19 }
0x113c   : > { %4305 = vst [vmem:[#allocation1 + $0x4] ss:$9 sm:$0xff] %v4276_v28 }
0x113d   : > { %4307 = vst [vmem:[#allocation1 + $0x5] ss:$9 sm:$0xff] %v4277_v46  ;;  %v4232_v31 = vpop.permute.xlu1 %4231  ;;  %v4248_v7 = vpop.permute.xlu0 %4247 }
0x113e   : > { %4309 = vst [vmem:[#allocation1 + $0x6] ss:$9 sm:$0xff] %v4278_v3  ;;  %v4262_v18 = vsel %vm2572_vm5, %v4258_v17, %v4232_v31 }
0x113f   : > { %4311 = vst [vmem:[#allocation1 + $0x7] ss:$9 sm:$0xff] %v4279_v47  ;;  %v4266_v29 = vsel %vm2577_vm6, %v4262_v18, %v4248_v7  ;;  %v4991_v18 = vld [vmem:[%s7445_s10 + $0x1] ss:$0 sm:$0xff] }
0x1145   : > { %v4236_v6 = vpop.permute.xlu1 %4235 }
0x1146   : > { %v4312_v57 = vld [vmem:[#allocation1] sm:$0xff]  ;;  %v4264_v14 = vsel %vm2572_vm5, %v4260_v20, %v4236_v6  ;;  %v4839_v6 = vld [vmem:[%s7449_s14 + $0x78] sm:$0xff]  ;;  %v4838_v20 = vld [vmem:[%s7449_s14 + $0x70] sm:$0xff] }
0x1147   : > { %4821 = vmatmul.msk.f32.vlgmr.msrb.gmra.mxu0 %vm878_vm3, %v4312_v57  ;;  %4313 = vst [vmem:[#allocation1] ss:$9 sm:$0xff] %v4266_v29  ;;  %4513 = vmatpush.msra.mxu2 %v4839_v6 }
0x1148   : > { %4314 = vst [vmem:[#allocation1 + $0x1] ss:$9 sm:$0xff] %v4267_v55 }
0x1149   : > { %4315 = vst [vmem:[#allocation1 + $0x2] ss:$9 sm:$0xff] %v4280_v60  ;;  %4514 = vmatpush.msra.mxu2 %v4838_v20 }
0x114a   : > { %4316 = vst [vmem:[#allocation1 + $0x3] ss:$9 sm:$0xff] %v4281_v50 }
0x114b   : > { %4317 = vst [vmem:[#allocation1 + $0x4] ss:$9 sm:$0xff] %v4282_v11 }
0x114c   : > { %4318 = vst [vmem:[#allocation1 + $0x5] ss:$9 sm:$0xff] %v4283_v37 }
0x114d   : > { %4319 = vst [vmem:[#allocation1 + $0x6] ss:$9 sm:$0xff] %v4284_v35 }
0x114e   : > { %4320 = vst [vmem:[#allocation1 + $0x7] ss:$9 sm:$0xff] %v4285_v22 }
0x1155   : > { %v4321_v56 = vld [vmem:[#allocation1] sm:$0xff] }
0x1156   : > { %4822 = vmatmul.msk.f32.gmra.mxu0 %vm878_vm3, %v4321_v56  ;;  %4322 = vst [vmem:[#allocation1] ss:$9 sm:$0xff] %v4286_v54 }
0x116a   : > { %v4252_v45 = vpop.permute.xlu0 %4251 }
0x116b   : > { %v4268_v16 = vsel %vm2577_vm6, %v4264_v14, %v4252_v45  ;;  %v4837_v14 = vld [vmem:[%s7449_s14 + $0x68] sm:$0xff] }
0x116c   : > { %4323 = vst [vmem:[#allocation1 + $0x1] ss:$9 sm:$0xff] %v4268_v16  ;;  %4515 = vmatpush.msra.mxu2 %v4837_v14 }
0x1173   : > { %v4324_v24 = vld [vmem:[#allocation1] sm:$0xff] }
0x1174   : > { %4823 = vmatmul.msk.f32.gmra.mxu0 %vm878_vm3, %v4324_v24  ;;  %v4836_v24 = vld [vmem:[%s7449_s14 + $0x60] sm:$0xff] }
0x1175   : > { %4516 = vmatpush.msra.mxu2 %v4836_v24 }
0x11c4   : > { %v4348_v62 = vpop.f32.mrf.mxu0 }
0x11c5   : > { %v7326_v9 = vadd.f32 %v4990_v21, %v4348_v62  ;;  %v4835_v62 = vld [vmem:[%s7449_s14 + $0x58] sm:$0xff] }
0x11c6   : > { %4517 = vmatpush.msra.mxu2 %v4835_v62 }
0x11c7   : > { %v4361_v26 = vsel %vm878_vm3, %v7326_v9, 0.0 }
0x11c8   : > { %4362 = vadd.xlane.f32.xlu2 %v4361_v26 }
0x11d3   : > { %v4351_v53 = vpop.f32.mrf.mxu0 }
0x11d4   : > { %v7330_v15 = vadd.f32 %v4990_v21, %v4351_v53 }
0x11d6   : > { %v4364_v32 = vsel %vm878_vm3, %v7330_v15, 0.0 }
0x11d7   : > { %4365 = vadd.xlane.f32.xlu1 %v4364_v32 }
0x11f1   : > { %v4354_v5 = vpop.f32.mrf.mxu0 }
0x11f2   : > { %v4355_v59 = vadd.f32 %v4990_v21, %v4354_v5 }
0x11f4   : > { %v4367_v34 = vsel %vm885_vm4, %v4355_v59, 0.0 }
0x11f5   : > { %4368 = vadd.xlane.f32.xlu0 %v4367_v34 }
0x123b   : > { %v4363_v58 = vpop.xlane.xlu2 %4362 }
0x123c   : > { %v4370_v33 = vmul.f32 %v4363_v58, %v5624_v42 }
0x123e   : > { %v4373_v30 = vsub.f32 %v7326_v9, %v4370_v33 }
0x1240   : > { %v4376_v36 = vmul.f32 %v4373_v30, %v4373_v30 }
0x1242   : > { %v4379_v51 = vsel %vm878_vm3, %v4376_v36, 0.0  ;;  %v4834_v36 = vld [vmem:[%s7449_s14 + $0x50] sm:$0xff] }
0x1243   : > { %4380 = vadd.xlane.f32.xlu2 %v4379_v51  ;;  %v4833_v51 = vld [vmem:[%s7449_s14 + $0x48] sm:$0xff]  ;;  %4518 = vmatpush.msra.mxu2 %v4834_v36 }
0x1245   : > { %4519 = vmatpush.msra.mxu2 %v4833_v51 }
0x124a   : > { %v4366_v8 = vpop.xlane.xlu1 %4365 }
0x124b   : > { %v4371_v25 = vmul.f32 %v4366_v8, %v5624_v42  ;;  %v4832_v8 = vld [vmem:[%s7449_s14 + $0x40] sm:$0xff] }
0x124c   : > { %4520 = vmatpush.msra.mxu2 %v4832_v8 }
0x124d   : > { %v4374_v27 = vsub.f32 %v7330_v15, %v4371_v25  ;;  %v4993_v25 = vld [vmem:[#allocation8 + $0x1] ss:$0 sm:$0xff] }
0x124f   : > { %v4377_v0 = vmul.f32 %v4374_v27, %v4374_v27 }
0x1251   : > { %v4382_v40 = vsel %vm878_vm3, %v4377_v0, 0.0 }
0x1252   : > { %4383 = vadd.xlane.f32.xlu1 %v4382_v40 }
0x1268   : > { %v4369_v41 = vpop.xlane.xlu0 %4368 }
0x1269   : > { %v4372_v1 = vmul.f32 %v4369_v41, %v5624_v42 }
0x126b   : > { %v7342_v23 = vsub.f32 %v4355_v59, %v4372_v1 }
0x126d   : > { %v4378_v63 = vmul.f32 %v7342_v23, %v7342_v23 }
0x126f   : > { %v4385_v61 = vsel %vm885_vm4, %v4378_v63, 0.0 }
0x1270   : > { %4386 = vadd.xlane.f32.xlu0 %v4385_v61 }
0x12b6   : > { %v4381_v12 = vpop.xlane.xlu2 %4380 }
0x12b7   : > { %v4388_v10 = vmul.f32 %v4381_v12, %v5624_v42 }
0x12b9   : > { %v4391_v48 = vadd.f32 1e-05, %v4388_v10 }
0x12bb   : > { %5143 = vrsqrt.f32 %v4391_v48  ;;  %vm4400_vm15 = vweird.f32 %v4391_v48 }
0x12c1   : > { %v5144_v49 = vpop.eup %5143 }
0x12c2   : > { %v4395_v28 = vmul.f32 %v5144_v49, %v4391_v48  ;;  %vm4401_vm4 = vweird.f32 %v5144_v49 }
0x12c3   : > { %vm4402_vm0 = vmor %vm4400_vm15, %vm4401_vm4 }
0x12c4   : > { %v4396_v38 = vmul.f32 %v5144_v49, %v4395_v28 }
0x12c5   : > { %v4384_v46 = vpop.xlane.xlu1 %4383 }
0x12c6   : > { %v4397_v3 = vmul.f32 0.5, %v4396_v38  ;;  %v4389_v47 = vmul.f32 %v4384_v46, %v5624_v42 }
0x12c8   : > { %v4398_v31 = vsub.f32 1.5, %v4397_v3  ;;  %v4392_v17 = vadd.f32 1e-05, %v4389_v47 }
0x12ca   : > { %v4399_v39 = vmul.f32 %v5144_v49, %v4398_v31  ;;  %5145 = vrsqrt.f32 %v4392_v17  ;;  %vm4410_vm2 = vweird.f32 %v4392_v17 }
0x12cc   : > { %v4403_v7 = vsel %vm4402_vm0, %v5144_v49, %v4399_v39 }
0x12cd   : > { %v4424_v4 = vmul.f32 %v4403_v7, %v4373_v30 }
0x12cf   : > { %v4430_v55 = vmul.f32 %v4991_v18, %v4424_v4 }
0x12d0   : > { %v5146_v29 = vpop.eup %5145 }
0x12d1   : > { %v4405_v57 = vmul.f32 %v5146_v29, %v4392_v17  ;;  %v4436_v60 = vadd.f32 %v4992_v2, %v4430_v55  ;;  %vm4411_vm1 = vweird.f32 %v5146_v29 }
0x12d2   : > { %vm4412_vm5 = vmor %vm4410_vm2, %vm4411_vm1 }
0x12d3   : > { %v4406_v50 = vmul.f32 %v5146_v29, %v4405_v57  ;;  %4829 = vmatmul.msk.f32.vlgmr.msrb.gmra.mxu1 %vm878_vm3, %v4436_v60 }
0x12d5   : > { %v4407_v11 = vmul.f32 0.5, %v4406_v50 }
0x12d7   : > { %v4408_v37 = vsub.f32 1.5, %v4407_v11 }
0x12d9   : > { %v4409_v35 = vmul.f32 %v5146_v29, %v4408_v37 }
0x12db   : > { %v4413_v22 = vsel %vm4412_vm5, %v5146_v29, %v4409_v35 }
0x12dc   : > { %v4425_v54 = vmul.f32 %v4413_v22, %v4374_v27 }
0x12de   : > { %v4431_v56 = vmul.f32 %v4991_v18, %v4425_v54 }
0x12e0   : > { %v4437_v43 = vadd.f32 %v4992_v2, %v4431_v56 }
0x12e2   : > { %4830 = vmatmul.msk.f32.gmra.mxu1 %vm878_vm3, %v4437_v43 }
0x12e3   : > { %v4387_v45 = vpop.xlane.xlu0 %4386 }
0x12e4   : > { %v4390_v16 = vmul.f32 %v4387_v45, %v5624_v42 }
0x12e6   : > { %v4393_v21 = vadd.f32 1e-05, %v4390_v16 }
0x12e8   : > { %5147 = vrsqrt.f32 %v4393_v21  ;;  %vm4420_vm11 = vweird.f32 %v4393_v21 }
0x12ee   : > { %v5148_v26 = vpop.eup %5147 }
0x12ef   : > { %v4415_v53 = vmul.f32 %v5148_v26, %v4393_v21  ;;  %vm4421_vm6 = vweird.f32 %v5148_v26 }
0x12f0   : > { %vm4422_vm12 = vmor %vm4420_vm11, %vm4421_vm6 }
0x12f1   : > { %v4416_v32 = vmul.f32 %v5148_v26, %v4415_v53 }
0x12f3   : > { %v4417_v5 = vmul.f32 0.5, %v4416_v32 }
0x12f5   : > { %v4418_v59 = vsub.f32 1.5, %v4417_v5 }
0x12f7   : > { %v4419_v42 = vmul.f32 %v5148_v26, %v4418_v59 }
0x12f9   : > { %v4423_v34 = vsel %vm4422_vm12, %v5148_v26, %v4419_v42 }
0x12fa   : > { %v4426_v58 = vmul.f32 %v4423_v34, %v7342_v23 }
0x12fc   : > { %v4432_v33 = vmul.f32 %v4991_v18, %v4426_v58 }
0x12fe   : > { %v4438_v30 = vadd.f32 %v4992_v2, %v4432_v33 }
0x1300   : > { %4831 = vmatmul.msk.f32.gmra.mxu1 %vm878_vm3, %v4438_v30  ;;  %vm4542_vm3 = vcmask 253952  }
0x1350   : > { %v4475_v27 = vpop.f32.mrf.mxu1 }
0x1351   : > { %v4476_v0 = vadd.f32 %v4993_v25, %v4475_v27 }
0x1353   : > { %v4484_v40 = vmax.f32 %v4476_v0, 0.0 }
0x1355   : > { %4840 = vmatmul.msk.f32.vlgmr.msra.gmra.mxu2 %vm2802_vm8, %v4484_v40 }
0x135f   : > { %v4478_v41 = vpop.f32.mrf.mxu1 }
0x1360   : > { %v4479_v1 = vadd.f32 %v4993_v25, %v4478_v41 }
0x1362   : > { %v4485_v23 = vmax.f32 %v4479_v1, 0.0 }
0x1364   : > { %4841 = vmatmul.msk.f32.gmra.mxu2 %vm2802_vm8, %v4485_v23 }
0x137d   : > { %v4481_v63 = vpop.f32.mrf.mxu1 }
0x137e   : > { %v4482_v61 = vadd.f32 %v4993_v25, %v4481_v63 }
0x1380   : > { %v4486_v13 = vmax.f32 %v4482_v61, 0.0 }
0x1382   : > { %4842 = vmatmul.msk.f32.gmra.mxu2 %vm2802_vm8, %v4486_v13 }
0x13d8   : > { %v4522_v12 = vpop.f32.mrf.mxu2 }
0x13d9   : > { %v4530_v10 = vadd.f32 %v4522_v12, %v7326_v9 }
0x13db   : > { %v4537_v52 = vadd.f32 %v4994_v44, %v4530_v10 }
0x13dd   : > { %4543 = vst.msk [vmem:[%s580_s25] sm:$0x1] %vm4542_vm3, %v4537_v52 }
0x13e7   : > { %v4525_v48 = vpop.f32.mrf.mxu2 }
0x13e8   : > { %v4531_v19 = vadd.f32 %v4525_v48, %v7330_v15 }
0x13ea   : > { %v4538_v49 = vadd.f32 %v4994_v44, %v4531_v19 }
0x13ec   : > { %v4540_v28 = vrot.slane %v4538_v49, 1 }
0x13ee   : > { %4544 = vst.msk [vmem:[%s580_s25 + $0x1] sm:$0x1] %vm4542_vm3, %v4540_v28 }
0x13ef   : > { %5296 = shalt.err (!%p5293_p8)
}
0x13f0   : > { %s5366_s27 = smov 1  }
0x13f1   : > { %4867 = dma.vmem_to_hbm [thread:$0]  (%p5490_p5), %s4558_s28, 32, %s4560_s23, %s4546_s30, %s5364_s22, %s5364_s22, %s5366_s27  }
0x1405   : > { %v4528_v9 = vpop.f32.mrf.mxu2 }
0x1406 PF: > { %s7499_s25 = sld [smem:[#allocation18_spill]] }
0x1407   : > { %s7500_s21 = sld [smem:[#allocation15_spill]] }
0x140c   : > { %p4894_p9 = scmp.ge.s32.totalorder %s7499_s25, 2 }
0x140d   : > { %s4574_s20 = sand.u32 1, %s7500_s21  }
0x140e   : > { %p4883_p10 = pnand %p4894_p9, %p5494_p6  ;;  %s4575_s19 = scalar_lea.sflag [#allocation4], %s4574_s20 }
0x1410   : > { %p4884_p11 = pneg %p4883_p10 }
0x1412   : > { %5326 = dma.done.wait (%p4884_p11), %s4575_s19, 32  }
0x1413   : > { %5328 = vsyncadd (%p4884_p11), %s4575_s19, 4294967264  ;;  %s7502_s24 = sld [smem:[#allocation19_spill]] }
0x1414   : > { %s7503_s21 = sld [smem:[#allocation16_spill]] }
0x1415   : > { %s7504_s22 = sld [smem:[#allocation17_spill]] }
0x1416   : > { %s7505_s23 = sld [smem:[#allocation20_spill]] }
0x1419   : > { %p29_p12 = scmp.ge.s32.totalorder %s7502_s24, 4  }
0x141b   :  { %31 = sbr.rel (!%p29_p12) target bundleno = 11 (0xb), region = 532 }
0x1420   :  { %4581 = vsyncpa [#allocation3], 1 }
0x1421   :  { %4583 = vsyncpa [#allocation3 + $0x1], 1 }
0x1422   :  { %4584 = vsyncpa [#allocation6], 1 }
0x1423   :  { %4585 = vsyncpa [#allocation9], 1 }
0x1424   :  { %4586 = vsyncpa [#allocation4], 1 }
0x1425   :  { %4588 = vsyncpa [#allocation4 + $0x1], 1 }

</bundles_post_ra>
